<compile_context>
chip_gen: v7x
topology: tpu7x:2x2x1
jax: 0.10.0
libtpu: 0.0.40
codegen_flags: <defaults>
</compile_context>

<pallas_src>
import functools

import jax
import jax.numpy as jnp
import numpy as np
from jax.experimental import pallas as pl
from jax.experimental.pallas import tpu as pltpu

LEAK = 0.2
BN_EPS = 1e-5
CIN_PAD = 8      # conv1 input channels padded 6 -> 8
OUT_PAD = 128    # transform output padded 9 -> 128 (lane-dense store)


def _leaky(v):
    # leaky_relu with slope 0.2 (max works because slope < 1)
    return jnp.maximum(v, LEAK * v)


def _bf16(v):
    return v.astype(jnp.bfloat16)


# ----------------------------------------------------------------------------
# Single fused kernel: conv1 -> conv2 -> max_K -> conv3 -> max_N -> MLP head
# ----------------------------------------------------------------------------
def _transform_net_kernel(x_ref, w1_ref, b1_ref, w2_ref, b2_ref, w3_ref, b3_ref,
                          wl1_ref, b4_ref, wl2_ref, b5_ref, wt_ref, bt_ref,
                          out_ref, feat_ref, *, k_neighbors, tile_n):
    nt = pl.program_id(1)

    # conv1 (8->64) + conv2 (64->128) over K * tile_n positions (one big matmul M)
    xb = x_ref[0].reshape(k_neighbors * tile_n, CIN_PAD)                  # bf16
    h1 = jnp.dot(xb, w1_ref[...], preferred_element_type=jnp.float32)
    h1 = _leaky(h1 + b1_ref[...])                                         # (K*TN, 64) f32
    h2 = jnp.dot(_bf16(h1), w2_ref[...], preferred_element_type=jnp.float32)
    h2 = _leaky(h2 + b2_ref[...])                                         # (K*TN, 128) f32

    # max over K neighbors: split on the MAJOR axis (K) -> pure VPU maxes
    h2m = h2.reshape(k_neighbors, tile_n, h2.shape[-1]).max(axis=0)       # (TN, 128)

    # conv3 (128->1024) + max over this tile's points
    h3 = jnp.dot(_bf16(h2m), w3_ref[...], preferred_element_type=jnp.float32)
    h3 = _leaky(h3 + b3_ref[...])                                         # (TN, 1024)
    tile_max = h3.max(axis=0, keepdims=True)                              # (1, 1024)

    # running max over point tiles, accumulated in the feature output block
    @pl.when(nt == 0)
    def _():
        feat_ref[0] = tile_max

    @pl.when(nt > 0)
    def _():
        feat_ref[0] = jnp.maximum(feat_ref[0], tile_max)

    # MLP head fused into the last point-tile step (per batch element)
    @pl.when(nt == pl.num_programs(1) - 1)
    def _():
        f = feat_ref[0]                                                   # (1, 1024) f32
        h4 = jnp.dot(_bf16(f), wl1_ref[...], preferred_element_type=jnp.float32)
        h4 = _leaky(h4 + b4_ref[...])                                     # (1, 512)
        h5 = jnp.dot(_bf16(h4), wl2_ref[...], preferred_element_type=jnp.float32)
        h5 = _leaky(h5 + b5_ref[...])                                     # (1, 256)
        out_ref[0] = (jnp.dot(_bf16(h5), wt_ref[...],
                              preferred_element_type=jnp.float32)
                      + bt_ref[...])                                      # (1, 128)


def _pick_tile_n(n, max_rows=512):
    """Largest point-tile <= max_rows that divides n and keeps bf16/f32 tiling
    friendly (multiple of 16). Falls back to the whole axis."""
    if n <= max_rows:
        return n
    t = (max_rows // 16) * 16
    while t >= 16:
        if n % t == 0:
            return t
        t -= 16
    return n


def transform_net_forward(x_nchw, p, *, max_tile_n=512):
    """x_nchw: (B, 6, N, K) float32 -> ((B, 3, 3) transforms, (B, 1024) global feat)."""
    B, cin, N, K = x_nchw.shape
    # glue: NCHW -> (B, K, N, C); pad C 6->8 with zeros; cast to bf16 for the MXU.
    x = jnp.transpose(x_nchw, (0, 3, 2, 1))
    x = jnp.pad(x, ((0, 0), (0, 0), (0, 0), (0, CIN_PAD - cin))).astype(jnp.bfloat16)

    tile_n = _pick_tile_n(N, max_tile_n)
    assert N % tile_n == 0
    n_tiles = N // tile_n

    def _const(shape):  # weight/bias operand resident across the whole grid
        return pl.BlockSpec(shape, lambda b, nt: (0,) * len(shape))

    out128, feat = pl.pallas_call(
        functools.partial(_transform_net_kernel, k_neighbors=K, tile_n=tile_n),
        out_shape=(jax.ShapeDtypeStruct((B, 1, OUT_PAD), jnp.float32),
                   jax.ShapeDtypeStruct((B, 1, 1024), jnp.float32)),
        grid=(B, n_tiles),
        in_specs=[
            pl.BlockSpec((1, K, tile_n, CIN_PAD), lambda b, nt: (b, 0, nt, 0)),
            _const((CIN_PAD, 64)), _const((1, 64)),
            _const((64, 128)), _const((1, 128)),
            _const((128, 1024)), _const((1, 1024)),
            _const((1024, 512)), _const((1, 512)),
            _const((512, 256)), _const((1, 256)),
            _const((256, OUT_PAD)), _const((1, OUT_PAD)),
        ],
        out_specs=(pl.BlockSpec((1, 1, OUT_PAD), lambda b, nt: (b, 0, 0)),
                   pl.BlockSpec((1, 1, 1024), lambda b, nt: (b, 0, 0))),
        compiler_params=pltpu.CompilerParams(
            dimension_semantics=("parallel", "arbitrary"),
            vmem_limit_bytes=32 * 1024 * 1024),
    )(x, p["w1"], p["b1"], p["w2"], p["b2"], p["w3"], p["b3"],
      p["wl1"], p["b4"], p["wl2"], p["b5"], p["wt"], p["bt"])

    out = out128[:, 0, :9].reshape(B, 3, 3)
    return out, feat.reshape(B, 1024)


# ----------------------------------------------------------------------------
# Deterministic parameter construction (shapes from Transform_Net.__init__),
# with eval-mode BN folded: scale -> weight columns (bf16), shift kept (f32).
# ----------------------------------------------------------------------------
def init_params(key):
    ks = jax.random.split(key, 10)

    def bn_fold(k, c):
        kk = jax.random.split(k, 4)
        gamma = 1.0 + 0.1 * jax.random.normal(kk[0], (c,), jnp.float32)
        beta = 0.1 * jax.random.normal(kk[1], (c,), jnp.float32)
        mean = 0.1 * jax.random.normal(kk[2], (c,), jnp.float32)
        var = jax.random.uniform(kk[3], (c,), jnp.float32, 0.5, 1.5)
        scale = gamma / jnp.sqrt(var + BN_EPS)
        shift = beta - mean * scale
        return scale, shift

    w1 = 0.1 * jax.random.normal(ks[0], (64, 6), jnp.float32)       # Conv2d(6,64,1,bias=False)
    w2 = 0.1 * jax.random.normal(ks[1], (128, 64), jnp.float32)     # Conv2d(64,128,1,bias=False)
    w3 = 0.1 * jax.random.normal(ks[2], (1024, 128), jnp.float32)   # Conv1d(128,1024,1,bias=False)
    wl1 = 0.05 * jax.random.normal(ks[3], (512, 1024), jnp.float32)  # Linear(1024,512,bias=False)
    wl2 = 0.05 * jax.random.normal(ks[4], (256, 512), jnp.float32)   # Linear(512,256,bias=False)
    wt = jnp.zeros((9, 256), jnp.float32)                            # init.constant_(weight, 0)
    bt = jnp.eye(3, dtype=jnp.float32).reshape(9)                    # init.eye_(bias.view(3,3))

    s1, b1 = bn_fold(ks[5], 64)
    s2, b2 = bn_fold(ks[6], 128)
    s3, b3 = bn_fold(ks[7], 1024)
    s4, b4 = bn_fold(ks[8], 512)
    s5, b5 = bn_fold(ks[9], 256)

    def fold(w, scale):   # (out, in) -> BN-scaled, transposed, bf16 (in, out)
        return (w.T * scale[None, :]).astype(jnp.bfloat16)

    w1a = jnp.zeros((CIN_PAD, 64), jnp.bfloat16).at[:6].set(fold(w1, s1))
    wta = jnp.zeros((256, OUT_PAD), jnp.float32).at[:, :9].set(wt.T).astype(jnp.bfloat16)
    bta = jnp.zeros((1, OUT_PAD), jnp.float32).at[0, :9].set(bt)

    return dict(
        w1=w1a, b1=b1.reshape(1, 64),
        w2=fold(w2, s2), b2=b2.reshape(1, 128),
        w3=fold(w3, s3), b3=b3.reshape(1, 1024),
        wl1=fold(wl1, s4), b4=b4.reshape(1, 512),
        wl2=fold(wl2, s5), b5=b5.reshape(1, 256),
        wt=wta, bt=bta,
    )


# ----------------------------------------------------------------------------
# Pure-JAX reference (same folded params, same bf16-dot math) for validation
# ----------------------------------------------------------------------------
def ref_forward(x_nchw, p):
    B, cin, N, K = x_nchw.shape
    x = jnp.transpose(x_nchw, (0, 3, 2, 1))
    x = jnp.pad(x, ((0, 0), (0, 0), (0, 0), (0, CIN_PAD - cin))).astype(jnp.bfloat16)

    def dot(a, b):
        return jnp.dot(a.astype(jnp.bfloat16), b, preferred_element_type=jnp.float32)

    h0 = x.reshape(B, K * N, CIN_PAD)
    h1 = _leaky(dot(h0, p["w1"]) + p["b1"])                     # (B, K*N, 64)
    h2 = _leaky(dot(h1, p["w2"]) + p["b2"])                     # (B, K*N, 128)
    h2 = h2.reshape(B, K, N, 128).max(axis=1)                   # max over K -> (B, N, 128)
    h3 = _leaky(dot(h2, p["w3"]) + p["b3"])                     # (B, N, 1024)
    feat = h3.max(axis=1)                                        # max over N -> (B, 1024)
    h4 = _leaky(dot(feat, p["wl1"]) + p["b4"])
    h5 = _leaky(dot(h4, p["wl2"]) + p["b5"])
    out = dot(h5, p["wt"]) + p["bt"]                             # (B, 128)
    return out[:, :9].reshape(B, 3, 3), feat


if __name__ == "__main__":
    key = jax.random.PRNGKey(0)
    pkey, xkey, wkey = jax.random.split(key, 3)
    params = init_params(pkey)

    # PyTorch inits transform.weight to 0 (so the output would be the identity
    # matrix for any input); perturb the first 9 real columns here so the test
    # actually exercises the full fused head numerics.
    noise = (0.02 * jax.random.normal(wkey, (256, 9), jnp.float32)).astype(jnp.bfloat16)
    params["wt"] = params["wt"].at[:, :9].add(noise)

    B, CIN, N, K = 2, 6, 16, 16      # (batch, edge-feature channels, points, neighbors)
    x = jax.random.normal(xkey, (B, CIN, N, K), jnp.float32)

    out, feat = transform_net_forward(x, params)
    out = jax.block_until_ready(out)
    feat = jax.block_until_ready(feat)

    ref_out, ref_feat = ref_forward(x, params)
    assert out.shape == (B, 3, 3)
    np.testing.assert_allclose(np.asarray(feat), np.asarray(ref_feat), rtol=1e-3, atol=1e-3)
    np.testing.assert_allclose(np.asarray(out), np.asarray(ref_out), rtol=1e-3, atol=1e-3)
    print("KERNEL_OK")
</pallas_src>

<mosaic_0001>
module attributes {stable_mosaic.version = 11 : i64} {
  func.func @_transform_net_kernel(%arg0: i32, %arg1: i32, %arg2: memref<1x16x16x8xbf16, #tpu.memory_space<vmem>>, %arg3: memref<8x64xbf16, #tpu.memory_space<vmem>>, %arg4: memref<1x64xf32, #tpu.memory_space<vmem>>, %arg5: memref<64x128xbf16, #tpu.memory_space<vmem>>, %arg6: memref<1x128xf32, #tpu.memory_space<vmem>>, %arg7: memref<128x1024xbf16, #tpu.memory_space<vmem>>, %arg8: memref<1x1024xf32, #tpu.memory_space<vmem>>, %arg9: memref<1024x512xbf16, #tpu.memory_space<vmem>>, %arg10: memref<1x512xf32, #tpu.memory_space<vmem>>, %arg11: memref<512x256xbf16, #tpu.memory_space<vmem>>, %arg12: memref<1x256xf32, #tpu.memory_space<vmem>>, %arg13: memref<256x128xbf16, #tpu.memory_space<vmem>>, %arg14: memref<1x128xf32, #tpu.memory_space<vmem>>, %arg15: memref<1x1x128xf32, #tpu.memory_space<vmem>>, %arg16: memref<1x1x1024xf32, #tpu.memory_space<vmem>>) attributes {dimension_semantics = [#tpu.dimension_semantics<parallel>, #tpu.dimension_semantics<arbitrary>], iteration_bounds = array<i64: 2, 1>, scalar_prefetch = 0 : i64, scratch_operands = 0 : i64, tpu.core_type = #tpu.core_type<tc>, window_params = [{transform_indices = @transform_0, window_bounds = array<i64: 1, 16, 16, 8>}, {pipeline_mode = #tpu.pipeline_mode<synchronous>, transform_indices = @transform_1, window_bounds = array<i64: 8, 64>}, {pipeline_mode = #tpu.pipeline_mode<synchronous>, transform_indices = @transform_2, window_bounds = array<i64: 1, 64>}, {pipeline_mode = #tpu.pipeline_mode<synchronous>, transform_indices = @transform_3, window_bounds = array<i64: 64, 128>}, {pipeline_mode = #tpu.pipeline_mode<synchronous>, transform_indices = @transform_4, window_bounds = array<i64: 1, 128>}, {pipeline_mode = #tpu.pipeline_mode<synchronous>, transform_indices = @transform_5, window_bounds = array<i64: 128, 1024>}, {pipeline_mode = #tpu.pipeline_mode<synchronous>, transform_indices = @transform_6, window_bounds = array<i64: 1, 1024>}, {pipeline_mode = #tpu.pipeline_mode<synchronous>, transform_indices = @transform_7, window_bounds = array<i64: 1024, 512>}, {pipeline_mode = #tpu.pipeline_mode<synchronous>, transform_indices = @transform_8, window_bounds = array<i64: 1, 512>}, {pipeline_mode = #tpu.pipeline_mode<synchronous>, transform_indices = @transform_9, window_bounds = array<i64: 512, 256>}, {pipeline_mode = #tpu.pipeline_mode<synchronous>, transform_indices = @transform_10, window_bounds = array<i64: 1, 256>}, {pipeline_mode = #tpu.pipeline_mode<synchronous>, transform_indices = @transform_11, window_bounds = array<i64: 256, 128>}, {pipeline_mode = #tpu.pipeline_mode<synchronous>, transform_indices = @transform_12, window_bounds = array<i64: 1, 128>}, {transform_indices = @transform_13, window_bounds = array<i64: 1, 1, 128>}, {transform_indices = @transform_14, window_bounds = array<i64: 1, 1, 1024>}]} {
    %c0 = arith.constant 0 : index
    %c0_0 = arith.constant 0 : index
    %c0_1 = arith.constant 0 : index
    %c0_2 = arith.constant 0 : index
    %0 = vector.load %arg2[%c0, %c0_0, %c0_1, %c0_2] : memref<1x16x16x8xbf16, #tpu.memory_space<vmem>>, vector<1x16x16x8xbf16>
    %1 = vector.shape_cast %0 : vector<1x16x16x8xbf16> to vector<16x16x8xbf16>
    %2 = vector.shape_cast %1 : vector<16x16x8xbf16> to vector<256x8xbf16>
    %c0_3 = arith.constant 0 : index
    %c0_4 = arith.constant 0 : index
    %3 = vector.load %arg3[%c0_3, %c0_4] : memref<8x64xbf16, #tpu.memory_space<vmem>>, vector<8x64xbf16>
    %cst = arith.constant dense<0.000000e+00> : vector<256x64xf32>
    %4 = tpu.matmul %2, %3, %cst {dimension_numbers = #tpu.dot_dimension_numbers<[1], [0], [0], [1], [0, 0, 1, 1], [], []>} : vector<256x8xbf16>, vector<8x64xbf16>, vector<256x64xf32> -> vector<256x64xf32>
    %c0_5 = arith.constant 0 : index
    %c0_6 = arith.constant 0 : index
    %5 = vector.load %arg4[%c0_5, %c0_6] : memref<1x64xf32, #tpu.memory_space<vmem>>, vector<1x64xf32>
    %6 = vector.broadcast %5 : vector<1x64xf32> to vector<256x64xf32>
    %7 = arith.addf %4, %6 : vector<256x64xf32>
    %cst_7 = arith.constant 2.000000e-01 : f32
    %8 = vector.broadcast %cst_7 : f32 to vector<256x64xf32>
    %9 = arith.mulf %8, %7 : vector<256x64xf32>
    %10 = arith.maximumf %7, %9 : vector<256x64xf32>
    %11 = arith.truncf %10 : vector<256x64xf32> to vector<256x64xbf16>
    %c0_8 = arith.constant 0 : index
    %c0_9 = arith.constant 0 : index
    %12 = vector.load %arg5[%c0_8, %c0_9] : memref<64x128xbf16, #tpu.memory_space<vmem>>, vector<64x128xbf16>
    %cst_10 = arith.constant dense<0.000000e+00> : vector<256x128xf32>
    %13 = tpu.matmul %11, %12, %cst_10 {dimension_numbers = #tpu.dot_dimension_numbers<[1], [0], [0], [1], [0, 0, 1, 1], [], []>} : vector<256x64xbf16>, vector<64x128xbf16>, vector<256x128xf32> -> vector<256x128xf32>
    %c0_11 = arith.constant 0 : index
    %c0_12 = arith.constant 0 : index
    %14 = vector.load %arg6[%c0_11, %c0_12] : memref<1x128xf32, #tpu.memory_space<vmem>>, vector<1x128xf32>
    %15 = vector.broadcast %14 : vector<1x128xf32> to vector<256x128xf32>
    %16 = arith.addf %13, %15 : vector<256x128xf32>
    %cst_13 = arith.constant 2.000000e-01 : f32
    %17 = vector.broadcast %cst_13 : f32 to vector<256x128xf32>
    %18 = arith.mulf %17, %16 : vector<256x128xf32>
    %19 = arith.maximumf %16, %18 : vector<256x128xf32>
    %20 = vector.shape_cast %19 : vector<256x128xf32> to vector<16x16x128xf32>
    %cst_14 = arith.constant dense<0xFF800000> : vector<16x128xf32>
    %21 = vector.multi_reduction <maximumf>, %20, %cst_14 [0] : vector<16x16x128xf32> to vector<16x128xf32>
    %22 = arith.truncf %21 : vector<16x128xf32> to vector<16x128xbf16>
    %c0_15 = arith.constant 0 : index
    %c0_16 = arith.constant 0 : index
    %23 = vector.load %arg7[%c0_15, %c0_16] : memref<128x1024xbf16, #tpu.memory_space<vmem>>, vector<128x1024xbf16>
    %cst_17 = arith.constant dense<0.000000e+00> : vector<16x1024xf32>
    %24 = tpu.matmul %22, %23, %cst_17 {dimension_numbers = #tpu.dot_dimension_numbers<[1], [0], [0], [1], [0, 0, 1, 1], [], []>} : vector<16x128xbf16>, vector<128x1024xbf16>, vector<16x1024xf32> -> vector<16x1024xf32>
    %c0_18 = arith.constant 0 : index
    %c0_19 = arith.constant 0 : index
    %25 = vector.load %arg8[%c0_18, %c0_19] : memref<1x1024xf32, #tpu.memory_space<vmem>>, vector<1x1024xf32>
    %26 = vector.broadcast %25 : vector<1x1024xf32> to vector<16x1024xf32>
    %27 = arith.addf %24, %26 : vector<16x1024xf32>
    %cst_20 = arith.constant 2.000000e-01 : f32
    %28 = vector.broadcast %cst_20 : f32 to vector<16x1024xf32>
    %29 = arith.mulf %28, %27 : vector<16x1024xf32>
    %30 = arith.maximumf %27, %29 : vector<16x1024xf32>
    %cst_21 = arith.constant dense<0xFF800000> : vector<1024xf32>
    %31 = vector.multi_reduction <maximumf>, %30, %cst_21 [0] : vector<16x1024xf32> to vector<1024xf32>
    %32 = vector.shape_cast %31 : vector<1024xf32> to vector<1x1024xf32>
    %c0_i32 = arith.constant 0 : i32
    %33 = arith.cmpi eq, %arg1, %c0_i32 : i32
    %34 = arith.extui %33 : i1 to i32
    %c0_i32_22 = arith.constant 0 : i32
    %35 = arith.cmpi ne, %34, %c0_i32_22 : i32
    scf.if %35 {
      %c0_27 = arith.constant 0 : index
      %c0_28 = arith.constant 0 : index
      %c0_29 = arith.constant 0 : index
      %42 = vector.load %arg16[%c0_27, %c0_28, %c0_29] : memref<1x1x1024xf32, #tpu.memory_space<vmem>>, vector<1x1x1024xf32>
      %43 = vector.shape_cast %42 : vector<1x1x1024xf32> to vector<1x1024xf32>
      %44 = vector.shape_cast %32 : vector<1x1024xf32> to vector<1x1x1024xf32>
      tpu.vector_store %arg16[%c0_27, %c0_28, %c0_29], %44 {strides = array<i32>} : memref<1x1x1024xf32, #tpu.memory_space<vmem>>, vector<1x1x1024xf32>,
    } else {
    }
    %c0_i32_23 = arith.constant 0 : i32
    %36 = arith.cmpi sgt, %arg1, %c0_i32_23 : i32
    %37 = arith.extui %36 : i1 to i32
    %c0_i32_24 = arith.constant 0 : i32
    %38 = arith.cmpi ne, %37, %c0_i32_24 : i32
    scf.if %38 {
      %c0_27 = arith.constant 0 : index
      %c0_28 = arith.constant 0 : index
      %c0_29 = arith.constant 0 : index
      %42 = vector.load %arg16[%c0_27, %c0_28, %c0_29] : memref<1x1x1024xf32, #tpu.memory_space<vmem>>, vector<1x1x1024xf32>
      %43 = vector.shape_cast %42 : vector<1x1x1024xf32> to vector<1x1024xf32>
      %44 = arith.maximumf %43, %32 : vector<1x1024xf32>
      %c0_30 = arith.constant 0 : index
      %c0_31 = arith.constant 0 : index
      %c0_32 = arith.constant 0 : index
      %45 = vector.load %arg16[%c0_30, %c0_31, %c0_32] : memref<1x1x1024xf32, #tpu.memory_space<vmem>>, vector<1x1x1024xf32>
      %46 = vector.shape_cast %45 : vector<1x1x1024xf32> to vector<1x1024xf32>
      %47 = vector.shape_cast %44 : vector<1x1024xf32> to vector<1x1x1024xf32>
      tpu.vector_store %arg16[%c0_30, %c0_31, %c0_32], %47 {strides = array<i32>} : memref<1x1x1024xf32, #tpu.memory_space<vmem>>, vector<1x1x1024xf32>,
    } else {
    }
    %c0_i32_25 = arith.constant 0 : i32
    %39 = arith.cmpi eq, %arg1, %c0_i32_25 : i32
    %40 = arith.extui %39 : i1 to i32
    %c0_i32_26 = arith.constant 0 : i32
    %41 = arith.cmpi ne, %40, %c0_i32_26 : i32
    scf.if %41 {
      %c0_27 = arith.constant 0 : index
      %c0_28 = arith.constant 0 : index
      %c0_29 = arith.constant 0 : index
      %42 = vector.load %arg16[%c0_27, %c0_28, %c0_29] : memref<1x1x1024xf32, #tpu.memory_space<vmem>>, vector<1x1x1024xf32>
      %43 = vector.shape_cast %42 : vector<1x1x1024xf32> to vector<1x1024xf32>
      %44 = arith.truncf %43 : vector<1x1024xf32> to vector<1x1024xbf16>
      %c0_30 = arith.constant 0 : index
      %c0_31 = arith.constant 0 : index
      %45 = vector.load %arg9[%c0_30, %c0_31] : memref<1024x512xbf16, #tpu.memory_space<vmem>>, vector<1024x512xbf16>
      %cst_32 = arith.constant dense<0.000000e+00> : vector<1x512xf32>
      %46 = tpu.matmul %44, %45, %cst_32 {dimension_numbers = #tpu.dot_dimension_numbers<[1], [0], [0], [1], [0, 0, 1, 1], [], []>} : vector<1x1024xbf16>, vector<1024x512xbf16>, vector<1x512xf32> -> vector<1x512xf32>
      %c0_33 = arith.constant 0 : index
      %c0_34 = arith.constant 0 : index
      %47 = vector.load %arg10[%c0_33, %c0_34] : memref<1x512xf32, #tpu.memory_space<vmem>>, vector<1x512xf32>
      %48 = arith.addf %46, %47 : vector<1x512xf32>
      %cst_35 = arith.constant 2.000000e-01 : f32
      %49 = vector.broadcast %cst_35 : f32 to vector<1x512xf32>
      %50 = arith.mulf %49, %48 : vector<1x512xf32>
      %51 = arith.maximumf %48, %50 : vector<1x512xf32>
      %52 = arith.truncf %51 : vector<1x512xf32> to vector<1x512xbf16>
      %c0_36 = arith.constant 0 : index
      %c0_37 = arith.constant 0 : index
      %53 = vector.load %arg11[%c0_36, %c0_37] : memref<512x256xbf16, #tpu.memory_space<vmem>>, vector<512x256xbf16>
      %cst_38 = arith.constant dense<0.000000e+00> : vector<1x256xf32>
      %54 = tpu.matmul %52, %53, %cst_38 {dimension_numbers = #tpu.dot_dimension_numbers<[1], [0], [0], [1], [0, 0, 1, 1], [], []>} : vector<1x512xbf16>, vector<512x256xbf16>, vector<1x256xf32> -> vector<1x256xf32>
      %c0_39 = arith.constant 0 : index
      %c0_40 = arith.constant 0 : index
      %55 = vector.load %arg12[%c0_39, %c0_40] : memref<1x256xf32, #tpu.memory_space<vmem>>, vector<1x256xf32>
      %56 = arith.addf %54, %55 : vector<1x256xf32>
      %cst_41 = arith.constant 2.000000e-01 : f32
      %57 = vector.broadcast %cst_41 : f32 to vector<1x256xf32>
      %58 = arith.mulf %57, %56 : vector<1x256xf32>
      %59 = arith.maximumf %56, %58 : vector<1x256xf32>
      %60 = arith.truncf %59 : vector<1x256xf32> to vector<1x256xbf16>
      %c0_42 = arith.constant 0 : index
      %c0_43 = arith.constant 0 : index
      %61 = vector.load %arg13[%c0_42, %c0_43] : memref<256x128xbf16, #tpu.memory_space<vmem>>, vector<256x128xbf16>
      %cst_44 = arith.constant dense<0.000000e+00> : vector<1x128xf32>
      %62 = tpu.matmul %60, %61, %cst_44 {dimension_numbers = #tpu.dot_dimension_numbers<[1], [0], [0], [1], [0, 0, 1, 1], [], []>} : vector<1x256xbf16>, vector<256x128xbf16>, vector<1x128xf32> -> vector<1x128xf32>
      %c0_45 = arith.constant 0 : index
      %c0_46 = arith.constant 0 : index
      %63 = vector.load %arg14[%c0_45, %c0_46] : memref<1x128xf32, #tpu.memory_space<vmem>>, vector<1x128xf32>
      %64 = arith.addf %62, %63 : vector<1x128xf32>
      %c0_47 = arith.constant 0 : index
      %c0_48 = arith.constant 0 : index
      %c0_49 = arith.constant 0 : index
      %65 = vector.load %arg15[%c0_47, %c0_48, %c0_49] : memref<1x1x128xf32, #tpu.memory_space<vmem>>, vector<1x1x128xf32>
      %66 = vector.shape_cast %65 : vector<1x1x128xf32> to vector<1x128xf32>
      %67 = vector.shape_cast %64 : vector<1x128xf32> to vector<1x1x128xf32>
      tpu.vector_store %arg15[%c0_47, %c0_48, %c0_49], %67 {strides = array<i32>} : memref<1x1x128xf32, #tpu.memory_space<vmem>>, vector<1x1x128xf32>,
    } else {
    }
    return
  }
  func.func @transform_0(%arg0: i32, %arg1: i32) -> (i32, i32, i32, i32) {
    %c0_i32 = arith.constant 0 : i32
    %c0_i32_0 = arith.constant 0 : i32
    %c0_i32_1 = arith.constant 0 : i32
    return %arg0, %c0_i32, %arg1, %c0_i32_0 : i32, i32, i32, i32
  }
  func.func @transform_1(%arg0: i32, %arg1: i32) -> (i32, i32) {
    %c0_i32 = arith.constant 0 : i32
    %c0_i32_0 = arith.constant 0 : i32
    %c0_i32_1 = arith.constant 0 : i32
    return %c0_i32, %c0_i32_0 : i32, i32
  }
  func.func @transform_2(%arg0: i32, %arg1: i32) -> (i32, i32) {
    %c0_i32 = arith.constant 0 : i32
    %c0_i32_0 = arith.constant 0 : i32
    %c0_i32_1 = arith.constant 0 : i32
    return %c0_i32, %c0_i32_0 : i32, i32
  }
  func.func @transform_3(%arg0: i32, %arg1: i32) -> (i32, i32) {
    %c0_i32 = arith.constant 0 : i32
    %c0_i32_0 = arith.constant 0 : i32
    %c0_i32_1 = arith.constant 0 : i32
    return %c0_i32, %c0_i32_0 : i32, i32
  }
  func.func @transform_4(%arg0: i32, %arg1: i32) -> (i32, i32) {
    %c0_i32 = arith.constant 0 : i32
    %c0_i32_0 = arith.constant 0 : i32
    %c0_i32_1 = arith.constant 0 : i32
    return %c0_i32, %c0_i32_0 : i32, i32
  }
  func.func @transform_5(%arg0: i32, %arg1: i32) -> (i32, i32) {
    %c0_i32 = arith.constant 0 : i32
    %c0_i32_0 = arith.constant 0 : i32
    %c0_i32_1 = arith.constant 0 : i32
    return %c0_i32, %c0_i32_0 : i32, i32
  }
  func.func @transform_6(%arg0: i32, %arg1: i32) -> (i32, i32) {
    %c0_i32 = arith.constant 0 : i32
    %c0_i32_0 = arith.constant 0 : i32
    %c0_i32_1 = arith.constant 0 : i32
    return %c0_i32, %c0_i32_0 : i32, i32
  }
  func.func @transform_7(%arg0: i32, %arg1: i32) -> (i32, i32) {
    %c0_i32 = arith.constant 0 : i32
    %c0_i32_0 = arith.constant 0 : i32
    %c0_i32_1 = arith.constant 0 : i32
    return %c0_i32, %c0_i32_0 : i32, i32
  }
  func.func @transform_8(%arg0: i32, %arg1: i32) -> (i32, i32) {
    %c0_i32 = arith.constant 0 : i32
    %c0_i32_0 = arith.constant 0 : i32
    %c0_i32_1 = arith.constant 0 : i32
    return %c0_i32, %c0_i32_0 : i32, i32
  }
  func.func @transform_9(%arg0: i32, %arg1: i32) -> (i32, i32) {
    %c0_i32 = arith.constant 0 : i32
    %c0_i32_0 = arith.constant 0 : i32
    %c0_i32_1 = arith.constant 0 : i32
    return %c0_i32, %c0_i32_0 : i32, i32
  }
  func.func @transform_10(%arg0: i32, %arg1: i32) -> (i32, i32) {
    %c0_i32 = arith.constant 0 : i32
    %c0_i32_0 = arith.constant 0 : i32
    %c0_i32_1 = arith.constant 0 : i32
    return %c0_i32, %c0_i32_0 : i32, i32
  }
  func.func @transform_11(%arg0: i32, %arg1: i32) -> (i32, i32) {
    %c0_i32 = arith.constant 0 : i32
    %c0_i32_0 = arith.constant 0 : i32
    %c0_i32_1 = arith.constant 0 : i32
    return %c0_i32, %c0_i32_0 : i32, i32
  }
  func.func @transform_12(%arg0: i32, %arg1: i32) -> (i32, i32) {
    %c0_i32 = arith.constant 0 : i32
    %c0_i32_0 = arith.constant 0 : i32
    %c0_i32_1 = arith.constant 0 : i32
    return %c0_i32, %c0_i32_0 : i32, i32
  }
  func.func @transform_13(%arg0: i32, %arg1: i32) -> (i32, i32, i32) {
    %c0_i32 = arith.constant 0 : i32
    %c0_i32_0 = arith.constant 0 : i32
    %c0_i32_1 = arith.constant 0 : i32
    return %arg0, %c0_i32, %c0_i32_0 : i32, i32, i32
  }
  func.func @transform_14(%arg0: i32, %arg1: i32) -> (i32, i32, i32) {
    %c0_i32 = arith.constant 0 : i32
    %c0_i32_0 = arith.constant 0 : i32
    %c0_i32_1 = arith.constant 0 : i32
    return %arg0, %c0_i32, %c0_i32_0 : i32, i32, i32
  }
}

</mosaic_0001>

<bundles_post_ra>
// kernel: tpu_custom_call.1
= control target key start
LH: loop header
LB: loop body
LE: loop exit
PB: predicated region body
PF: predicated region fallthrough
CT: control target
= control target key end

     0   :  { %s6999_s0 = inlined_call_operand.vmem [shape: bf16[2,16,16,8], index: 0, kind: input, shape index: {}]   ;;  %s7000_s1 = inlined_call_operand.vmem [shape: bf16[8,64], index: 1, kind: input, shape index: {}]   ;;  %s7001_s2 = inlined_call_operand.vmem [shape: f32[1,64], index: 2, kind: input, shape index: {}]   ;;  %s7002_s3 = inlined_call_operand.vmem [shape: bf16[64,128], index: 3, kind: input, shape index: {}]   ;;  %s7003_s4 = inlined_call_operand.vmem [shape: f32[1,128], index: 4, kind: input, shape index: {}]   ;;  %s7004_s5 = inlined_call_operand.hbm [shape: bf16[128,1024], index: 5, kind: input, shape index: {}]   ;;  %s7005_s6 = inlined_call_operand.vmem [shape: f32[1,1024], index: 6, kind: input, shape index: {}]   ;;  %s7006_s7 = inlined_call_operand.hbm [shape: bf16[1024,512], index: 7, kind: input, shape index: {}]   ;;  %s7007_s8 = inlined_call_operand.vmem [shape: f32[1,512], index: 8, kind: input, shape index: {}]   ;;  %s7008_s9 = inlined_call_operand.hbm [shape: bf16[512,256], index: 9, kind: input, shape index: {}]   ;;  %s7009_s10 = inlined_call_operand.vmem [shape: f32[1,256], index: 10, kind: input, shape index: {}]   ;;  %s7010_s11 = inlined_call_operand.vmem [shape: bf16[256,128], index: 11, kind: input, shape index: {}]   ;;  %s7011_s12 = inlined_call_operand.vmem [shape: f32[1,128], index: 12, kind: input, shape index: {}]   ;;  %s7012_s13 = inlined_call_operand.hbm [shape: f32[2,1,128], index: 13, kind: output, shape index: {0}]   ;;  %s7013_s14 = inlined_call_operand.hbm [shape: f32[2,1,1024], index: 14, kind: output, shape index: {1}]  }
   0x1   :  { %7029 = sst [smem:[#allocation23_spill]] %s7006_s7 }
   0x2   :  { %7030 = sst [smem:[#allocation24_spill]] %s7011_s12 }
   0x3   :  { %7031 = sst [smem:[#allocation25_spill]] %s7012_s13 }
   0x4   :  { %7032 = sst [smem:[#allocation26_spill]] %s7013_s14 }
   0x5   :  { %20 = vsyncpa [#allocation3], 0 }
   0x6   :  { %21 = vsyncpa [#allocation6], 0 }
   0x7   :  { %22 = vsyncpa [#allocation4], 0 }
   0x8   :  { %24 = vsyncpa [#allocation4 + $0x1], 0 }
   0x9   :  { %25 = vsyncpa [#allocation10], 0 }
   0xa   :  { %27 = vsyncpa [#allocation10 + $0x1], 0  ;;  %s6441_s29 = smov 0   ;;  %s6443_s30 = smov 0  }
   0xb   :  { %s6445_s15 = smov 0   ;;  %s6447_s16 = smov 0  }
   0xc   :  { %s6449_s17 = smov 0   ;;  %s6451_s18 = smov 0  }
   0xd LB: > { %7033 = sst [smem:[#allocation15_spill]] %s6331_s29  ;;  %s4890_s19 = sadd.s32 4294967295, %s6351_s18   ;;  %s6351_s18 = sphi %s6451_s18, %s33_s18   ;;  %s6347_s17 = sphi %s6449_s17, %s7063_s17   ;;  %s6343_s16 = sphi %s6447_s16, %s7062_s16   ;;  %s6339_s15 = sphi %s6445_s15, %s7061_s15   ;;  %s6335_s30 = sphi %s6443_s30, %s7065_s30   ;;  %s6331_s29 = sphi %s6441_s29, %s7064_s29  }
   0xe   : > { %7034 = sst [smem:[#allocation16_spill]] %s6339_s15  ;;  %s4891_s20 = sadd.s32 4294967294, %s6351_s18  }
   0xf   : > { %7035 = sst [smem:[#allocation17_spill]] %s6347_s17  ;;  %s45_s21 = sadd.s32 1, %s6347_s17 }
  0x10   : > { %7036 = sst [smem:[#allocation18_spill]] %s6351_s18  ;;  %s332_s22 = sadd.s32 1, %s6339_s15 }
  0x11   : > { %p47_p0 = scmp.ge.s32.totalorder %s45_s21, 2  ;;  %p342_p1 = scmp.ne.s32.totalorder %s6339_s15, %s6335_s30 }
  0x12   : > { %p343_p2 = scmp.eq.s32.totalorder %s4890_s19, 1  ;;  %p348_p3 = scmp.ne.s32.totalorder %s6335_s30, %s6331_s29 }
  0x13   : > { %s7067_s21 = smov (%p47_p0, %s45_s21), 0  ;;  %p349_p5 = scmp.eq.s32.totalorder %s4891_s20, 1 }
  0x14   : > { %7037 = sst [smem:[#allocation19_spill]] %s7067_s21  ;;  %p6481_p4 = por %p343_p2, %p342_p1 }
  0x15   : > { %s329_s24 = ssub.s32 %s6347_s17, %s7067_s21  ;;  %p4892_p6 = scmp.ge.s32.totalorder %s6351_s18, 1 }
  0x16   : > { %s7038_s23 = scalar_select %p6481_p4, 1, 0 }
  0x17   : > { %p330_p7 = scmp.eq.s32.totalorder %s329_s24, 0  ;;  %p6488_p8 = por %p349_p5, %p348_p3 }
  0x18   : > { %7039 = sst [smem:[#allocation20_spill]] %s7038_s23  ;;  %p382_p9 = scmp.lt.s32.totalorder %s6351_s18, 3 }
  0x19   : > { %s7040_s25 = scalar_select %p6488_p8, 1, 0 }
  0x1a   : > { %s6494_s26 = scalar_select %p330_p7, %s6339_s15, %s332_s22  }
  0x1b   : > { %7041 = sst [smem:[#allocation21_spill]] %s7040_s25  ;;  %p6496_p10 = pnand %p4892_p6, %p382_p9 }
  0x1c   : > { %7042 = sst [smem:[#allocation22_spill]] %s6494_s26  ;;  %p6500_p11 = scmp.eq.s32.totalorder %s4890_s19, 0 }
  0x1d   : > { %s7043_s27 = scalar_select %p6496_p10, 1, 0 }
  0x1e   : > { %s7044_s28 = scalar_select %p6500_p11, 1, 0 }
  0x1f   : > { %p5550_p12 = pneg %p6496_p10  ;;  %s6353_s20 = smov [#allocation5]  }
  0x20   : > { %s422_s24 = sshll.u32 %s6353_s20, 4  ;;  %s6354_s22 = smov [#allocation2]   ;;  %s423_s24 = int_to_ptr.vmem [resolvable:$true] %s422_s24 }
  0x21   : > { %p6508_p13 = pnand %p6500_p11, %p5550_p12  ;;  %s406_s17 = sshll.u32 %s6354_s22, 4  ;;  %s407_s17 = int_to_ptr.vmem [resolvable:$true] %s406_s17 }
  0x22   : > { %s7046_s7 = sld [smem:[#allocation23_spill]] }
  0x23   : > { %p6520_p1 = pneg %p6508_p13 }
  0x28   : > { %s6149_s19 = scalar_lea.hbm %s7046_s7, 32768 }
  0x29   : > { %p6150_p0 = scmp.ne.s32.totalorder %s7046_s7, %s6149_s19  ;;  %p6156_p5 = scmp.lt.u32.totalorder %s6149_s19, %s7046_s7 }
  0x2b   : > { %p6152_p2 = pnand %p6520_p1, %p6150_p0 }
  0x2d   : > { %p6153_p3 = pneg %p6152_p2 }
  0x2f   : > { %p6158_p6 = pnand %p6156_p5, %p6153_p3 }
  0x31   : > { %6161 = shalt.err (!%p6158_p6)
}
  0x32   : > { %s6162_s15 = scalar_lea.vmem %s423_s24, 32768  ;;  %p6170_p8 = scmp.lt.s32.totalorder %s423_s24, %s423_s24 }
  0x33   : > { %p6163_p7 = scmp.ne.s32.totalorder %s423_s24, %s6162_s15  ;;  %p6171_p4 = scmp.lt.s32.totalorder %s6162_s15, %s6162_s15 }
  0x35   : > { %p6165_p9 = pnand %p6163_p7, %p6520_p1  ;;  %p6172_p11 = por %p6171_p4, %p6170_p8 }
  0x37   : > { %p6166_p12 = pneg %p6165_p9 }
  0x39   : > { %p6173_p10 = pnand %p6172_p11, %p6166_p12 }
  0x3b   : > { %6176 = shalt.err (!%p6173_p10)
}
  0x3c   : > { %s6355_s29 = smov 256   ;;  %s6356_s25 = smov 16  }
  0x3d   : > { %5556 = dma.hbm_to_vmem [thread:$0]  (!%p6508_p13), %s7046_s7, 32768, %s423_s24, [#allocation6], %s6355_s29, %s6355_s29, %s6356_s25  }
  0x3e   : > { %s6177_s19 = scalar_lea.hbm %s7004_s5, 8192 }
  0x3f   : > { %p6178_p4 = scmp.ne.s32.totalorder %s7004_s5, %s6177_s19  ;;  %p6184_p11 = scmp.lt.u32.totalorder %s6177_s19, %s7004_s5 }
  0x41   : > { %p6180_p8 = pnand %p6178_p4, %p6520_p1 }
  0x43   : > { %p6181_p10 = pneg %p6180_p8 }
  0x45   : > { %p6186_p0 = pnand %p6184_p11, %p6181_p10 }
  0x47   : > { %6189 = shalt.err (!%p6186_p0)
}
  0x48   : > { %s6190_s13 = scalar_lea.vmem %s407_s17, 8192  ;;  %p6198_p6 = scmp.lt.s32.totalorder %s407_s17, %s407_s17 }
  0x49   : > { %p6191_p2 = scmp.ne.s32.totalorder %s407_s17, %s6190_s13  ;;  %p6199_p7 = scmp.lt.s32.totalorder %s6190_s13, %s6190_s13 }
  0x4b   : > { %p6193_p3 = pnand %p6191_p2, %p6520_p1  ;;  %p6200_p9 = por %p6199_p7, %p6198_p6 }
  0x4d   : > { %p6194_p5 = pneg %p6193_p3 }
  0x4f   : > { %p6201_p12 = pnand %p6200_p9, %p6194_p5 }
  0x51   : > { %6204 = shalt.err (!%p6201_p12)
}
  0x52   : > { %s6357_s12 = smov 512   ;;  %s6358_s14 = smov 32  }
  0x53   : > { %5553 = dma.hbm_to_vmem [thread:$0]  (!%p6508_p13), %s7004_s5, 8192, %s407_s17, [#allocation3], %s6357_s12, %s6357_s12, %s6358_s14  }
  0x54   : > { %s6359_s29 = smov [#allocation7]   ;;  %s6205_s22 = scalar_lea.hbm %s7008_s9, 8192 }
  0x55   : > { %s438_s25 = sshll.u32 %s6359_s29, 4  ;;  %p6206_p4 = scmp.ne.s32.totalorder %s7008_s9, %s6205_s22  ;;  %s439_s25 = int_to_ptr.vmem [resolvable:$true] %s438_s25 }
  0x56   : > { %p6212_p11 = scmp.lt.u32.totalorder %s6205_s22, %s7008_s9 }
  0x57   : > { %p6208_p8 = pnand %p6206_p4, %p6520_p1 }
  0x59   : > { %p6209_p10 = pneg %p6208_p8 }
  0x5b   : > { %p6214_p0 = pnand %p6212_p11, %p6209_p10 }
  0x5d   : > { %6217 = shalt.err (!%p6214_p0)
}
  0x5e   : > { %s6218_s17 = scalar_lea.vmem %s439_s25, 8192  ;;  %p6226_p6 = scmp.lt.s32.totalorder %s439_s25, %s439_s25 }
  0x5f   : > { %p6219_p2 = scmp.ne.s32.totalorder %s439_s25, %s6218_s17  ;;  %p6227_p7 = scmp.lt.s32.totalorder %s6218_s17, %s6218_s17 }
  0x61   : > { %p6221_p3 = pnand %p6219_p2, %p6520_p1  ;;  %p6228_p9 = por %p6227_p7, %p6226_p6 }
  0x63   : > { %p6222_p5 = pneg %p6221_p3 }
  0x65   : > { %p6229_p12 = pnand %p6228_p9, %p6222_p5 }
  0x67   : > { %6232 = shalt.err (!%p6229_p12)
}
  0x68   : > { %s6360_s12 = smov 128   ;;  %s6361_s14 = smov 8  }
  0x69   : > { %5559 = dma.hbm_to_vmem [thread:$0]  (!%p6508_p13), %s7008_s9, 8192, %s439_s25, [#allocation6], %s6360_s12, %s6360_s12, %s6361_s14  }
  0x6a   : > { %p7048_p4 = scmp.ne.s32.totalorder %s7043_s27, 0 }
  0x6b   : > { %p7049_p8 = scmp.ne.s32.totalorder (!%p7048_p4), %s7044_s28, 0 }
  0x6c   : > { %476 = sbr.rel (%p7048_p4) target bundleno = 1846 (0x736), region = 72 }
  0x73   : > { %6314 = dma.done.wait (%p7049_p8), [#allocation3], 8192  }
  0x74   : > { %6316 = vsyncadd (%p7049_p8), [#allocation3], 4294959104 }
  0x75   : > { %6318 = dma.done.wait (%p7049_p8), [#allocation6], 40960  }
  0x76   : > { %6320 = vsyncadd (%p7049_p8), [#allocation6], 4294926336  ;;  %p539_p1 = scmp.lt.s32.totalorder %s6343_s16, 1  ;;  %vm718_vm0 = vcmask 1043456   ;;  %vm669_vm1 = vcmask 64512   ;;  %v5649_v9 = vld [vmem:[%s7002_s3] sm:$0xff]  }
  0x77   : > { %v581_v0 = vld [vmem:[%s7000_s1] sm:$0xf]  ;;  %v5650_v10 = vld [vmem:[%s7002_s3 + $0x8] sm:$0xff]   ;;  %v5651_v11 = vld [vmem:[%s7002_s3 + $0x10] sm:$0xff]   ;;  %vm1002_vm2 = vcmask 523264   ;;  %s6813_s24 = sand.u32 1, %s6335_s30  }
  0x78   : > { %s540_s21 = scalar_select %p539_p1, %s6343_s16, 1  ;;  %5533 = vmatprep.subr.msk.bf16.mxu1 %vm718_vm0, %v581_v0  ;;  %v720_v1 = vsel %vm718_vm0, %v581_v0, 0  ;;  %v5652_v13 = vld [vmem:[%s7002_s3 + $0x18] sm:$0xff]   ;;  %v6639_v22 = vld [vmem:[%s7001_s2] ss:$0 sm:$0xff] }
  0x79   : > { %5426 = vmatpush3.bf16.msra.mxu1 %v720_v1  ;;  %s7050_s19 = sld [smem:[#allocation20_spill]]  ;;  %s5365_s15 = sshll.u32 %s6343_s16, 7 }
  0x7a   : > { %s5364_s20 = sshll.u32 %s540_s21, 7  ;;  %5459 = vmatprep.subr.bf16.mxu1 %v5649_v9  ;;  %s7051_s14 = sld [smem:[#allocation26_spill]] }
  0x7b   : > { %s6587_s29 = scalar_lea.vmem %s6999_s0, %s5364_s20  ;;  %s4731_s7 = scalar_lea.sflag [#allocation10], %s6813_s24 }
  0x7c   : > { %v5633_v2 = vld [vmem:[%s6587_s29] sm:$0xff]   ;;  %v5634_v3 = vld [vmem:[%s6587_s29 + $0x8] sm:$0xff]   ;;  %v5635_v4 = vld [vmem:[%s6587_s29 + $0x10] sm:$0xff]   ;;  %s6364_s20 = smov [#allocation9]  }
  0x7d   : > { %5427 = vmatprep.mubr.msk.bf16.mxu1 %vm669_vm1, %v5633_v2  ;;  %v5636_v5 = vld [vmem:[%s6587_s29 + $0x18] sm:$0xff]   ;;  %v5637_v6 = vld [vmem:[%s6587_s29 + $0x20] sm:$0xff]   ;;  %v5638_v7 = vld [vmem:[%s6587_s29 + $0x28] sm:$0xff]   ;;  %s6237_s27 = sshll.u32 %s6364_s20, 4  ;;  %s6238_s27 = int_to_ptr.vmem [resolvable:$false] %s6237_s27 }
  0x7e   : > { %5428 = vmatmul.mubr.msk.bf16.vlgmr.msra.gmra.mrb[0].mxu1 %vm669_vm1, %v5634_v3  ;;  %v5639_v8 = vld [vmem:[%s6587_s29 + $0x30] sm:$0xff]   ;;  %v5640_v12 = vld [vmem:[%s6587_s29 + $0x38] sm:$0xff]   ;;  %v5641_v14 = vld [vmem:[%s6587_s29 + $0x40] sm:$0xff]  }
  0x7f   : > { %5431 = vmatprep.mubr.msk.bf16.mxu1 %vm669_vm1, %v5635_v4  ;;  %5460 = vmatpush3.bf16.msra.mxu1 %v5649_v9  ;;  %v5642_v15 = vld [vmem:[%s6587_s29 + $0x48] sm:$0xff]   ;;  %v5643_v16 = vld [vmem:[%s6587_s29 + $0x50] sm:$0xff]   ;;  %v5644_v17 = vld [vmem:[%s6587_s29 + $0x58] sm:$0xff]   ;;  %p7052_p10 = scmp.ne.s32.totalorder %s7050_s19, 0 }
  0x80   : > { %5461 = vmatprep.subr.bf16.mxu1 %v5650_v10  ;;  %v5645_v18 = vld [vmem:[%s6587_s29 + $0x60] sm:$0xff]   ;;  %v5646_v19 = vld [vmem:[%s6587_s29 + $0x68] sm:$0xff]   ;;  %v5647_v20 = vld [vmem:[%s6587_s29 + $0x70] sm:$0xff]   ;;  %s6923_s23 = scalar_lea.hbm %s7051_s14, %s5365_s15 }
  0x81   : > { %v5648_v21 = vld [vmem:[%s6587_s29 + $0x78] sm:$0xff]   ;;  %s4901_s29 = sshll.u32 %s6813_s24, 3 }
  0x82   : > { %s6825_s28 = scalar_lea.vmem [#allocation9], %s4901_s29  ;;  %s6239_s29 = scalar_lea.vmem %s6238_s27, 256 }
  0x83   : > { %5462 = vmatpush3.bf16.msra.mxu1 %v5650_v10  ;;  %s4758_s13 = sshll.u32 %s6825_s28, 4  ;;  %s4759_s13 = int_to_ptr.vmem [resolvable:$true] %s4758_s13 }
  0x84   : > { %5463 = vmatprep.subr.bf16.mxu1 %v5651_v11  ;;  %s6233_s21 = scalar_lea.vmem %s4759_s13, 128  ;;  %p6240_p2 = scmp.lt.s32.totalorder %s4759_s13, %s6238_s27 }
  0x85   : > { %p6234_p13 = scmp.ne.s32.totalorder %s4759_s13, %s6233_s21  ;;  %p6241_p3 = scmp.lt.s32.totalorder %s6239_s29, %s6233_s21 }
  0x86   : > { %5432 = vmatmul.mubr.msk.bf16.gmra.mrb[4].mxu1 %vm669_vm1, %v5636_v5 }
  0x87   : > { %5435 = vmatprep.mubr.msk.bf16.mxu1 %vm669_vm1, %v5637_v6  ;;  %5464 = vmatpush3.bf16.msra.mxu1 %v5651_v11  ;;  %p6235_p11 = pnand %p6234_p13, %p7052_p10  ;;  %p6242_p5 = por %p6241_p3, %p6240_p2 }
  0x88   : > { %5465 = vmatprep.subr.bf16.mxu1 %v5652_v13 }
  0x89   : > { %p6236_p0 = pneg %p6235_p11 }
  0x8b   : > { %5466 = vmatpush3.bf16.msra.mxu1 %v5652_v13  ;;  %p6243_p6 = pnand %p6242_p5, %p6236_p0 }
  0x8e   : > { %5436 = vmatmul.mubr.msk.bf16.gmra.mrb[8].mxu1 %vm669_vm1, %v5638_v7 }
  0x8f   : > { %5439 = vmatprep.mubr.msk.bf16.mxu1 %vm669_vm1, %v5639_v8 }
  0x96   : > { %5440 = vmatmul.mubr.msk.bf16.gmra.mrb[12].mxu1 %vm669_vm1, %v5640_v12 }
  0x97   : > { %5443 = vmatprep.mubr.msk.bf16.mxu1 %vm669_vm1, %v5641_v14 }
  0x9e   : > { %5444 = vmatmul.mubr.msk.bf16.gmra.mrb[16].mxu1 %vm669_vm1, %v5642_v15 }
  0x9f   : > { %5447 = vmatprep.mubr.msk.bf16.mxu1 %vm669_vm1, %v5643_v16 }
  0xa6   : > { %5448 = vmatmul.mubr.msk.bf16.gmra.mrb[20].mxu1 %vm669_vm1, %v5644_v17 }
  0xa7   : > { %5451 = vmatprep.mubr.msk.bf16.mxu1 %vm669_vm1, %v5645_v18 }
  0xae   : > { %5452 = vmatmul.mubr.msk.bf16.gmra.mrb[24].mxu1 %vm669_vm1, %v5646_v19 }
  0xaf   : > { %5455 = vmatprep.mubr.msk.bf16.mxu1 %vm669_vm1, %v5647_v20 }
  0xb6   : > { %5456 = vmatmul.mubr.msk.bf16.gmra.mrb[28].mxu1 %vm669_vm1, %v5648_v21 }
 0x151   : > { %v5429_v23 = vpop.f32.mrb[0].mxu1 }
 0x152   : > { %v765_v24 = vadd.f32 %v5429_v23, %v6639_v22  ;;  %v756_v25 = vpop.f32.mrb[1].mxu1 }
 0x153   : > { %v757_v26 = vadd.f32 %v6639_v22, %v756_v25  ;;  %v5430_v27 = vpop.f32.mrb[2].mxu1 }
 0x154   : > { %v885_v28 = vmul.f32 0.2, %v765_v24  ;;  %v768_v29 = vadd.f32 %v5430_v27, %v6639_v22  ;;  %v759_v30 = vpop.f32.mrb[3].mxu1 }
 0x155   : > { %v883_v31 = vmul.f32 0.2, %v757_v26  ;;  %v760_v32 = vadd.f32 %v6639_v22, %v759_v30 }
 0x156   : > { %v886_v33 = vmul.f32 0.2, %v768_v29  ;;  %v917_v35 = vmax.f32 %v765_v24, %v885_v28 }
 0x157   : > { %v884_v34 = vmul.f32 0.2, %v760_v32  ;;  %v915_v37 = vmax.f32 %v757_v26, %v883_v31 }
 0x158   : > { %v918_v36 = vmax.f32 %v768_v29, %v886_v33 }
 0x159   : > { %v916_v38 = vmax.f32 %v760_v32, %v884_v34  ;;  %v5433_v39 = vpop.f32.mrb[4].mxu1 }
 0x15a   : > { %v948_v40 = vpack.c.bf16 %v918_v36, %v917_v35  ;;  %v781_v41 = vadd.f32 %v5433_v39, %v6639_v22  ;;  %v772_v42 = vpop.f32.mrb[5].mxu1 }
 0x15b   : > { %v947_v43 = vpack.c.bf16 %v916_v38, %v915_v37  ;;  %v773_v44 = vadd.f32 %v6639_v22, %v772_v42  ;;  %v5434_v45 = vpop.f32.mrb[6].mxu1 }
 0x15c   : > { %v889_v46 = vmul.f32 0.2, %v781_v41  ;;  %v784_v47 = vadd.f32 %v5434_v45, %v6639_v22  ;;  %v775_v48 = vpop.f32.mrb[7].mxu1 }
 0x15d   : > { %v887_v49 = vmul.f32 0.2, %v773_v44  ;;  %v776_v50 = vadd.f32 %v6639_v22, %v775_v48  ;;  %5467 = vmatprep.mubr.msk.bf16.mxu1 %vm1002_vm2, %v947_v43 }
 0x15e   : > { %v890_v51 = vmul.f32 0.2, %v784_v47  ;;  %5468 = vmatmul.mubr.msk.bf16.vlgmr.msra.gmra.mrb[32].mxu1 %vm1002_vm2, %v948_v40  ;;  %v921_v53 = vmax.f32 %v781_v41, %v889_v46 }
 0x15f   : > { %v888_v52 = vmul.f32 0.2, %v776_v50  ;;  %v919_v55 = vmax.f32 %v773_v44, %v887_v49 }
 0x160   : > { %v922_v54 = vmax.f32 %v784_v47, %v890_v51 }
 0x161   : > { %v920_v56 = vmax.f32 %v776_v50, %v888_v52  ;;  %v5437_v57 = vpop.f32.mrb[8].mxu1 }
 0x162   : > { %v950_v58 = vpack.c.bf16 %v922_v54, %v921_v53  ;;  %v797_v59 = vadd.f32 %v5437_v57, %v6639_v22  ;;  %v788_v60 = vpop.f32.mrb[9].mxu1 }
 0x163   : > { %v949_v61 = vpack.c.bf16 %v920_v56, %v919_v55  ;;  %v789_v62 = vadd.f32 %v6639_v22, %v788_v60  ;;  %v5438_v63 = vpop.f32.mrb[10].mxu1 }
 0x164   : > { %v893_v0 = vmul.f32 0.2, %v797_v59  ;;  %v800_v1 = vadd.f32 %v5438_v63, %v6639_v22  ;;  %v791_v2 = vpop.f32.mrb[11].mxu1 }
 0x165   : > { %v891_v3 = vmul.f32 0.2, %v789_v62  ;;  %v792_v4 = vadd.f32 %v6639_v22, %v791_v2  ;;  %5471 = vmatprep.mubr.msk.bf16.mxu1 %vm1002_vm2, %v949_v61 }
 0x166   : > { %v894_v5 = vmul.f32 0.2, %v800_v1  ;;  %5472 = vmatmul.mubr.msk.bf16.gmra.mrb[36].mxu1 %vm1002_vm2, %v950_v58  ;;  %v925_v7 = vmax.f32 %v797_v59, %v893_v0 }
 0x167   : > { %v892_v6 = vmul.f32 0.2, %v792_v4  ;;  %v923_v9 = vmax.f32 %v789_v62, %v891_v3 }
 0x168   : > { %v926_v8 = vmax.f32 %v800_v1, %v894_v5 }
 0x169   : > { %v924_v10 = vmax.f32 %v792_v4, %v892_v6  ;;  %v5441_v11 = vpop.f32.mrb[12].mxu1 }
 0x16a   : > { %v952_v12 = vpack.c.bf16 %v926_v8, %v925_v7  ;;  %v813_v13 = vadd.f32 %v5441_v11, %v6639_v22  ;;  %v804_v14 = vpop.f32.mrb[13].mxu1 }
 0x16b   : > { %v951_v15 = vpack.c.bf16 %v924_v10, %v923_v9  ;;  %v805_v16 = vadd.f32 %v6639_v22, %v804_v14  ;;  %v5442_v17 = vpop.f32.mrb[14].mxu1 }
 0x16c   : > { %v897_v18 = vmul.f32 0.2, %v813_v13  ;;  %v816_v19 = vadd.f32 %v5442_v17, %v6639_v22  ;;  %v807_v20 = vpop.f32.mrb[15].mxu1 }
 0x16d   : > { %v895_v21 = vmul.f32 0.2, %v805_v16  ;;  %v808_v23 = vadd.f32 %v6639_v22, %v807_v20  ;;  %5475 = vmatprep.mubr.msk.bf16.mxu1 %vm1002_vm2, %v951_v15 }
 0x16e   : > { %v898_v24 = vmul.f32 0.2, %v816_v19  ;;  %5476 = vmatmul.mubr.msk.bf16.gmra.mrb[40].mxu1 %vm1002_vm2, %v952_v12  ;;  %v929_v26 = vmax.f32 %v813_v13, %v897_v18 }
 0x16f   : > { %v896_v25 = vmul.f32 0.2, %v808_v23  ;;  %v927_v28 = vmax.f32 %v805_v16, %v895_v21 }
 0x170   : > { %v930_v27 = vmax.f32 %v816_v19, %v898_v24 }
 0x171   : > { %v928_v29 = vmax.f32 %v808_v23, %v896_v25  ;;  %v5445_v30 = vpop.f32.mrb[16].mxu1 }
 0x172   : > { %v954_v31 = vpack.c.bf16 %v930_v27, %v929_v26  ;;  %v829_v32 = vadd.f32 %v5445_v30, %v6639_v22  ;;  %v820_v33 = vpop.f32.mrb[17].mxu1 }
 0x173   : > { %v953_v34 = vpack.c.bf16 %v928_v29, %v927_v28  ;;  %v821_v35 = vadd.f32 %v6639_v22, %v820_v33  ;;  %v5446_v36 = vpop.f32.mrb[18].mxu1 }
 0x174   : > { %v901_v37 = vmul.f32 0.2, %v829_v32  ;;  %v832_v38 = vadd.f32 %v5446_v36, %v6639_v22  ;;  %v823_v39 = vpop.f32.mrb[19].mxu1 }
 0x175   : > { %v899_v40 = vmul.f32 0.2, %v821_v35  ;;  %v824_v41 = vadd.f32 %v6639_v22, %v823_v39  ;;  %5479 = vmatprep.mubr.msk.bf16.mxu1 %vm1002_vm2, %v953_v34 }
 0x176   : > { %v902_v42 = vmul.f32 0.2, %v832_v38  ;;  %5480 = vmatmul.mubr.msk.bf16.gmra.mrb[44].mxu1 %vm1002_vm2, %v954_v31  ;;  %v933_v44 = vmax.f32 %v829_v32, %v901_v37 }
 0x177   : > { %v900_v43 = vmul.f32 0.2, %v824_v41  ;;  %v931_v46 = vmax.f32 %v821_v35, %v899_v40 }
 0x178   : > { %v934_v45 = vmax.f32 %v832_v38, %v902_v42  ;;  %v1312_v42 = vld [vmem:[#allocation2 + $0x28] sm:$0xff] }
 0x179   : > { %v932_v47 = vmax.f32 %v824_v41, %v900_v43  ;;  %v5449_v48 = vpop.f32.mrb[20].mxu1  ;;  %v1308_v41 = vld [vmem:[#allocation2 + $0x8] sm:$0xff] }
 0x17a   : > { %v956_v49 = vpack.c.bf16 %v934_v45, %v933_v44  ;;  %v845_v50 = vadd.f32 %v5449_v48, %v6639_v22  ;;  %v836_v51 = vpop.f32.mrb[21].mxu1  ;;  %v4960_v43 = vcombine.low %v1308_v41, %v1312_v42  ;;  %v1316_v44 = vld [vmem:[#allocation2 + $0x48] sm:$0xff] }
 0x17b   : > { %v955_v52 = vpack.c.bf16 %v932_v47, %v931_v46  ;;  %v837_v53 = vadd.f32 %v6639_v22, %v836_v51  ;;  %v5450_v54 = vpop.f32.mrb[22].mxu1  ;;  %v1320_v45 = vld [vmem:[#allocation2 + $0x68] sm:$0xff] }
 0x17c   : > { %v905_v55 = vmul.f32 0.2, %v845_v50  ;;  %v848_v56 = vadd.f32 %v5450_v54, %v6639_v22  ;;  %v839_v57 = vpop.f32.mrb[23].mxu1  ;;  %v4968_v46 = vcombine.low %v1316_v44, %v1320_v45  ;;  %v4969_v47 = vcombine.high %v1316_v44, %v1320_v45  ;;  %v1324_v48 = vld [vmem:[#allocation2 + $0x88] sm:$0xff] }
 0x17d   : > { %v903_v58 = vmul.f32 0.2, %v837_v53  ;;  %v840_v59 = vadd.f32 %v6639_v22, %v839_v57  ;;  %5483 = vmatprep.mubr.msk.bf16.mxu1 %vm1002_vm2, %v955_v52  ;;  %v1332_v52 = vld [vmem:[#allocation2 + $0xc8] sm:$0xff]  ;;  %v1311_v57 = vld [vmem:[#allocation2 + $0x20] sm:$0xff] }
 0x17e   : > { %v906_v60 = vmul.f32 0.2, %v848_v56  ;;  %5484 = vmatmul.mubr.msk.bf16.gmra.mrb[48].mxu1 %vm1002_vm2, %v956_v49  ;;  %v937_v62 = vmax.f32 %v845_v50, %v905_v55  ;;  %v1328_v49 = vld [vmem:[#allocation2 + $0xa8] sm:$0xff] }
 0x17f   : > { %v904_v61 = vmul.f32 0.2, %v840_v59  ;;  %v935_v0 = vmax.f32 %v837_v53, %v903_v58  ;;  %v4976_v50 = vcombine.low %v1324_v48, %v1328_v49  ;;  %v4977_v51 = vcombine.high %v1324_v48, %v1328_v49  ;;  %v1336_v53 = vld [vmem:[#allocation2 + $0xe8] sm:$0xff] }
 0x180   : > { %v938_v63 = vmax.f32 %v848_v56, %v906_v60  ;;  %v4984_v54 = vcombine.low %v1332_v52, %v1336_v53  ;;  %v4985_v55 = vcombine.high %v1332_v52, %v1336_v53  ;;  %v1307_v56 = vld [vmem:[#allocation2] sm:$0xff] }
 0x181   : > { %v936_v1 = vmax.f32 %v840_v59, %v904_v61  ;;  %v5453_v2 = vpop.f32.mrb[24].mxu1  ;;  %v4959_v58 = vcombine.high %v1307_v56, %v1311_v57  ;;  %v4958_v59 = vcombine.low %v1307_v56, %v1311_v57  ;;  %v1315_v60 = vld [vmem:[#allocation2 + $0x40] sm:$0xff] }
 0x182   : > { %v958_v3 = vpack.c.bf16 %v938_v63, %v937_v62  ;;  %v861_v4 = vadd.f32 %v5453_v2, %v6639_v22  ;;  %v852_v5 = vpop.f32.mrb[25].mxu1  ;;  %v1319_v61 = vld [vmem:[#allocation2 + $0x60] sm:$0xff]  ;;  %v1340_v63 = vld [vmem:[#allocation2 + $0x108] sm:$0xff] }
 0x183   : > { %v957_v6 = vpack.c.bf16 %v936_v1, %v935_v0  ;;  %v853_v7 = vadd.f32 %v6639_v22, %v852_v5  ;;  %v5454_v8 = vpop.f32.mrb[26].mxu1  ;;  %1733 = vmatprep.subr.bf16.mxu0 %v4959_v58  ;;  %v4967_v62 = vcombine.high %v1315_v60, %v1319_v61  ;;  %v1344_v0 = vld [vmem:[#allocation2 + $0x128] sm:$0xff]  ;;  %v4966_v1 = vcombine.low %v1315_v60, %v1319_v61  ;;  %v1327_v5 = vld [vmem:[#allocation2 + $0xa0] sm:$0xff] }
 0x184   : > { %v909_v9 = vmul.f32 0.2, %v861_v4  ;;  %v864_v10 = vadd.f32 %v5454_v8, %v6639_v22  ;;  %v855_v11 = vpop.f32.mrb[27].mxu1  ;;  %1734 = vmatpush1.bf16.msra.mxu0 %v4958_v59  ;;  %v4992_v2 = vcombine.low %v1340_v63, %v1344_v0  ;;  %v1331_v8 = vld [vmem:[#allocation2 + $0xc0] sm:$0xff] }
 0x185   : > { %v907_v12 = vmul.f32 0.2, %v853_v7  ;;  %v856_v13 = vadd.f32 %v6639_v22, %v855_v11  ;;  %5487 = vmatprep.mubr.msk.bf16.mxu1 %vm1002_vm2, %v957_v6  ;;  %1735 = vmatprep.subr.bf16.mxu0 %v4967_v62  ;;  %v1348_v11 = vld [vmem:[#allocation2 + $0x148] sm:$0xff] }
 0x186   : > { %v910_v14 = vmul.f32 0.2, %v864_v10  ;;  %5488 = vmatmul.mubr.msk.bf16.gmra.mrb[52].mxu1 %vm1002_vm2, %v958_v3  ;;  %v941_v16 = vmax.f32 %v861_v4, %v909_v9  ;;  %v4993_v3 = vcombine.high %v1340_v63, %v1344_v0  ;;  %v1323_v4 = vld [vmem:[#allocation2 + $0x80] sm:$0xff] }
 0x187   : > { %v908_v15 = vmul.f32 0.2, %v856_v13  ;;  %v939_v18 = vmax.f32 %v853_v7, %v907_v12  ;;  %v4975_v6 = vcombine.high %v1323_v4, %v1327_v5  ;;  %v4974_v7 = vcombine.low %v1323_v4, %v1327_v5  ;;  %v1335_v9 = vld [vmem:[#allocation2 + $0xe0] sm:$0xff]  ;;  %v1352_v12 = vld [vmem:[#allocation2 + $0x168] sm:$0xff] }
 0x188   : > { %v942_v17 = vmax.f32 %v864_v10, %v910_v14  ;;  %1736 = vmatpush1.bf16.msra.mxu0 %v4966_v1  ;;  %v4983_v10 = vcombine.high %v1331_v8, %v1335_v9  ;;  %v5000_v14 = vcombine.low %v1348_v11, %v1352_v12 }
 0x189   : > { %v940_v19 = vmax.f32 %v856_v13, %v908_v15  ;;  %v5457_v20 = vpop.f32.mrb[28].mxu1  ;;  %1737 = vmatprep.subr.bf16.mxu0 %v4975_v6  ;;  %v4982_v13 = vcombine.low %v1331_v8, %v1335_v9  ;;  %v5001_v15 = vcombine.high %v1348_v11, %v1352_v12 }
 0x18a   : > { %v960_v21 = vpack.c.bf16 %v942_v17, %v941_v16  ;;  %v877_v23 = vadd.f32 %v5457_v20, %v6639_v22  ;;  %v868_v24 = vpop.f32.mrb[29].mxu1  ;;  %v1339_v16 = vld [vmem:[#allocation2 + $0x100] sm:$0xff] }
 0x18b   : > { %v959_v25 = vpack.c.bf16 %v940_v19, %v939_v18  ;;  %v869_v26 = vadd.f32 %v6639_v22, %v868_v24  ;;  %v5458_v27 = vpop.f32.mrb[30].mxu1  ;;  %v1343_v17 = vld [vmem:[#allocation2 + $0x120] sm:$0xff]  ;;  %v1356_v24 = vld [vmem:[#allocation2 + $0x188] sm:$0xff] }
 0x18c   : > { %v913_v28 = vmul.f32 0.2, %v877_v23  ;;  %v880_v29 = vadd.f32 %v5458_v27, %v6639_v22  ;;  %v871_v30 = vpop.f32.mrb[31].mxu1  ;;  %1738 = vmatpush1.bf16.msra.mxu0 %v4974_v7  ;;  %v4991_v18 = vcombine.high %v1339_v16, %v1343_v17  ;;  %v4990_v19 = vcombine.low %v1339_v16, %v1343_v17  ;;  %v1347_v20 = vld [vmem:[#allocation2 + $0x140] sm:$0xff] }
 0x18d   : > { %v911_v31 = vmul.f32 0.2, %v869_v26  ;;  %v872_v32 = vadd.f32 %v6639_v22, %v871_v30  ;;  %5491 = vmatprep.mubr.msk.bf16.mxu1 %vm1002_vm2, %v959_v25  ;;  %v4961_v22 = vcombine.high %v1308_v41, %v1312_v42  ;;  %1739 = vmatprep.subr.bf16.mxu0 %v4983_v10  ;;  %v1360_v25 = vld [vmem:[#allocation2 + $0x1a8] sm:$0xff]  ;;  %v1359_v30 = vld [vmem:[#allocation2 + $0x1a0] sm:$0xff]  ;;  %v6689_v41 = vld [vmem:[#allocation2 + $0x10] sm:$0xff] }
 0x18e   : > { %v914_v33 = vmul.f32 0.2, %v880_v29  ;;  %5492 = vmatmul.mubr.msk.bf16.gmra.mrb[56].mxu1 %vm1002_vm2, %v960_v21  ;;  %v945_v35 = vmax.f32 %v877_v23, %v913_v28  ;;  %v1351_v21 = vld [vmem:[#allocation2 + $0x160] sm:$0xff]  ;;  %v5008_v27 = vcombine.low %v1356_v24, %v1360_v25  ;;  %v5009_v28 = vcombine.high %v1356_v24, %v1360_v25  ;;  %v6691_v42 = vld [vmem:[#allocation2 + $0x30] sm:$0xff] }
 0x18f   : > { %v912_v34 = vmul.f32 0.2, %v872_v32  ;;  %v943_v37 = vmax.f32 %v869_v26, %v911_v31  ;;  %1776 = vmatprep.subr.bf16.mxu1 %v4961_v22  ;;  %v4999_v23 = vcombine.high %v1347_v20, %v1351_v21  ;;  %v4998_v26 = vcombine.low %v1347_v20, %v1351_v21 }
 0x190   : > { %v946_v36 = vmax.f32 %v880_v29, %v914_v33  ;;  %1777 = vmatpush1.bf16.msra.mxu1 %v4960_v43  ;;  %1740 = vmatpush1.bf16.msra.mxu0 %v4982_v13  ;;  %v1355_v29 = vld [vmem:[#allocation2 + $0x180] sm:$0xff]  ;;  %v1364_v33 = vld [vmem:[#allocation2 + $0x1c8] sm:$0xff]  ;;  %v6693_v43 = vld [vmem:[#allocation2 + $0x18] sm:$0xff]  ;;  %v6362_v22 = vmov 0   ;;  %v4962_v44 = vcombine.low %v6689_v41, %v6691_v42  ;;  %v4963_v45 = vcombine.high %v6689_v41, %v6691_v42 }
 0x191   : > { %v944_v38 = vmax.f32 %v872_v32, %v912_v34  ;;  %1778 = vmatprep.subr.bf16.mxu1 %v4969_v47  ;;  %1741 = vmatprep.subr.bf16.mxu0 %v4991_v18  ;;  %v5007_v31 = vcombine.high %v1355_v29, %v1359_v30  ;;  %v5006_v32 = vcombine.low %v1355_v29, %v1359_v30  ;;  %v1368_v34 = vld [vmem:[#allocation2 + $0x1e8] sm:$0xff] }
 0x192   : > { %v962_v39 = vpack.c.bf16 %v946_v36, %v945_v35  ;;  %v1363_v35 = vld [vmem:[#allocation2 + $0x1c0] sm:$0xff]  ;;  %v5017_v36 = vcombine.high %v1364_v33, %v1368_v34  ;;  %1765 = vmatprep.mubr.bf16.mxu0 %v6362_v22 }
 0x193   : > { %v961_v40 = vpack.c.bf16 %v944_v38, %v943_v37  ;;  %v1367_v37 = vld [vmem:[#allocation2 + $0x1e0] sm:$0xff]  ;;  %v5016_v38 = vcombine.low %v1364_v33, %v1368_v34 }
 0x194   : > { %1779 = vmatpush1.bf16.msra.mxu1 %v4968_v46  ;;  %1742 = vmatpush1.bf16.msra.mxu0 %v4990_v19  ;;  %v6700_v46 = vld [vmem:[#allocation2 + $0x38] sm:$0xff] }
 0x195   : > { %5495 = vmatprep.mubr.msk.bf16.mxu1 %vm1002_vm2, %v961_v40  ;;  %1780 = vmatprep.subr.bf16.mxu1 %v4977_v51  ;;  %v5014_v40 = vcombine.low %v1363_v35, %v1367_v37  ;;  %v4964_v47 = vcombine.low %v6693_v43, %v6700_v46  ;;  %v4965_v48 = vcombine.high %v6693_v43, %v6700_v46  ;;  %v6710_v51 = vld [vmem:[%s7003_s4] ss:$0 sm:$0xff]  ;;  %v1341_v46 = vld [vmem:[#allocation2 + $0x110] sm:$0xff] }
 0x196   : > { %5496 = vmatmul.mubr.msk.bf16.gmra.mrb[60].mxu1 %vm1002_vm2, %v962_v39  ;;  %1743 = vmatprep.subr.bf16.mxu0 %v4999_v23  ;;  %v5015_v39 = vcombine.high %v1363_v35, %v1367_v37 }
 0x197   : > { %1808 = vmatprep.mubr.bf16.mxu1 %v6362_v22 }
 0x198   : > { %1781 = vmatpush1.bf16.msra.mxu1 %v4976_v50  ;;  %1744 = vmatpush1.bf16.msra.mxu0 %v4998_v26 }
 0x199   : > { %1782 = vmatprep.subr.bf16.mxu1 %v4985_v55  ;;  %1745 = vmatprep.subr.bf16.mxu0 %v5007_v31 }
 0x19c   : > { %1783 = vmatpush1.bf16.msra.mxu1 %v4984_v54  ;;  %1746 = vmatpush1.bf16.msra.mxu0 %v5006_v32 }
 0x19d   : > { %1784 = vmatprep.subr.bf16.mxu1 %v4993_v3  ;;  %1747 = vmatprep.subr.bf16.mxu0 %v5015_v39 }
 0x1a0   : > { %1785 = vmatpush1.bf16.msra.mxu1 %v4992_v2  ;;  %1748 = vmatpush1.bf16.msra.mxu0 %v5014_v40 }
 0x1a1   : > { %1786 = vmatprep.subr.bf16.mxu1 %v5001_v15  ;;  %1819 = vmatprep.subr.bf16.mxu0 %v4963_v45 }
 0x1a4   : > { %1787 = vmatpush1.bf16.msra.mxu1 %v5000_v14 }
 0x1a5   : > { %1788 = vmatprep.subr.bf16.mxu1 %v5009_v28 }
 0x1a8   : > { %1789 = vmatpush1.bf16.msra.mxu1 %v5008_v27 }
 0x1a9   : > { %1790 = vmatprep.subr.bf16.mxu1 %v5017_v36 }
 0x1ac   : > { %1791 = vmatpush1.bf16.msra.mxu1 %v5016_v38 }
 0x1ad   : > { %1862 = vmatprep.subr.bf16.mxu1 %v4965_v48 }
 0x231   : > { %v5469_v49 = vpop.f32.mrb[32].mxu1 }
 0x232   : > { %v1085_v50 = vpop.f32.mrb[33].mxu1  ;;  %v1094_v54 = vadd.f32 %v5469_v49, %v6710_v51 }
 0x233   : > { %v5470_v52 = vpop.f32.mrb[34].mxu1  ;;  %v1086_v55 = vadd.f32 %v6710_v51, %v1085_v50 }
 0x234   : > { %v1088_v53 = vpop.f32.mrb[35].mxu1  ;;  %v1097_v56 = vadd.f32 %v5470_v52, %v6710_v51  ;;  %v1214_v59 = vmul.f32 0.2, %v1094_v54 }
 0x235   : > { %v1089_v57 = vadd.f32 %v6710_v51, %v1088_v53  ;;  %v1212_v62 = vmul.f32 0.2, %v1086_v55 }
 0x236   : > { %v1215_v1 = vmul.f32 0.2, %v1097_v56  ;;  %v1246_v8 = vmax.f32 %v1094_v54, %v1214_v59 }
 0x237   : > { %v1213_v5 = vmul.f32 0.2, %v1089_v57  ;;  %v1244_v11 = vmax.f32 %v1086_v55, %v1212_v62 }
 0x238   : > { %v1247_v14 = vmax.f32 %v1097_v56, %v1215_v1 }
 0x239   : > { %v5473_v58 = vpop.f32.mrb[36].mxu1  ;;  %v1245_v17 = vmax.f32 %v1089_v57, %v1213_v5 }
 0x23a   : > { %v1110_v60 = vadd.f32 %v5473_v58, %v6710_v51  ;;  %v1101_v61 = vpop.f32.mrb[37].mxu1 }
 0x23b   : > { %v1102_v63 = vadd.f32 %v6710_v51, %v1101_v61  ;;  %v5474_v0 = vpop.f32.mrb[38].mxu1 }
 0x23c   : > { %v1218_v2 = vmul.f32 0.2, %v1110_v60  ;;  %v1113_v3 = vadd.f32 %v5474_v0, %v6710_v51  ;;  %v1104_v4 = vpop.f32.mrb[39].mxu1 }
 0x23d   : > { %v1216_v6 = vmul.f32 0.2, %v1102_v63  ;;  %v1105_v7 = vadd.f32 %v6710_v51, %v1104_v4 }
 0x23e   : > { %v1250_v9 = vmax.f32 %v1110_v60, %v1218_v2  ;;  %v1219_v10 = vmul.f32 0.2, %v1113_v3 }
 0x23f   : > { %v1248_v12 = vmax.f32 %v1102_v63, %v1216_v6  ;;  %v1217_v13 = vmul.f32 0.2, %v1105_v7 }
 0x240   : > { %v1277_v15 = vmax.f32 %v1246_v8, %v1250_v9  ;;  %v1251_v16 = vmax.f32 %v1113_v3, %v1219_v10 }
 0x241   : > { %v1276_v18 = vmax.f32 %v1244_v11, %v1248_v12  ;;  %v1249_v19 = vmax.f32 %v1105_v7, %v1217_v13  ;;  %v5477_v20 = vpop.f32.mrb[40].mxu1 }
 0x242   : > { %v1292_v21 = vmax.f32 %v1247_v14, %v1251_v16  ;;  %v1126_v23 = vadd.f32 %v5477_v20, %v6710_v51  ;;  %v1117_v24 = vpop.f32.mrb[41].mxu1 }
 0x243   : > { %v1291_v25 = vmax.f32 %v1245_v17, %v1249_v19  ;;  %v1118_v26 = vadd.f32 %v6710_v51, %v1117_v24  ;;  %v5478_v27 = vpop.f32.mrb[42].mxu1 }
 0x244   : > { %v1222_v28 = vmul.f32 0.2, %v1126_v23  ;;  %v1129_v29 = vadd.f32 %v5478_v27, %v6710_v51  ;;  %v1120_v30 = vpop.f32.mrb[43].mxu1 }
 0x245   : > { %v1220_v31 = vmul.f32 0.2, %v1118_v26  ;;  %v1121_v32 = vadd.f32 %v6710_v51, %v1120_v30 }
 0x246   : > { %v1254_v33 = vmax.f32 %v1126_v23, %v1222_v28  ;;  %v1223_v34 = vmul.f32 0.2, %v1129_v29 }
 0x247   : > { %v1252_v35 = vmax.f32 %v1118_v26, %v1220_v31  ;;  %v1221_v36 = vmul.f32 0.2, %v1121_v32 }
 0x248   : > { %v1279_v37 = vmax.f32 %v1277_v15, %v1254_v33  ;;  %v1255_v38 = vmax.f32 %v1129_v29, %v1223_v34 }
 0x249   : > { %v1278_v39 = vmax.f32 %v1276_v18, %v1252_v35  ;;  %v1253_v40 = vmax.f32 %v1121_v32, %v1221_v36  ;;  %v5481_v45 = vpop.f32.mrb[44].mxu1 }
 0x24a   : > { %v1294_v48 = vmax.f32 %v1292_v21, %v1255_v38  ;;  %v1142_v49 = vadd.f32 %v5481_v45, %v6710_v51  ;;  %v1133_v50 = vpop.f32.mrb[45].mxu1 }
 0x24b   : > { %v1293_v52 = vmax.f32 %v1291_v25, %v1253_v40  ;;  %v1134_v53 = vadd.f32 %v6710_v51, %v1133_v50  ;;  %v5482_v54 = vpop.f32.mrb[46].mxu1 }
 0x24c   : > { %v1226_v55 = vmul.f32 0.2, %v1142_v49  ;;  %v1145_v56 = vadd.f32 %v5482_v54, %v6710_v51  ;;  %v1136_v57 = vpop.f32.mrb[47].mxu1 }
 0x24d   : > { %v1224_v58 = vmul.f32 0.2, %v1134_v53  ;;  %v1137_v59 = vadd.f32 %v6710_v51, %v1136_v57 }
 0x24e   : > { %v1258_v60 = vmax.f32 %v1142_v49, %v1226_v55  ;;  %v1227_v61 = vmul.f32 0.2, %v1145_v56 }
 0x24f   : > { %v1256_v62 = vmax.f32 %v1134_v53, %v1224_v58  ;;  %v1225_v63 = vmul.f32 0.2, %v1137_v59 }
 0x250   : > { %v1281_v0 = vmax.f32 %v1279_v37, %v1258_v60  ;;  %v1259_v1 = vmax.f32 %v1145_v56, %v1227_v61 }
 0x251   : > { %v1280_v2 = vmax.f32 %v1278_v39, %v1256_v62  ;;  %v1257_v3 = vmax.f32 %v1137_v59, %v1225_v63  ;;  %v5485_v4 = vpop.f32.mrb[48].mxu1 }
 0x252   : > { %v1296_v5 = vmax.f32 %v1294_v48, %v1259_v1  ;;  %v1158_v6 = vadd.f32 %v5485_v4, %v6710_v51  ;;  %v1149_v7 = vpop.f32.mrb[49].mxu1 }
 0x253   : > { %v1295_v8 = vmax.f32 %v1293_v52, %v1257_v3  ;;  %v1150_v9 = vadd.f32 %v6710_v51, %v1149_v7  ;;  %v5486_v10 = vpop.f32.mrb[50].mxu1 }
 0x254   : > { %v1230_v11 = vmul.f32 0.2, %v1158_v6  ;;  %v1161_v12 = vadd.f32 %v5486_v10, %v6710_v51  ;;  %v1152_v13 = vpop.f32.mrb[51].mxu1 }
 0x255   : > { %v1228_v14 = vmul.f32 0.2, %v1150_v9  ;;  %v1153_v15 = vadd.f32 %v6710_v51, %v1152_v13 }
 0x256   : > { %v1262_v16 = vmax.f32 %v1158_v6, %v1230_v11  ;;  %v1231_v17 = vmul.f32 0.2, %v1161_v12 }
 0x257   : > { %v1260_v18 = vmax.f32 %v1150_v9, %v1228_v14  ;;  %v1229_v19 = vmul.f32 0.2, %v1153_v15 }
 0x258   : > { %v1283_v20 = vmax.f32 %v1281_v0, %v1262_v16  ;;  %v1263_v21 = vmax.f32 %v1161_v12, %v1231_v17 }
 0x259   : > { %v1282_v23 = vmax.f32 %v1280_v2, %v1260_v18  ;;  %v1261_v24 = vmax.f32 %v1153_v15, %v1229_v19  ;;  %v5489_v25 = vpop.f32.mrb[52].mxu1 }
 0x25a   : > { %v1298_v26 = vmax.f32 %v1296_v5, %v1263_v21  ;;  %v1174_v27 = vadd.f32 %v5489_v25, %v6710_v51  ;;  %v1165_v28 = vpop.f32.mrb[53].mxu1 }
 0x25b   : > { %v1297_v29 = vmax.f32 %v1295_v8, %v1261_v24  ;;  %v1166_v30 = vadd.f32 %v6710_v51, %v1165_v28  ;;  %v5490_v31 = vpop.f32.mrb[54].mxu1 }
 0x25c   : > { %v1234_v32 = vmul.f32 0.2, %v1174_v27  ;;  %v1177_v33 = vadd.f32 %v5490_v31, %v6710_v51  ;;  %v1168_v34 = vpop.f32.mrb[55].mxu1 }
 0x25d   : > { %v1232_v35 = vmul.f32 0.2, %v1166_v30  ;;  %v1169_v36 = vadd.f32 %v6710_v51, %v1168_v34  ;;  %v1318_v34 = vld [vmem:[#allocation2 + $0x58] sm:$0xff] }
 0x25e   : > { %v1266_v37 = vmax.f32 %v1174_v27, %v1234_v32  ;;  %v1235_v38 = vmul.f32 0.2, %v1177_v33  ;;  %v1317_v32 = vld [vmem:[#allocation2 + $0x50] sm:$0xff] }
 0x25f   : > { %v1264_v39 = vmax.f32 %v1166_v30, %v1232_v35  ;;  %v1233_v40 = vmul.f32 0.2, %v1169_v36  ;;  %v1322_v35 = vld [vmem:[#allocation2 + $0x78] sm:$0xff] }
 0x260   : > { %v1285_v45 = vmax.f32 %v1283_v20, %v1266_v37  ;;  %v1267_v48 = vmax.f32 %v1177_v33, %v1235_v38  ;;  %v1321_v33 = vld [vmem:[#allocation2 + $0x70] sm:$0xff] }
 0x261   : > { %v1284_v49 = vmax.f32 %v1282_v23, %v1264_v39  ;;  %v1265_v50 = vmax.f32 %v1169_v36, %v1233_v40  ;;  %v5493_v52 = vpop.f32.mrb[56].mxu1  ;;  %v4971_v38 = vcombine.high %v1317_v32, %v1321_v33  ;;  %v1325_v39 = vld [vmem:[#allocation2 + $0x90] sm:$0xff] }
 0x262   : > { %v1300_v53 = vmax.f32 %v1298_v26, %v1267_v48  ;;  %v1190_v54 = vadd.f32 %v5493_v52, %v6710_v51  ;;  %v1181_v55 = vpop.f32.mrb[57].mxu1  ;;  %v1329_v40 = vld [vmem:[#allocation2 + $0xb0] sm:$0xff]  ;;  %v1330_v48 = vld [vmem:[#allocation2 + $0xb8] sm:$0xff] }
 0x263   : > { %v1299_v56 = vmax.f32 %v1297_v29, %v1265_v50  ;;  %v1182_v57 = vadd.f32 %v6710_v51, %v1181_v55  ;;  %v5494_v58 = vpop.f32.mrb[58].mxu1  ;;  %v4972_v50 = vcombine.low %v1318_v34, %v1322_v35  ;;  %v4979_v52 = vcombine.high %v1325_v39, %v1329_v40  ;;  %v1337_v55 = vld [vmem:[#allocation2 + $0xf0] sm:$0xff] }
 0x264   : > { %v1238_v59 = vmul.f32 0.2, %v1190_v54  ;;  %v1193_v60 = vadd.f32 %v5494_v58, %v6710_v51  ;;  %v1184_v61 = vpop.f32.mrb[59].mxu1  ;;  %v4978_v41 = vcombine.low %v1325_v39, %v1329_v40  ;;  %v1342_v58 = vld [vmem:[#allocation2 + $0x118] sm:$0xff]  ;;  %v5671_v39 = vld [vmem:[#allocation5 + $0x60] ss:$16 sps:$4 sm:$0xff]  }
 0x265   : > { %v1236_v62 = vmul.f32 0.2, %v1182_v57  ;;  %v1185_v63 = vadd.f32 %v6710_v51, %v1184_v61  ;;  %v5674_v40 = vld [vmem:[#allocation5 + $0x68] ss:$16 sps:$4 sm:$0xff]  }
 0x266   : > { %v1270_v0 = vmax.f32 %v1190_v54, %v1238_v59  ;;  %v1239_v1 = vmul.f32 0.2, %v1193_v60  ;;  %v1333_v54 = vld [vmem:[#allocation2 + $0xd0] sm:$0xff]  ;;  %v1346_v59 = vld [vmem:[#allocation2 + $0x138] sm:$0xff] }
 0x267   : > { %v1268_v2 = vmax.f32 %v1182_v57, %v1236_v62  ;;  %v1237_v3 = vmul.f32 0.2, %v1185_v63  ;;  %v1338_v57 = vld [vmem:[#allocation2 + $0xf8] sm:$0xff]  ;;  %v4987_v43 = vcombine.high %v1333_v54, %v1337_v55 }
 0x268   : > { %v1287_v4 = vmax.f32 %v1285_v45, %v1270_v0  ;;  %v1271_v5 = vmax.f32 %v1193_v60, %v1239_v1  ;;  %v1326_v45 = vld [vmem:[#allocation2 + $0x98] sm:$0xff]  ;;  %v4986_v60 = vcombine.low %v1333_v54, %v1337_v55  ;;  %v1353_v0 = vld [vmem:[#allocation2 + $0x170] sm:$0xff] }
 0x269   : > { %v1286_v6 = vmax.f32 %v1284_v49, %v1268_v2  ;;  %v1269_v7 = vmax.f32 %v1185_v63, %v1237_v3  ;;  %v5497_v8 = vpop.f32.mrb[60].mxu1  ;;  %v4970_v49 = vcombine.low %v1317_v32, %v1321_v33  ;;  %v4980_v42 = vcombine.low %v1326_v45, %v1330_v48  ;;  %v1349_v63 = vld [vmem:[#allocation2 + $0x150] sm:$0xff]  ;;  %v1350_v1 = vld [vmem:[#allocation2 + $0x158] sm:$0xff] }
 0x26a   : > { %v1302_v9 = vmax.f32 %v1300_v53, %v1271_v5  ;;  %v1206_v10 = vadd.f32 %v5497_v8, %v6710_v51  ;;  %v1197_v11 = vpop.f32.mrb[61].mxu1  ;;  %v4981_v53 = vcombine.high %v1326_v45, %v1330_v48  ;;  %v1354_v2 = vld [vmem:[#allocation2 + $0x178] sm:$0xff]  ;;  %v5003_v5 = vcombine.high %v1349_v63, %v1353_v0  ;;  %v1361_v8 = vld [vmem:[#allocation2 + $0x1b0] sm:$0xff] }
 0x26b   : > { %v1301_v12 = vmax.f32 %v1299_v56, %v1269_v7  ;;  %v1198_v13 = vadd.f32 %v6710_v51, %v1197_v11  ;;  %v5498_v14 = vpop.f32.mrb[62].mxu1  ;;  %v1334_v56 = vld [vmem:[#allocation2 + $0xd8] sm:$0xff]  ;;  %v1357_v7 = vld [vmem:[#allocation2 + $0x190] sm:$0xff]  ;;  %v5002_v11 = vcombine.low %v1349_v63, %v1353_v0 }
 0x26c   : > { %v1242_v15 = vmul.f32 0.2, %v1206_v10  ;;  %v1209_v16 = vadd.f32 %v5498_v14, %v6710_v51  ;;  %v1200_v17 = vpop.f32.mrb[63].mxu1  ;;  %v4988_v61 = vcombine.low %v1334_v56, %v1338_v57  ;;  %v5659_v32 = vld [vmem:[#allocation5 + $0x20] ss:$16 sps:$4 sm:$0xff]  }
 0x26d   : > { %v1240_v18 = vmul.f32 0.2, %v1198_v13  ;;  %v1201_v19 = vadd.f32 %v6710_v51, %v1200_v17  ;;  %v4973_v51 = vcombine.high %v1318_v34, %v1322_v35  ;;  %v1366_v17 = vld [vmem:[#allocation2 + $0x1d8] sm:$0xff]  ;;  %v5667_v34 = vld [vmem:[#allocation5 + $0x44] ss:$16 sps:$4 sm:$0xff]  }
 0x26e   : > { %v1274_v20 = vmax.f32 %v1206_v10, %v1242_v15  ;;  %v1243_v21 = vmul.f32 0.2, %v1209_v16  ;;  %v1362_v10 = vld [vmem:[#allocation2 + $0x1b8] sm:$0xff]  ;;  %v1365_v15 = vld [vmem:[#allocation2 + $0x1d0] sm:$0xff] }
 0x26f   : > { %v1272_v23 = vmax.f32 %v1198_v13, %v1240_v18  ;;  %v1241_v24 = vmul.f32 0.2, %v1201_v19  ;;  %v5011_v13 = vcombine.high %v1357_v7, %v1361_v8  ;;  %v1370_v18 = vld [vmem:[#allocation2 + $0x1f8] sm:$0xff]  ;;  %v5679_v45 = vld [vmem:[#allocation5 + $0x84] ss:$16 sps:$4 sm:$0xff]  }
 0x270   : > { %v1289_v25 = vmax.f32 %v1287_v4, %v1274_v20  ;;  %v1275_v26 = vmax.f32 %v1209_v16, %v1243_v21  ;;  %v4996_v4 = vcombine.low %v1342_v58, %v1346_v59  ;;  %v1369_v16 = vld [vmem:[#allocation2 + $0x1f0] sm:$0xff]  ;;  %v5662_v33 = vld [vmem:[#allocation5 + $0x28] ss:$16 sps:$4 sm:$0xff]   ;;  %v5670_v35 = vld [vmem:[#allocation5 + $0x4c] ss:$16 sps:$4 sm:$0xff]  }
 0x271   : > { %v1288_v27 = vmax.f32 %v1286_v6, %v1272_v23  ;;  %v1273_v28 = vmax.f32 %v1201_v19, %v1241_v24  ;;  %v5005_v6 = vcombine.high %v1350_v1, %v1354_v2  ;;  %v5010_v19 = vcombine.low %v1357_v7, %v1361_v8  ;;  %v5682_v48 = vld [vmem:[#allocation5 + $0x8c] ss:$16 sps:$4 sm:$0xff]   ;;  %v5683_v54 = vld [vmem:[#allocation5 + $0xa0] ss:$16 sps:$4 sm:$0xff]   ;;  %v5686_v55 = vld [vmem:[#allocation5 + $0xa8] ss:$16 sps:$4 sm:$0xff]  }
 0x272   : > { %v1304_v29 = vmax.f32 %v1302_v9, %v1275_v26  ;;  %v1358_v9 = vld [vmem:[#allocation2 + $0x198] sm:$0xff]  ;;  %v5019_v21 = vcombine.high %v1365_v15, %v1369_v16  ;;  %v5021_v23 = vcombine.high %v1366_v17, %v1370_v18  ;;  %v5018_v24 = vcombine.low %v1365_v15, %v1369_v16  ;;  %v5655_v26 = vld [vmem:[#allocation5 + $0x4] ss:$16 sps:$4 sm:$0xff]   ;;  %v5707_v63 = vld [vmem:[#allocation5 + $0x120] ss:$16 sps:$4 sm:$0xff]  }
 0x273   : > { %v1290_v30 = vmax.f32 %v1288_v27, %v1289_v25  ;;  %v1303_v31 = vmax.f32 %v1301_v12, %v1273_v28  ;;  %v5004_v12 = vcombine.low %v1350_v1, %v1354_v2  ;;  %v5013_v14 = vcombine.high %v1358_v9, %v1362_v10  ;;  %v5658_v27 = vld [vmem:[#allocation5 + $0xc] ss:$16 sps:$4 sm:$0xff]   ;;  %v5653_v28 = vld [vmem:[#allocation5] ss:$16 sps:$4 sm:$0xff]   ;;  %v5710_v0 = vld [vmem:[#allocation5 + $0x128] ss:$16 sps:$4 sm:$0xff]  }
 0x274   : > { %v5012_v20 = vcombine.low %v1358_v9, %v1362_v10  ;;  %v5020_v25 = vcombine.low %v1366_v17, %v1370_v18  ;;  %v5715_v1 = vld [vmem:[#allocation5 + $0x144] ss:$16 sps:$4 sm:$0xff]   ;;  %v5718_v2 = vld [vmem:[#allocation5 + $0x14c] ss:$16 sps:$4 sm:$0xff]   ;;  %v5719_v7 = vld [vmem:[#allocation5 + $0x160] ss:$16 sps:$4 sm:$0xff]  }
 0x275   : > { %v1305_v36 = vmax.f32 %v1303_v31, %v1304_v29  ;;  %v5656_v29 = vld [vmem:[#allocation5 + $0x8] ss:$16 sps:$4 sm:$0xff]   ;;  %v5664_v31 = vld [vmem:[#allocation5 + $0x2c] ss:$16 sps:$4 sm:$0xff]   ;;  %v5727_v9 = vld [vmem:[#allocation5 + $0x184] ss:$16 sps:$4 sm:$0xff]  }
 0x276   : > { %v5722_v8 = vld [vmem:[#allocation5 + $0x168] ss:$16 sps:$4 sm:$0xff]   ;;  %v5730_v10 = vld [vmem:[#allocation5 + $0x18c] ss:$16 sps:$4 sm:$0xff]   ;;  %v5731_v15 = vld [vmem:[#allocation5 + $0x1a0] ss:$16 sps:$4 sm:$0xff]  }
 0x277   : > { %v6744_v37 = vpack.c.bf16 %v1305_v36, %v1290_v30  ;;  %v5661_v30 = vld [vmem:[#allocation5 + $0x24] ss:$16 sps:$4 sm:$0xff]   ;;  %v5665_v36 = vld [vmem:[#allocation5 + $0x40] ss:$16 sps:$4 sm:$0xff]   ;;  %v5734_v16 = vld [vmem:[#allocation5 + $0x1a8] ss:$16 sps:$4 sm:$0xff]  }
 0x278   : > { %v5739_v17 = vld [vmem:[#allocation5 + $0x1c4] ss:$16 sps:$4 sm:$0xff]   ;;  %v5742_v18 = vld [vmem:[#allocation5 + $0x1cc] ss:$16 sps:$4 sm:$0xff]  }
 0x279   : > { %1766 = vmatmul.mubr.bf16.vlgmr.msra.gmra.mrb[0].mxu0 %v6744_v37  ;;  %1809 = vmatmul.mubr.bf16.vlgmr.msra.gmra.mrb[64].mxu1 %v6744_v37 }
 0x27a   : > { %1820 = vmatpush1.bf16.msra.mxu0 %v4962_v44  ;;  %1863 = vmatpush1.bf16.msra.mxu1 %v4964_v47  ;;  %v4989_v44 = vcombine.high %v1334_v56, %v1338_v57  ;;  %v1345_v47 = vld [vmem:[#allocation2 + $0x130] sm:$0xff]  ;;  %v5694_v57 = vld [vmem:[#allocation5 + $0xcc] ss:$16 sps:$4 sm:$0xff]  }
 0x27b   : > { %1821 = vmatprep.subr.bf16.mxu0 %v4971_v38  ;;  %1864 = vmatprep.subr.bf16.mxu1 %v4973_v51  ;;  %v4995_v62 = vcombine.high %v1341_v46, %v1345_v47  ;;  %v4994_v3 = vcombine.low %v1341_v46, %v1345_v47  ;;  %v5673_v38 = vld [vmem:[#allocation5 + $0x64] ss:$16 sps:$4 sm:$0xff]   ;;  %v5676_v51 = vld [vmem:[#allocation5 + $0x6c] ss:$16 sps:$4 sm:$0xff]   ;;  %v5695_v46 = vld [vmem:[#allocation5 + $0xe0] ss:$16 sps:$4 sm:$0xff]  }
 0x27c   : > { %1851 = vmatprep.mubr.bf16.mxu0 %v6362_v22  ;;  %1894 = vmatprep.mubr.bf16.mxu1 %v6362_v22  ;;  %v4997_v22 = vcombine.high %v1342_v58, %v1346_v59  ;;  %v5691_v56 = vld [vmem:[#allocation5 + $0xc4] ss:$16 sps:$4 sm:$0xff]   ;;  %v5698_v47 = vld [vmem:[#allocation5 + $0xe8] ss:$16 sps:$4 sm:$0xff]   ;;  %v5706_v59 = vld [vmem:[#allocation5 + $0x10c] ss:$16 sps:$4 sm:$0xff]  }
 0x27d   : > { %v5703_v58 = vld [vmem:[#allocation5 + $0x104] ss:$16 sps:$4 sm:$0xff]  }
 0x27e   : > { %1822 = vmatpush1.bf16.msra.mxu0 %v4970_v49  ;;  %1865 = vmatpush1.bf16.msra.mxu1 %v4972_v50  ;;  %v5677_v49 = vld [vmem:[#allocation5 + $0x80] ss:$16 sps:$4 sm:$0xff]   ;;  %v5680_v50 = vld [vmem:[#allocation5 + $0x88] ss:$16 sps:$4 sm:$0xff]  }
 0x27f   : > { %1823 = vmatprep.subr.bf16.mxu0 %v4979_v52  ;;  %1866 = vmatprep.subr.bf16.mxu1 %v4981_v53  ;;  %v5685_v52 = vld [vmem:[#allocation5 + $0xa4] ss:$16 sps:$4 sm:$0xff]   ;;  %v5688_v53 = vld [vmem:[#allocation5 + $0xac] ss:$16 sps:$4 sm:$0xff]  }
 0x282   : > { %1824 = vmatpush1.bf16.msra.mxu0 %v4978_v41  ;;  %1867 = vmatpush1.bf16.msra.mxu1 %v4980_v42  ;;  %v5689_v41 = vld [vmem:[#allocation5 + $0xc0] ss:$16 sps:$4 sm:$0xff]   ;;  %v5692_v42 = vld [vmem:[#allocation5 + $0xc8] ss:$16 sps:$4 sm:$0xff]  }
 0x283   : > { %1825 = vmatprep.subr.bf16.mxu0 %v4987_v43  ;;  %1868 = vmatprep.subr.bf16.mxu1 %v4989_v44  ;;  %v5697_v43 = vld [vmem:[#allocation5 + $0xe4] ss:$16 sps:$4 sm:$0xff]   ;;  %v5700_v44 = vld [vmem:[#allocation5 + $0xec] ss:$16 sps:$4 sm:$0xff]  }
 0x286   : > { %1826 = vmatpush1.bf16.msra.mxu0 %v4986_v60  ;;  %1869 = vmatpush1.bf16.msra.mxu1 %v4988_v61  ;;  %v5701_v60 = vld [vmem:[#allocation5 + $0x100] ss:$16 sps:$4 sm:$0xff]   ;;  %v5704_v61 = vld [vmem:[#allocation5 + $0x108] ss:$16 sps:$4 sm:$0xff]  }
 0x287   : > { %1827 = vmatprep.subr.bf16.mxu0 %v4995_v62  ;;  %1870 = vmatprep.subr.bf16.mxu1 %v4997_v22  ;;  %v5709_v62 = vld [vmem:[#allocation5 + $0x124] ss:$16 sps:$4 sm:$0xff]   ;;  %v5712_v22 = vld [vmem:[#allocation5 + $0x12c] ss:$16 sps:$4 sm:$0xff]  }
 0x28a   : > { %1828 = vmatpush1.bf16.msra.mxu0 %v4994_v3  ;;  %1871 = vmatpush1.bf16.msra.mxu1 %v4996_v4  ;;  %v5713_v3 = vld [vmem:[#allocation5 + $0x140] ss:$16 sps:$4 sm:$0xff]   ;;  %v5716_v4 = vld [vmem:[#allocation5 + $0x148] ss:$16 sps:$4 sm:$0xff]  }
 0x28b   : > { %1829 = vmatprep.subr.bf16.mxu0 %v5003_v5  ;;  %1872 = vmatprep.subr.bf16.mxu1 %v5005_v6  ;;  %v5721_v5 = vld [vmem:[#allocation5 + $0x164] ss:$16 sps:$4 sm:$0xff]   ;;  %v5724_v6 = vld [vmem:[#allocation5 + $0x16c] ss:$16 sps:$4 sm:$0xff]  }
 0x28e   : > { %1830 = vmatpush1.bf16.msra.mxu0 %v5002_v11  ;;  %1873 = vmatpush1.bf16.msra.mxu1 %v5004_v12  ;;  %v5725_v11 = vld [vmem:[#allocation5 + $0x180] ss:$16 sps:$4 sm:$0xff]   ;;  %v5728_v12 = vld [vmem:[#allocation5 + $0x188] ss:$16 sps:$4 sm:$0xff]  }
 0x28f   : > { %1831 = vmatprep.subr.bf16.mxu0 %v5011_v13  ;;  %1874 = vmatprep.subr.bf16.mxu1 %v5013_v14  ;;  %v5733_v13 = vld [vmem:[#allocation5 + $0x1a4] ss:$16 sps:$4 sm:$0xff]   ;;  %v5736_v14 = vld [vmem:[#allocation5 + $0x1ac] ss:$16 sps:$4 sm:$0xff]  }
 0x292   : > { %1832 = vmatpush1.bf16.msra.mxu0 %v5010_v19  ;;  %1875 = vmatpush1.bf16.msra.mxu1 %v5012_v20  ;;  %v5737_v19 = vld [vmem:[#allocation5 + $0x1c0] ss:$16 sps:$4 sm:$0xff]   ;;  %v5740_v20 = vld [vmem:[#allocation5 + $0x1c8] ss:$16 sps:$4 sm:$0xff]  }
 0x293   : > { %1833 = vmatprep.subr.bf16.mxu0 %v5019_v21  ;;  %1876 = vmatprep.subr.bf16.mxu1 %v5021_v23  ;;  %v5743_v21 = vld [vmem:[#allocation5 + $0x1e0] ss:$16 sps:$4 sm:$0xff]   ;;  %v5745_v23 = vld [vmem:[#allocation5 + $0x1e4] ss:$16 sps:$4 sm:$0xff]  }
 0x296   : > { %1834 = vmatpush1.bf16.msra.mxu0 %v5018_v24  ;;  %1877 = vmatpush1.bf16.msra.mxu1 %v5020_v25  ;;  %v5746_v24 = vld [vmem:[#allocation5 + $0x1e8] ss:$16 sps:$4 sm:$0xff]   ;;  %v5748_v25 = vld [vmem:[#allocation5 + $0x1ec] ss:$16 sps:$4 sm:$0xff]  }
 0x297   : > { %3732 = vmatprep.subr.bf16.mxu0 %v5655_v26  ;;  %3896 = vmatprep.subr.bf16.mxu1 %v5658_v27  ;;  %v5751_v26 = vld [vmem:[#allocation5 + $0x204] ss:$16 sps:$4 sm:$0xff]   ;;  %v5754_v27 = vld [vmem:[#allocation5 + $0x20c] ss:$16 sps:$4 sm:$0xff]  }
 0x299   : > { %1852 = vmatmul.mubr.bf16.vlgmr.msra.gmra.mrb[4].mxu0 %v6744_v37  ;;  %1895 = vmatmul.mubr.bf16.vlgmr.msra.gmra.mrb[68].mxu1 %v6744_v37  ;;  %v5668_v37 = vld [vmem:[#allocation5 + $0x48] ss:$16 sps:$4 sm:$0xff]  }
 0x29a   : > { %3733 = vmatpush1.bf16.msra.mxu0 %v5653_v28  ;;  %3897 = vmatpush1.bf16.msra.mxu1 %v5656_v29  ;;  %v1373_v28 = vlaneseq }
 0x29b   : > { %3734 = vmatprep.subr.bf16.mxu0 %v5661_v30  ;;  %3898 = vmatprep.subr.bf16.mxu1 %v5664_v31 }
 0x29c   : > { %v6758_v29 = vshrl.u32 %v1373_v28, 7 }
 0x29e   : > { %3735 = vmatpush1.bf16.msra.mxu0 %v5659_v32  ;;  %3899 = vmatpush1.bf16.msra.mxu1 %v5662_v33  ;;  %v6761_v30 = vsub.s32 0, %v6758_v29  ;;  %v6764_v31 = vsub.s32 2, %v6758_v29  ;;  %v6769_v32 = vld [vmem:[%s7005_s6] sm:$0xff]  ;;  %v6772_v33 = vsub.s32 1, %v6758_v29 }
 0x29f   : > { %3736 = vmatprep.subr.bf16.mxu0 %v5667_v34  ;;  %3900 = vmatprep.subr.bf16.mxu1 %v5670_v35  ;;  %v6775_v34 = vsub.s32 3, %v6758_v29 }
 0x2a0   : > { %v1376_v35 = vrot.slane %v6769_v32, %v6761_v30 }
 0x2a2   : > { %3737 = vmatpush1.bf16.msra.mxu0 %v5665_v36  ;;  %3901 = vmatpush1.bf16.msra.mxu1 %v5668_v37  ;;  %v1384_v36 = vrot.slane %v6769_v32, %v6764_v31  ;;  %v1380_v37 = vrot.slane %v6769_v32, %v6772_v33 }
 0x2a3   : > { %3738 = vmatprep.subr.bf16.mxu0 %v5673_v38  ;;  %3902 = vmatprep.subr.bf16.mxu1 %v5676_v51  ;;  %v1388_v38 = vrot.slane %v6769_v32, %v6775_v34 }
 0x2a6   : > { %3739 = vmatpush1.bf16.msra.mxu0 %v5671_v39  ;;  %3903 = vmatpush1.bf16.msra.mxu1 %v5674_v40 }
 0x2a7   : > { %3740 = vmatprep.subr.bf16.mxu0 %v5679_v45  ;;  %3904 = vmatprep.subr.bf16.mxu1 %v5682_v48 }
 0x2aa   : > { %3741 = vmatpush1.bf16.msra.mxu0 %v5677_v49  ;;  %3905 = vmatpush1.bf16.msra.mxu1 %v5680_v50 }
 0x2ab   : > { %3742 = vmatprep.subr.bf16.mxu0 %v5685_v52  ;;  %3906 = vmatprep.subr.bf16.mxu1 %v5688_v53 }
 0x2ae   : > { %3743 = vmatpush1.bf16.msra.mxu0 %v5683_v54  ;;  %3907 = vmatpush1.bf16.msra.mxu1 %v5686_v55 }
 0x2af   : > { %3744 = vmatprep.subr.bf16.mxu0 %v5691_v56  ;;  %3908 = vmatprep.subr.bf16.mxu1 %v5694_v57 }
 0x2b2   : > { %3745 = vmatpush1.bf16.msra.mxu0 %v5689_v41  ;;  %3909 = vmatpush1.bf16.msra.mxu1 %v5692_v42 }
 0x2b3   : > { %3746 = vmatprep.subr.bf16.mxu0 %v5697_v43  ;;  %3910 = vmatprep.subr.bf16.mxu1 %v5700_v44 }
 0x2b6   : > { %3747 = vmatpush1.bf16.msra.mxu0 %v5695_v46  ;;  %3911 = vmatpush1.bf16.msra.mxu1 %v5698_v47 }
 0x2b7   : > { %3748 = vmatprep.subr.bf16.mxu0 %v5703_v58  ;;  %3912 = vmatprep.subr.bf16.mxu1 %v5706_v59 }
 0x2ba   : > { %3749 = vmatpush1.bf16.msra.mxu0 %v5701_v60  ;;  %3913 = vmatpush1.bf16.msra.mxu1 %v5704_v61 }
 0x2bb   : > { %3750 = vmatprep.subr.bf16.mxu0 %v5709_v62  ;;  %3914 = vmatprep.subr.bf16.mxu1 %v5712_v22 }
 0x2be   : > { %3751 = vmatpush1.bf16.msra.mxu0 %v5707_v63  ;;  %3915 = vmatpush1.bf16.msra.mxu1 %v5710_v0 }
 0x2bf   : > { %3752 = vmatprep.subr.bf16.mxu0 %v5715_v1  ;;  %3916 = vmatprep.subr.bf16.mxu1 %v5718_v2 }
 0x2c2   : > { %3753 = vmatpush1.bf16.msra.mxu0 %v5713_v3  ;;  %3917 = vmatpush1.bf16.msra.mxu1 %v5716_v4 }
 0x2c3   : > { %3754 = vmatprep.subr.bf16.mxu0 %v5721_v5  ;;  %3918 = vmatprep.subr.bf16.mxu1 %v5724_v6 }
 0x2c6   : > { %3755 = vmatpush1.bf16.msra.mxu0 %v5719_v7  ;;  %3919 = vmatpush1.bf16.msra.mxu1 %v5722_v8 }
 0x2c7   : > { %3756 = vmatprep.subr.bf16.mxu0 %v5727_v9  ;;  %3920 = vmatprep.subr.bf16.mxu1 %v5730_v10 }
 0x2ca   : > { %3757 = vmatpush1.bf16.msra.mxu0 %v5725_v11  ;;  %3921 = vmatpush1.bf16.msra.mxu1 %v5728_v12 }
 0x2cb   : > { %3758 = vmatprep.subr.bf16.mxu0 %v5733_v13  ;;  %3922 = vmatprep.subr.bf16.mxu1 %v5736_v14 }
 0x2ce   : > { %3759 = vmatpush1.bf16.msra.mxu0 %v5731_v15  ;;  %3923 = vmatpush1.bf16.msra.mxu1 %v5734_v16 }
 0x2cf   : > { %3760 = vmatprep.subr.bf16.mxu0 %v5739_v17  ;;  %3924 = vmatprep.subr.bf16.mxu1 %v5742_v18  ;;  %v6363_v17 = vmov 1966171168  }
 0x2d0   : > { %v2010_v18 = vunpack.c.l.s4 %v6363_v17 }
 0x2d2   : > { %3761 = vmatpush1.bf16.msra.mxu0 %v5737_v19  ;;  %3925 = vmatpush1.bf16.msra.mxu1 %v5740_v20  ;;  %v2011_v28 = vunpack.c.0.s8 %v2010_v18 }
 0x2d3   : > { %3762 = vmatprep.subr.bf16.mxu0 %v5745_v23  ;;  %3926 = vmatprep.subr.bf16.mxu1 %v5748_v25 }
 0x2d6   : > { %3763 = vmatpush1.bf16.msra.mxu0 %v5743_v21  ;;  %3927 = vmatpush1.bf16.msra.mxu1 %v5746_v24 }
 0x2d7   : > { %3773 = vmatprep.subr.bf16.mxu0 %v5751_v26  ;;  %3937 = vmatprep.subr.bf16.mxu1 %v5754_v27 }
 0x34c   : > { %v1767_v51 = vpop.f32.mrb[0].mxu0  ;;  %v1810_v39 = vpop.f32.mrb[64].mxu1 }
 0x34d   : > { %v1768_v40 = vadd.f32 %v1767_v51, %v1376_v35  ;;  %v1811_v45 = vadd.f32 %v1810_v39, %v1384_v36  ;;  %v1769_v48 = vpop.f32.mrb[1].mxu0  ;;  %v1812_v49 = vpop.f32.mrb[65].mxu1 }
 0x34e   : > { %v1770_v50 = vadd.f32 %v1769_v48, %v1380_v37  ;;  %v1813_v52 = vadd.f32 %v1812_v49, %v1388_v38  ;;  %v1771_v53 = vpop.f32.mrb[2].mxu0  ;;  %v1814_v54 = vpop.f32.mrb[66].mxu1  ;;  %v6786_v48 = vsub.s32 %v2011_v28, %v6758_v29 }
 0x34f   : > { %v1905_v55 = vmul.f32 0.2, %v1768_v40  ;;  %v1907_v56 = vmul.f32 0.2, %v1811_v45  ;;  %v1772_v57 = vadd.f32 %v1771_v53, %v1376_v35  ;;  %v1815_v41 = vadd.f32 %v1814_v54, %v1384_v36  ;;  %v1773_v42 = vpop.f32.mrb[3].mxu0  ;;  %v1816_v43 = vpop.f32.mrb[67].mxu1 }
 0x350   : > { %v1906_v44 = vmul.f32 0.2, %v1770_v50  ;;  %v1908_v46 = vmul.f32 0.2, %v1813_v52  ;;  %v1774_v47 = vadd.f32 %v1773_v42, %v1380_v37  ;;  %v1817_v58 = vadd.f32 %v1816_v43, %v1388_v38 }
 0x351   : > { %v1913_v59 = vmul.f32 0.2, %v1772_v57  ;;  %v1915_v60 = vmul.f32 0.2, %v1815_v41  ;;  %v1921_v22 = vmax.f32 %v1768_v40, %v1905_v55  ;;  %v1923_v63 = vmax.f32 %v1811_v45, %v1907_v56 }
 0x352   : > { %v1914_v61 = vmul.f32 0.2, %v1774_v47  ;;  %v1916_v62 = vmul.f32 0.2, %v1817_v58  ;;  %v1922_v2 = vmax.f32 %v1770_v50, %v1906_v44  ;;  %v1924_v3 = vmax.f32 %v1813_v52, %v1908_v46 }
 0x353   : > { %v1929_v0 = vmax.f32 %v1772_v57, %v1913_v59  ;;  %v1931_v1 = vmax.f32 %v1815_v41, %v1915_v60  ;;  %v1391_v53 = vsub.s32 4, %v6758_v29  ;;  %v1399_v54 = vsub.s32 6, %v6758_v29 }
 0x354   : > { %v1930_v4 = vmax.f32 %v1774_v47, %v1914_v61  ;;  %v1932_v5 = vmax.f32 %v1817_v58, %v1916_v62  ;;  %v1395_v57 = vsub.s32 5, %v6758_v29  ;;  %v1403_v41 = vsub.s32 7, %v6758_v29  ;;  %v6048_v29 = vld [vmem:[#allocation7 + $0x34] ss:$8 sps:$4 sm:$0xff]  }
 0x355   : > { %v1937_v6 = vmax.f32 %v1921_v22, %v1929_v0  ;;  %v1951_v7 = vmax.f32 %v1923_v63, %v1931_v1  ;;  %v1392_v43 = vrot.slane %v6769_v32, %v1391_v53  ;;  %v1400_v44 = vrot.slane %v6769_v32, %v1399_v54 }
 0x356   : > { %v1944_v8 = vmax.f32 %v1922_v2, %v1930_v4  ;;  %v1958_v9 = vmax.f32 %v1924_v3, %v1932_v5  ;;  %v1396_v46 = vrot.slane %v6769_v32, %v1395_v57  ;;  %v1404_v47 = vrot.slane %v6769_v32, %v1403_v41 }
 0x357   : > { %v1938_v10 = vrot.slane %v1937_v6, 4  ;;  %v1952_v11 = vrot.slane %v1951_v7, 4 }
 0x358   : > { %v1945_v12 = vrot.slane %v1944_v8, 4  ;;  %v1959_v13 = vrot.slane %v1958_v9, 4 }
 0x359   : > { %v1939_v14 = vmax.f32 %v1937_v6, %v1938_v10  ;;  %v1953_v15 = vmax.f32 %v1951_v7, %v1952_v11 }
 0x35a   : > { %v1946_v16 = vmax.f32 %v1944_v8, %v1945_v12  ;;  %v1960_v19 = vmax.f32 %v1958_v9, %v1959_v13 }
 0x35b   : > { %v1940_v20 = vrot.slane %v1939_v14, 2  ;;  %v1954_v21 = vrot.slane %v1953_v15, 2 }
 0x35c   : > { %v1947_v23 = vrot.slane %v1946_v16, 2  ;;  %v1961_v24 = vrot.slane %v1960_v19, 2 }
 0x35d   : > { %v1941_v25 = vmax.f32 %v1939_v14, %v1940_v20  ;;  %v1955_v26 = vmax.f32 %v1953_v15, %v1954_v21 }
 0x35e   : > { %v1948_v27 = vmax.f32 %v1946_v16, %v1947_v23  ;;  %v1962_v35 = vmax.f32 %v1960_v19, %v1961_v24 }
 0x35f   : > { %v1942_v36 = vrot.slane %v1941_v25, 1  ;;  %v1956_v37 = vrot.slane %v1955_v26, 1 }
 0x360   : > { %v1949_v38 = vrot.slane %v1948_v27, 1  ;;  %v1963_v51 = vrot.slane %v1962_v35, 1 }
 0x361   : > { %v1943_v39 = vmax.f32 %v1941_v25, %v1942_v36  ;;  %v1957_v40 = vmax.f32 %v1955_v26, %v1956_v37 }
 0x362   : > { %v1950_v45 = vmax.f32 %v1948_v27, %v1949_v38  ;;  %v1964_v49 = vmax.f32 %v1962_v35, %v1963_v51 }
 0x364   : > { %v2005_v50 = vcombine.low %v1943_v39, %v1950_v45  ;;  %v2006_v52 = vcombine.low %v1957_v40, %v1964_v49 }
 0x366   : > { %v6791_v55 = vrot.slane %v2005_v50, %v6786_v48  ;;  %v6794_v56 = vrot.slane %v2006_v52, %v6786_v48 }
 0x368   : > { %v2037_v42 = vcombine.low %v6791_v55, %v6794_v56  ;;  %v5749_v56 = vld [vmem:[#allocation5 + $0x200] ss:$16 sps:$4 sm:$0xff]  }
 0x36c   : > { %v1853_v58 = vpop.f32.mrb[4].mxu0  ;;  %v1896_v59 = vpop.f32.mrb[68].mxu1 }
 0x36d   : > { %v1854_v60 = vadd.f32 %v1853_v58, %v1392_v43  ;;  %v1897_v61 = vadd.f32 %v1896_v59, %v1400_v44  ;;  %v1855_v62 = vpop.f32.mrb[5].mxu0  ;;  %v1898_v22 = vpop.f32.mrb[69].mxu1 }
 0x36e   : > { %v1856_v63 = vadd.f32 %v1855_v62, %v1396_v46  ;;  %v1899_v0 = vadd.f32 %v1898_v22, %v1404_v47  ;;  %v1857_v1 = vpop.f32.mrb[6].mxu0  ;;  %v1900_v2 = vpop.f32.mrb[70].mxu1 }
 0x36f   : > { %v1909_v3 = vmul.f32 0.2, %v1854_v60  ;;  %v1911_v4 = vmul.f32 0.2, %v1897_v61  ;;  %v1858_v5 = vadd.f32 %v1857_v1, %v1392_v43  ;;  %v1901_v6 = vadd.f32 %v1900_v2, %v1400_v44  ;;  %v1859_v7 = vpop.f32.mrb[7].mxu0  ;;  %v1902_v8 = vpop.f32.mrb[71].mxu1 }
 0x370   : > { %v1910_v9 = vmul.f32 0.2, %v1856_v63  ;;  %v1912_v10 = vmul.f32 0.2, %v1899_v0  ;;  %v1860_v11 = vadd.f32 %v1859_v7, %v1396_v46  ;;  %v1903_v32 = vadd.f32 %v1902_v8, %v1404_v47 }
 0x371   : > { %v1917_v12 = vmul.f32 0.2, %v1858_v5  ;;  %v1919_v13 = vmul.f32 0.2, %v1901_v6  ;;  %v1925_v16 = vmax.f32 %v1854_v60, %v1909_v3  ;;  %v1927_v17 = vmax.f32 %v1897_v61, %v1911_v4 }
 0x372   : > { %v1918_v14 = vmul.f32 0.2, %v1860_v11  ;;  %v1920_v15 = vmul.f32 0.2, %v1903_v32  ;;  %v1926_v20 = vmax.f32 %v1856_v63, %v1910_v9  ;;  %v1928_v21 = vmax.f32 %v1899_v0, %v1912_v10 }
 0x373   : > { %v1933_v18 = vmax.f32 %v1858_v5, %v1917_v12  ;;  %v1935_v19 = vmax.f32 %v1901_v6, %v1919_v13  ;;  %v2045_v7 = vrot.slane %v2037_v42, %v6786_v48  ;;  %v5752_v42 = vld [vmem:[#allocation5 + $0x208] ss:$16 sps:$4 sm:$0xff]   ;;  %v5757_v12 = vld [vmem:[#allocation5 + $0x224] ss:$16 sps:$4 sm:$0xff]   ;;  %v5760_v13 = vld [vmem:[#allocation5 + $0x22c] ss:$16 sps:$4 sm:$0xff]  }
 0x374   : > { %v1934_v23 = vmax.f32 %v1860_v11, %v1918_v14  ;;  %v1936_v24 = vmax.f32 %v1903_v32, %v1920_v15  ;;  %v5755_v15 = vld [vmem:[#allocation5 + $0x220] ss:$16 sps:$4 sm:$0xff]  }
 0x375   : > { %v1965_v25 = vmax.f32 %v1925_v16, %v1933_v18  ;;  %v1979_v26 = vmax.f32 %v1927_v17, %v1935_v19  ;;  %v5758_v16 = vld [vmem:[#allocation5 + $0x228] ss:$16 sps:$4 sm:$0xff]   ;;  %v5763_v17 = vld [vmem:[#allocation5 + $0x244] ss:$16 sps:$4 sm:$0xff]   ;;  %v5766_v18 = vld [vmem:[#allocation5 + $0x24c] ss:$16 sps:$4 sm:$0xff]  }
 0x376   : > { %v1972_v27 = vmax.f32 %v1926_v20, %v1934_v23  ;;  %v1986_v28 = vmax.f32 %v1928_v21, %v1936_v24  ;;  %v5761_v19 = vld [vmem:[#allocation5 + $0x240] ss:$16 sps:$4 sm:$0xff]   ;;  %v5764_v20 = vld [vmem:[#allocation5 + $0x248] ss:$16 sps:$4 sm:$0xff]   ;;  %v5769_v21 = vld [vmem:[#allocation5 + $0x264] ss:$16 sps:$4 sm:$0xff]  }
 0x377   : > { %v1966_v35 = vrot.slane %v1965_v25, 4  ;;  %v1980_v36 = vrot.slane %v1979_v26, 4  ;;  %v5772_v23 = vld [vmem:[#allocation5 + $0x26c] ss:$16 sps:$4 sm:$0xff]   ;;  %v5767_v24 = vld [vmem:[#allocation5 + $0x260] ss:$16 sps:$4 sm:$0xff]  }
 0x378   : > { %v1973_v37 = vrot.slane %v1972_v27, 4  ;;  %v1987_v38 = vrot.slane %v1986_v28, 4 }
 0x379   : > { %v1967_v51 = vmax.f32 %v1965_v25, %v1966_v35  ;;  %v1981_v39 = vmax.f32 %v1979_v26, %v1980_v36  ;;  %v5770_v25 = vld [vmem:[#allocation5 + $0x268] ss:$16 sps:$4 sm:$0xff]   ;;  %v5775_v26 = vld [vmem:[#allocation5 + $0x284] ss:$16 sps:$4 sm:$0xff]  }
 0x37a   : > { %v1974_v40 = vmax.f32 %v1972_v27, %v1973_v37  ;;  %v1988_v45 = vmax.f32 %v1986_v28, %v1987_v38  ;;  %v5778_v27 = vld [vmem:[#allocation5 + $0x28c] ss:$16 sps:$4 sm:$0xff]   ;;  %v5773_v28 = vld [vmem:[#allocation5 + $0x280] ss:$16 sps:$4 sm:$0xff]   ;;  %v5776_v35 = vld [vmem:[#allocation5 + $0x288] ss:$16 sps:$4 sm:$0xff]  }
 0x37b   : > { %v1968_v49 = vrot.slane %v1967_v51, 2  ;;  %v1982_v50 = vrot.slane %v1981_v39, 2  ;;  %v5781_v36 = vld [vmem:[#allocation5 + $0x2a4] ss:$16 sps:$4 sm:$0xff]   ;;  %v5784_v37 = vld [vmem:[#allocation5 + $0x2ac] ss:$16 sps:$4 sm:$0xff]  }
 0x37c   : > { %v1975_v52 = vrot.slane %v1974_v40, 2  ;;  %v1989_v43 = vrot.slane %v1988_v45, 2  ;;  %v5779_v38 = vld [vmem:[#allocation5 + $0x2a0] ss:$16 sps:$4 sm:$0xff]  }
 0x37d   : > { %v1969_v44 = vmax.f32 %v1967_v51, %v1968_v49  ;;  %v1983_v46 = vmax.f32 %v1981_v39, %v1982_v50  ;;  %v5782_v51 = vld [vmem:[#allocation5 + $0x2a8] ss:$16 sps:$4 sm:$0xff]   ;;  %v5787_v39 = vld [vmem:[#allocation5 + $0x2c4] ss:$16 sps:$4 sm:$0xff]  }
 0x37e   : > { %v1976_v47 = vmax.f32 %v1974_v40, %v1975_v52  ;;  %v1990_v58 = vmax.f32 %v1988_v45, %v1989_v43  ;;  %v5790_v40 = vld [vmem:[#allocation5 + $0x2cc] ss:$16 sps:$4 sm:$0xff]   ;;  %v5785_v45 = vld [vmem:[#allocation5 + $0x2c0] ss:$16 sps:$4 sm:$0xff]   ;;  %v5788_v49 = vld [vmem:[#allocation5 + $0x2c8] ss:$16 sps:$4 sm:$0xff]  }
 0x37f   : > { %v1970_v59 = vrot.slane %v1969_v44, 1  ;;  %v1984_v60 = vrot.slane %v1983_v46, 1  ;;  %v5793_v50 = vld [vmem:[#allocation5 + $0x2e4] ss:$16 sps:$4 sm:$0xff]   ;;  %v5796_v52 = vld [vmem:[#allocation5 + $0x2ec] ss:$16 sps:$4 sm:$0xff]  }
 0x380   : > { %v1977_v61 = vrot.slane %v1976_v47, 1  ;;  %v1991_v62 = vrot.slane %v1990_v58, 1  ;;  %v5791_v43 = vld [vmem:[#allocation5 + $0x2e0] ss:$16 sps:$4 sm:$0xff]  }
 0x381   : > { %v1971_v22 = vmax.f32 %v1969_v44, %v1970_v59  ;;  %v1985_v63 = vmax.f32 %v1983_v46, %v1984_v60  ;;  %v5794_v44 = vld [vmem:[#allocation5 + $0x2e8] ss:$16 sps:$4 sm:$0xff]   ;;  %v5799_v46 = vld [vmem:[#allocation5 + $0x304] ss:$16 sps:$4 sm:$0xff]  }
 0x382   : > { %v1978_v0 = vmax.f32 %v1976_v47, %v1977_v61  ;;  %v1992_v1 = vmax.f32 %v1990_v58, %v1991_v62  ;;  %v5802_v47 = vld [vmem:[#allocation5 + $0x30c] ss:$16 sps:$4 sm:$0xff]   ;;  %v5797_v58 = vld [vmem:[#allocation5 + $0x300] ss:$16 sps:$4 sm:$0xff]   ;;  %v5800_v59 = vld [vmem:[#allocation5 + $0x308] ss:$16 sps:$4 sm:$0xff]  }
 0x383   : > { %v5805_v60 = vld [vmem:[#allocation5 + $0x324] ss:$16 sps:$4 sm:$0xff]   ;;  %v5808_v61 = vld [vmem:[#allocation5 + $0x32c] ss:$16 sps:$4 sm:$0xff]   ;;  %v5803_v62 = vld [vmem:[#allocation5 + $0x320] ss:$16 sps:$4 sm:$0xff]  }
 0x384   : > { %v2007_v2 = vcombine.low %v1971_v22, %v1978_v0  ;;  %v2008_v3 = vcombine.low %v1985_v63, %v1992_v1  ;;  %v5806_v22 = vld [vmem:[#allocation5 + $0x328] ss:$16 sps:$4 sm:$0xff]   ;;  %v5811_v63 = vld [vmem:[#allocation5 + $0x344] ss:$16 sps:$4 sm:$0xff]   ;;  %v5814_v0 = vld [vmem:[#allocation5 + $0x34c] ss:$16 sps:$4 sm:$0xff]  }
 0x385   : > { %v5809_v1 = vld [vmem:[#allocation5 + $0x340] ss:$16 sps:$4 sm:$0xff]  }
 0x386   : > { %v2029_v4 = vrot.slane %v2007_v2, %v6786_v48  ;;  %v2036_v5 = vrot.slane %v2008_v3, %v6786_v48  ;;  %v5812_v2 = vld [vmem:[#allocation5 + $0x348] ss:$16 sps:$4 sm:$0xff]   ;;  %v5817_v3 = vld [vmem:[#allocation5 + $0x364] ss:$16 sps:$4 sm:$0xff]  }
 0x388   : > { %v2038_v6 = vcombine.low %v2029_v4, %v2036_v5  ;;  %v5820_v4 = vld [vmem:[#allocation5 + $0x36c] ss:$16 sps:$4 sm:$0xff]   ;;  %v5815_v5 = vld [vmem:[#allocation5 + $0x360] ss:$16 sps:$4 sm:$0xff]  }
 0x38a   : > { %v2052_v8 = vrot.slane %v2038_v6, %v6786_v48  ;;  %v5818_v6 = vld [vmem:[#allocation5 + $0x368] ss:$16 sps:$4 sm:$0xff]  }
 0x38c   : > { %v6823_v9 = vcombine.low %v2045_v7, %v2052_v8  ;;  %v5823_v7 = vld [vmem:[#allocation5 + $0x384] ss:$16 sps:$4 sm:$0xff]   ;;  %v5826_v8 = vld [vmem:[#allocation5 + $0x38c] ss:$16 sps:$4 sm:$0xff]  }
 0x38e   : > { %2055 = vst [vmem:[%s6825_s28] sm:$0xff] %v6823_v9  ;;  %v2133_v10 = vrot.slane %v6823_v9, %v6772_v33  ;;  %v2129_v11 = vrot.slane %v6823_v9, %v6761_v30  ;;  %v2141_v32 = vrot.slane %v6823_v9, %v6775_v34 }
 0x390   : > { %v2167_v55 = vpack.c.bf16 %v2133_v10, %v2133_v10  ;;  %v2166_v48 = vpack.c.bf16 %v2129_v11, %v2129_v11  ;;  %v2169_v14 = vpack.c.bf16 %v2141_v32, %v2141_v32  ;;  %v5821_v10 = vld [vmem:[#allocation5 + $0x380] ss:$16 sps:$4 sm:$0xff]   ;;  %v5824_v11 = vld [vmem:[#allocation5 + $0x388] ss:$16 sps:$4 sm:$0xff]   ;;  %v5829_v32 = vld [vmem:[#allocation5 + $0x3a4] ss:$16 sps:$4 sm:$0xff]  }
 0x392   : > { %3764 = vmatprep.mubr.bf16.mxu0 %v2167_v55  ;;  %3928 = vmatprep.mubr.bf16.mxu1 %v2167_v55  ;;  %v5832_v55 = vld [vmem:[#allocation5 + $0x3ac] ss:$16 sps:$4 sm:$0xff]  }
 0x393   : > { %3765 = vmatmul.mubr.bf16.vlgmr.msra.gmra.mrb[8].mxu0 %v2166_v48  ;;  %3929 = vmatmul.mubr.bf16.vlgmr.msra.gmra.mrb[72].mxu1 %v2166_v48  ;;  %v5835_v48 = vld [vmem:[#allocation5 + $0x3c4] ss:$16 sps:$4 sm:$0xff]  }
 0x394   : > { %3774 = vmatpush1.bf16.msra.mxu0 %v5749_v56  ;;  %3938 = vmatpush1.bf16.msra.mxu1 %v5752_v42  ;;  %v5827_v56 = vld [vmem:[#allocation5 + $0x3a0] ss:$16 sps:$4 sm:$0xff]   ;;  %v5830_v42 = vld [vmem:[#allocation5 + $0x3a8] ss:$16 sps:$4 sm:$0xff]  }
 0x395   : > { %3805 = vmatprep.mubr.bf16.mxu0 %v2169_v14  ;;  %3969 = vmatprep.mubr.bf16.mxu1 %v2169_v14  ;;  %v5836_v14 = vld [vmem:[#allocation5 + $0x3c8] ss:$16 sps:$4 sm:$0xff]  }
 0x396   : > { %3775 = vmatprep.subr.bf16.mxu0 %v5757_v12  ;;  %3939 = vmatprep.subr.bf16.mxu1 %v5760_v13  ;;  %v5838_v12 = vld [vmem:[#allocation5 + $0x3cc] ss:$16 sps:$4 sm:$0xff]   ;;  %v5833_v13 = vld [vmem:[#allocation5 + $0x3c0] ss:$16 sps:$4 sm:$0xff]  }
 0x398   : > { %3776 = vmatpush1.bf16.msra.mxu0 %v5755_v15  ;;  %3940 = vmatpush1.bf16.msra.mxu1 %v5758_v16  ;;  %v5841_v15 = vld [vmem:[#allocation5 + $0x3e4] ss:$16 sps:$4 sm:$0xff]   ;;  %v5844_v16 = vld [vmem:[#allocation5 + $0x3ec] ss:$16 sps:$4 sm:$0xff]  }
 0x399   : > { %3777 = vmatprep.subr.bf16.mxu0 %v5763_v17  ;;  %3941 = vmatprep.subr.bf16.mxu1 %v5766_v18  ;;  %v5839_v17 = vld [vmem:[#allocation5 + $0x3e0] ss:$16 sps:$4 sm:$0xff]   ;;  %v5842_v18 = vld [vmem:[#allocation5 + $0x3e8] ss:$16 sps:$4 sm:$0xff]  }
 0x39c   : > { %3778 = vmatpush1.bf16.msra.mxu0 %v5761_v19  ;;  %3942 = vmatpush1.bf16.msra.mxu1 %v5764_v20  ;;  %v2137_v19 = vrot.slane %v6823_v9, %v6764_v31  ;;  %v5847_v20 = vld [vmem:[#allocation5 + $0x404] ss:$16 sps:$4 sm:$0xff]  }
 0x39d   : > { %3779 = vmatprep.subr.bf16.mxu0 %v5769_v21  ;;  %3943 = vmatprep.subr.bf16.mxu1 %v5772_v23  ;;  %v5850_v21 = vld [vmem:[#allocation5 + $0x40c] ss:$16 sps:$4 sm:$0xff]   ;;  %v2149_v23 = vrot.slane %v6823_v9, %v1395_v57 }
 0x39e   : > { %v5862_v57 = vld [vmem:[#allocation5 + $0x44c] ss:$16 sps:$4 sm:$0xff]  }
 0x3a0   : > { %3780 = vmatpush1.bf16.msra.mxu0 %v5767_v24  ;;  %3944 = vmatpush1.bf16.msra.mxu1 %v5770_v25  ;;  %v5845_v24 = vld [vmem:[#allocation5 + $0x400] ss:$16 sps:$4 sm:$0xff]   ;;  %v2168_v25 = vpack.c.bf16 %v2137_v19, %v2137_v19  ;;  %v5920_v19 = vld [vmem:[#allocation5 + $0x588] ss:$16 sps:$4 sm:$0xff]  }
 0x3a1   : > { %3781 = vmatprep.subr.bf16.mxu0 %v5775_v26  ;;  %3945 = vmatprep.subr.bf16.mxu1 %v5778_v27  ;;  %v5848_v26 = vld [vmem:[#allocation5 + $0x408] ss:$16 sps:$4 sm:$0xff]   ;;  %v2171_v27 = vpack.c.bf16 %v2149_v23, %v2149_v23  ;;  %v5923_v23 = vld [vmem:[#allocation5 + $0x5a0] ss:$16 sps:$4 sm:$0xff]  }
 0x3a4   : > { %3782 = vmatpush1.bf16.msra.mxu0 %v5773_v28  ;;  %3946 = vmatpush1.bf16.msra.mxu1 %v5776_v35  ;;  %v5853_v28 = vld [vmem:[#allocation5 + $0x424] ss:$16 sps:$4 sm:$0xff]   ;;  %v5856_v35 = vld [vmem:[#allocation5 + $0x42c] ss:$16 sps:$4 sm:$0xff]  }
 0x3a5   : > { %3783 = vmatprep.subr.bf16.mxu0 %v5781_v36  ;;  %3947 = vmatprep.subr.bf16.mxu1 %v5784_v37  ;;  %v5851_v36 = vld [vmem:[#allocation5 + $0x420] ss:$16 sps:$4 sm:$0xff]   ;;  %v5854_v37 = vld [vmem:[#allocation5 + $0x428] ss:$16 sps:$4 sm:$0xff]  }
 0x3a8   : > { %3784 = vmatpush1.bf16.msra.mxu0 %v5779_v38  ;;  %3948 = vmatpush1.bf16.msra.mxu1 %v5782_v51  ;;  %v5859_v38 = vld [vmem:[#allocation5 + $0x444] ss:$16 sps:$4 sm:$0xff]   ;;  %v5857_v51 = vld [vmem:[#allocation5 + $0x440] ss:$16 sps:$4 sm:$0xff]  }
 0x3a9   : > { %3785 = vmatprep.subr.bf16.mxu0 %v5787_v39  ;;  %3949 = vmatprep.subr.bf16.mxu1 %v5790_v40  ;;  %v5860_v39 = vld [vmem:[#allocation5 + $0x448] ss:$16 sps:$4 sm:$0xff]   ;;  %v5865_v40 = vld [vmem:[#allocation5 + $0x464] ss:$16 sps:$4 sm:$0xff]  }
 0x3ac   : > { %3786 = vmatpush1.bf16.msra.mxu0 %v5785_v45  ;;  %3950 = vmatpush1.bf16.msra.mxu1 %v5788_v49  ;;  %v5868_v45 = vld [vmem:[#allocation5 + $0x46c] ss:$16 sps:$4 sm:$0xff]   ;;  %v5863_v49 = vld [vmem:[#allocation5 + $0x460] ss:$16 sps:$4 sm:$0xff]  }
 0x3ad   : > { %3787 = vmatprep.subr.bf16.mxu0 %v5793_v50  ;;  %3951 = vmatprep.subr.bf16.mxu1 %v5796_v52  ;;  %v5866_v50 = vld [vmem:[#allocation5 + $0x468] ss:$16 sps:$4 sm:$0xff]   ;;  %v5871_v52 = vld [vmem:[#allocation5 + $0x484] ss:$16 sps:$4 sm:$0xff]  }
 0x3b0   : > { %3788 = vmatpush1.bf16.msra.mxu0 %v5791_v43  ;;  %3952 = vmatpush1.bf16.msra.mxu1 %v5794_v44  ;;  %v5874_v43 = vld [vmem:[#allocation5 + $0x48c] ss:$16 sps:$4 sm:$0xff]   ;;  %v5869_v44 = vld [vmem:[#allocation5 + $0x480] ss:$16 sps:$4 sm:$0xff]  }
 0x3b1   : > { %3789 = vmatprep.subr.bf16.mxu0 %v5799_v46  ;;  %3953 = vmatprep.subr.bf16.mxu1 %v5802_v47  ;;  %v5872_v46 = vld [vmem:[#allocation5 + $0x488] ss:$16 sps:$4 sm:$0xff]   ;;  %v5877_v47 = vld [vmem:[#allocation5 + $0x4a4] ss:$16 sps:$4 sm:$0xff]  }
 0x3b4   : > { %3790 = vmatpush1.bf16.msra.mxu0 %v5797_v58  ;;  %3954 = vmatpush1.bf16.msra.mxu1 %v5800_v59  ;;  %v5880_v58 = vld [vmem:[#allocation5 + $0x4ac] ss:$16 sps:$4 sm:$0xff]   ;;  %v5875_v59 = vld [vmem:[#allocation5 + $0x4a0] ss:$16 sps:$4 sm:$0xff]  }
 0x3b5   : > { %3791 = vmatprep.subr.bf16.mxu0 %v5805_v60  ;;  %3955 = vmatprep.subr.bf16.mxu1 %v5808_v61  ;;  %v5878_v60 = vld [vmem:[#allocation5 + $0x4a8] ss:$16 sps:$4 sm:$0xff]   ;;  %v5883_v61 = vld [vmem:[#allocation5 + $0x4c4] ss:$16 sps:$4 sm:$0xff]  }
 0x3b8   : > { %3792 = vmatpush1.bf16.msra.mxu0 %v5803_v62  ;;  %3956 = vmatpush1.bf16.msra.mxu1 %v5806_v22  ;;  %v5886_v62 = vld [vmem:[#allocation5 + $0x4cc] ss:$16 sps:$4 sm:$0xff]   ;;  %v5881_v22 = vld [vmem:[#allocation5 + $0x4c0] ss:$16 sps:$4 sm:$0xff]  }
 0x3b9   : > { %3793 = vmatprep.subr.bf16.mxu0 %v5811_v63  ;;  %3957 = vmatprep.subr.bf16.mxu1 %v5814_v0  ;;  %v5884_v63 = vld [vmem:[#allocation5 + $0x4c8] ss:$16 sps:$4 sm:$0xff]   ;;  %v5889_v0 = vld [vmem:[#allocation5 + $0x4e4] ss:$16 sps:$4 sm:$0xff]  }
 0x3bc   : > { %3794 = vmatpush1.bf16.msra.mxu0 %v5809_v1  ;;  %3958 = vmatpush1.bf16.msra.mxu1 %v5812_v2  ;;  %v5892_v1 = vld [vmem:[#allocation5 + $0x4ec] ss:$16 sps:$4 sm:$0xff]   ;;  %v5887_v2 = vld [vmem:[#allocation5 + $0x4e0] ss:$16 sps:$4 sm:$0xff]  }
 0x3bd   : > { %3795 = vmatprep.subr.bf16.mxu0 %v5817_v3  ;;  %3959 = vmatprep.subr.bf16.mxu1 %v5820_v4  ;;  %v5890_v3 = vld [vmem:[#allocation5 + $0x4e8] ss:$16 sps:$4 sm:$0xff]   ;;  %v5895_v4 = vld [vmem:[#allocation5 + $0x504] ss:$16 sps:$4 sm:$0xff]  }
 0x3c0   : > { %3796 = vmatpush1.bf16.msra.mxu0 %v5815_v5  ;;  %3960 = vmatpush1.bf16.msra.mxu1 %v5818_v6  ;;  %v5898_v5 = vld [vmem:[#allocation5 + $0x50c] ss:$16 sps:$4 sm:$0xff]   ;;  %v5893_v6 = vld [vmem:[#allocation5 + $0x500] ss:$16 sps:$4 sm:$0xff]  }
 0x3c1   : > { %3797 = vmatprep.subr.bf16.mxu0 %v5823_v7  ;;  %3961 = vmatprep.subr.bf16.mxu1 %v5826_v8  ;;  %v5896_v7 = vld [vmem:[#allocation5 + $0x508] ss:$16 sps:$4 sm:$0xff]   ;;  %v5901_v8 = vld [vmem:[#allocation5 + $0x524] ss:$16 sps:$4 sm:$0xff]  }
 0x3c4   : > { %3798 = vmatpush1.bf16.msra.mxu0 %v5821_v10  ;;  %3962 = vmatpush1.bf16.msra.mxu1 %v5824_v11  ;;  %v5904_v10 = vld [vmem:[#allocation5 + $0x52c] ss:$16 sps:$4 sm:$0xff]   ;;  %v5899_v11 = vld [vmem:[#allocation5 + $0x520] ss:$16 sps:$4 sm:$0xff]  }
 0x3c5   : > { %3799 = vmatprep.subr.bf16.mxu0 %v5829_v32  ;;  %3963 = vmatprep.subr.bf16.mxu1 %v5832_v55  ;;  %v5902_v32 = vld [vmem:[#allocation5 + $0x528] ss:$16 sps:$4 sm:$0xff]   ;;  %v5907_v55 = vld [vmem:[#allocation5 + $0x544] ss:$16 sps:$4 sm:$0xff]  }
 0x3c8   : > { %3800 = vmatpush1.bf16.msra.mxu0 %v5827_v56  ;;  %3964 = vmatpush1.bf16.msra.mxu1 %v5830_v42  ;;  %v5910_v56 = vld [vmem:[#allocation5 + $0x54c] ss:$16 sps:$4 sm:$0xff]   ;;  %v5905_v42 = vld [vmem:[#allocation5 + $0x540] ss:$16 sps:$4 sm:$0xff]  }
 0x3c9   : > { %3801 = vmatprep.subr.bf16.mxu0 %v5835_v48  ;;  %3965 = vmatprep.subr.bf16.mxu1 %v5838_v12  ;;  %v5908_v48 = vld [vmem:[#allocation5 + $0x548] ss:$16 sps:$4 sm:$0xff]   ;;  %v5913_v12 = vld [vmem:[#allocation5 + $0x564] ss:$16 sps:$4 sm:$0xff]  }
 0x3cc   : > { %3802 = vmatpush1.bf16.msra.mxu0 %v5833_v13  ;;  %3966 = vmatpush1.bf16.msra.mxu1 %v5836_v14  ;;  %v5916_v13 = vld [vmem:[#allocation5 + $0x56c] ss:$16 sps:$4 sm:$0xff]   ;;  %v5911_v14 = vld [vmem:[#allocation5 + $0x560] ss:$16 sps:$4 sm:$0xff]  }
 0x3cd   : > { %3803 = vmatprep.subr.bf16.mxu0 %v5841_v15  ;;  %3967 = vmatprep.subr.bf16.mxu1 %v5844_v16  ;;  %v5914_v15 = vld [vmem:[#allocation5 + $0x568] ss:$16 sps:$4 sm:$0xff]   ;;  %v5919_v16 = vld [vmem:[#allocation5 + $0x584] ss:$16 sps:$4 sm:$0xff]  }
 0x3d0   : > { %3804 = vmatpush1.bf16.msra.mxu0 %v5839_v17  ;;  %3968 = vmatpush1.bf16.msra.mxu1 %v5842_v18  ;;  %v5922_v17 = vld [vmem:[#allocation5 + $0x58c] ss:$16 sps:$4 sm:$0xff]   ;;  %v5917_v18 = vld [vmem:[#allocation5 + $0x580] ss:$16 sps:$4 sm:$0xff]  }
 0x3d1   : > { %3814 = vmatprep.subr.bf16.mxu0 %v5847_v20  ;;  %3978 = vmatprep.subr.bf16.mxu1 %v5850_v21  ;;  %v5925_v20 = vld [vmem:[#allocation5 + $0x5a4] ss:$16 sps:$4 sm:$0xff]   ;;  %v5928_v21 = vld [vmem:[#allocation5 + $0x5ac] ss:$16 sps:$4 sm:$0xff]  }
 0x3d3   : > { %3806 = vmatmul.mubr.bf16.vlgmr.msra.gmra.mrb[8].mxu0 %v2168_v25  ;;  %3970 = vmatmul.mubr.bf16.vlgmr.msra.gmra.mrb[72].mxu1 %v2168_v25  ;;  %v5931_v25 = vld [vmem:[#allocation5 + $0x5c4] ss:$16 sps:$4 sm:$0xff]  }
 0x3d4   : > { %3815 = vmatpush1.bf16.msra.mxu0 %v5845_v24  ;;  %3846 = vmatprep.mubr.bf16.mxu0 %v2171_v27  ;;  %v5926_v24 = vld [vmem:[#allocation5 + $0x5a8] ss:$16 sps:$4 sm:$0xff]  }
 0x3d5   : > { %3979 = vmatpush1.bf16.msra.mxu1 %v5848_v26  ;;  %4010 = vmatprep.mubr.bf16.mxu1 %v2171_v27  ;;  %v5934_v26 = vld [vmem:[#allocation5 + $0x5cc] ss:$16 sps:$4 sm:$0xff]   ;;  %v5929_v27 = vld [vmem:[#allocation5 + $0x5c0] ss:$16 sps:$4 sm:$0xff]  }
 0x3d6   : > { %3816 = vmatprep.subr.bf16.mxu0 %v5853_v28  ;;  %3980 = vmatprep.subr.bf16.mxu1 %v5856_v35  ;;  %v5932_v28 = vld [vmem:[#allocation5 + $0x5c8] ss:$16 sps:$4 sm:$0xff]   ;;  %v5937_v35 = vld [vmem:[#allocation5 + $0x5e4] ss:$16 sps:$4 sm:$0xff]  }
 0x3d8   : > { %3817 = vmatpush1.bf16.msra.mxu0 %v5851_v36  ;;  %v5940_v36 = vld [vmem:[#allocation5 + $0x5ec] ss:$16 sps:$4 sm:$0xff]  }
 0x3d9   : > { %3981 = vmatpush1.bf16.msra.mxu1 %v5854_v37  ;;  %3818 = vmatprep.subr.bf16.mxu0 %v5859_v38  ;;  %v5935_v37 = vld [vmem:[#allocation5 + $0x5e0] ss:$16 sps:$4 sm:$0xff]   ;;  %v5938_v38 = vld [vmem:[#allocation5 + $0x5e8] ss:$16 sps:$4 sm:$0xff]  }
 0x3da   : > { %3982 = vmatprep.subr.bf16.mxu1 %v5862_v57  ;;  %v2145_v57 = vrot.slane %v6823_v9, %v1391_v53  ;;  %v5947_v53 = vld [vmem:[#allocation5 + $0x620] ss:$16 sps:$4 sm:$0xff]  }
 0x3dc   : > { %3819 = vmatpush1.bf16.msra.mxu0 %v5857_v51  ;;  %v5943_v51 = vld [vmem:[#allocation5 + $0x604] ss:$16 sps:$4 sm:$0xff]  }
 0x3dd   : > { %3983 = vmatpush1.bf16.msra.mxu1 %v5860_v39  ;;  %3820 = vmatprep.subr.bf16.mxu0 %v5865_v40  ;;  %v5946_v39 = vld [vmem:[#allocation5 + $0x60c] ss:$16 sps:$4 sm:$0xff]   ;;  %v2157_v40 = vrot.slane %v6823_v9, %v1403_v41 }
 0x3de   : > { %3984 = vmatprep.subr.bf16.mxu1 %v5868_v45  ;;  %v5941_v45 = vld [vmem:[#allocation5 + $0x600] ss:$16 sps:$4 sm:$0xff]   ;;  %v5958_v41 = vld [vmem:[#allocation5 + $0x64c] ss:$16 sps:$4 sm:$0xff]  }
 0x3e0   : > { %3821 = vmatpush1.bf16.msra.mxu0 %v5863_v49  ;;  %v2170_v49 = vpack.c.bf16 %v2145_v57, %v2145_v57  ;;  %v6024_v57 = vld [vmem:[#allocation5 + $0x7ac] ss:$16 sps:$4 sm:$0xff]  }
 0x3e1   : > { %3985 = vmatpush1.bf16.msra.mxu1 %v5866_v50  ;;  %3822 = vmatprep.subr.bf16.mxu0 %v5871_v52  ;;  %v5944_v50 = vld [vmem:[#allocation5 + $0x608] ss:$16 sps:$4 sm:$0xff]   ;;  %v5949_v52 = vld [vmem:[#allocation5 + $0x624] ss:$16 sps:$4 sm:$0xff]  }
 0x3e2   : > { %3986 = vmatprep.subr.bf16.mxu1 %v5874_v43  ;;  %v2173_v43 = vpack.c.bf16 %v2157_v40, %v2157_v40  ;;  %v6027_v40 = vld [vmem:[#allocation5 + $0x7c4] ss:$16 sps:$4 sm:$0xff]  }
 0x3e4   : > { %3823 = vmatpush1.bf16.msra.mxu0 %v5869_v44  ;;  %v5952_v44 = vld [vmem:[#allocation5 + $0x62c] ss:$16 sps:$4 sm:$0xff]  }
 0x3e5   : > { %3987 = vmatpush1.bf16.msra.mxu1 %v5872_v46  ;;  %3824 = vmatprep.subr.bf16.mxu0 %v5877_v47  ;;  %v5950_v46 = vld [vmem:[#allocation5 + $0x628] ss:$16 sps:$4 sm:$0xff]   ;;  %v5955_v47 = vld [vmem:[#allocation5 + $0x644] ss:$16 sps:$4 sm:$0xff]  }
 0x3e6   : > { %3988 = vmatprep.subr.bf16.mxu1 %v5880_v58  ;;  %v5953_v58 = vld [vmem:[#allocation5 + $0x640] ss:$16 sps:$4 sm:$0xff]  }
 0x3e8   : > { %3825 = vmatpush1.bf16.msra.mxu0 %v5875_v59  ;;  %v5956_v59 = vld [vmem:[#allocation5 + $0x648] ss:$16 sps:$4 sm:$0xff]  }
 0x3e9   : > { %3989 = vmatpush1.bf16.msra.mxu1 %v5878_v60  ;;  %3826 = vmatprep.subr.bf16.mxu0 %v5883_v61  ;;  %v5961_v60 = vld [vmem:[#allocation5 + $0x664] ss:$16 sps:$4 sm:$0xff]   ;;  %v5964_v61 = vld [vmem:[#allocation5 + $0x66c] ss:$16 sps:$4 sm:$0xff]  }
 0x3ea   : > { %3990 = vmatprep.subr.bf16.mxu1 %v5886_v62  ;;  %v5959_v62 = vld [vmem:[#allocation5 + $0x660] ss:$16 sps:$4 sm:$0xff]  }
 0x3ec   : > { %3827 = vmatpush1.bf16.msra.mxu0 %v5881_v22  ;;  %v5962_v22 = vld [vmem:[#allocation5 + $0x668] ss:$16 sps:$4 sm:$0xff]  }
 0x3ed   : > { %3991 = vmatpush1.bf16.msra.mxu1 %v5884_v63  ;;  %3828 = vmatprep.subr.bf16.mxu0 %v5889_v0  ;;  %v5967_v63 = vld [vmem:[#allocation5 + $0x684] ss:$16 sps:$4 sm:$0xff]   ;;  %v5970_v0 = vld [vmem:[#allocation5 + $0x68c] ss:$16 sps:$4 sm:$0xff]  }
 0x3ee   : > { %3992 = vmatprep.subr.bf16.mxu1 %v5892_v1  ;;  %v5965_v1 = vld [vmem:[#allocation5 + $0x680] ss:$16 sps:$4 sm:$0xff]  }
 0x3f0   : > { %3829 = vmatpush1.bf16.msra.mxu0 %v5887_v2  ;;  %v5968_v2 = vld [vmem:[#allocation5 + $0x688] ss:$16 sps:$4 sm:$0xff]  }
 0x3f1   : > { %3993 = vmatpush1.bf16.msra.mxu1 %v5890_v3  ;;  %3830 = vmatprep.subr.bf16.mxu0 %v5895_v4  ;;  %v5973_v3 = vld [vmem:[#allocation5 + $0x6a4] ss:$16 sps:$4 sm:$0xff]   ;;  %v5976_v4 = vld [vmem:[#allocation5 + $0x6ac] ss:$16 sps:$4 sm:$0xff]  }
 0x3f2   : > { %3994 = vmatprep.subr.bf16.mxu1 %v5898_v5  ;;  %v5971_v5 = vld [vmem:[#allocation5 + $0x6a0] ss:$16 sps:$4 sm:$0xff]  }
 0x3f4   : > { %3831 = vmatpush1.bf16.msra.mxu0 %v5893_v6  ;;  %v5974_v6 = vld [vmem:[#allocation5 + $0x6a8] ss:$16 sps:$4 sm:$0xff]  }
 0x3f5   : > { %3995 = vmatpush1.bf16.msra.mxu1 %v5896_v7  ;;  %3832 = vmatprep.subr.bf16.mxu0 %v5901_v8  ;;  %v5979_v7 = vld [vmem:[#allocation5 + $0x6c4] ss:$16 sps:$4 sm:$0xff]   ;;  %v5982_v8 = vld [vmem:[#allocation5 + $0x6cc] ss:$16 sps:$4 sm:$0xff]  }
 0x3f6   : > { %3996 = vmatprep.subr.bf16.mxu1 %v5904_v10  ;;  %v5977_v10 = vld [vmem:[#allocation5 + $0x6c0] ss:$16 sps:$4 sm:$0xff]  }
 0x3f8   : > { %3833 = vmatpush1.bf16.msra.mxu0 %v5899_v11  ;;  %v5980_v11 = vld [vmem:[#allocation5 + $0x6c8] ss:$16 sps:$4 sm:$0xff]  }
 0x3f9   : > { %3997 = vmatpush1.bf16.msra.mxu1 %v5902_v32  ;;  %3834 = vmatprep.subr.bf16.mxu0 %v5907_v55  ;;  %v5985_v32 = vld [vmem:[#allocation5 + $0x6e4] ss:$16 sps:$4 sm:$0xff]   ;;  %v5988_v55 = vld [vmem:[#allocation5 + $0x6ec] ss:$16 sps:$4 sm:$0xff]  }
 0x3fa   : > { %3998 = vmatprep.subr.bf16.mxu1 %v5910_v56  ;;  %v5983_v56 = vld [vmem:[#allocation5 + $0x6e0] ss:$16 sps:$4 sm:$0xff]  }
 0x3fc   : > { %3835 = vmatpush1.bf16.msra.mxu0 %v5905_v42  ;;  %v5986_v42 = vld [vmem:[#allocation5 + $0x6e8] ss:$16 sps:$4 sm:$0xff]  }
 0x3fd   : > { %3999 = vmatpush1.bf16.msra.mxu1 %v5908_v48  ;;  %3836 = vmatprep.subr.bf16.mxu0 %v5913_v12  ;;  %v5991_v48 = vld [vmem:[#allocation5 + $0x704] ss:$16 sps:$4 sm:$0xff]   ;;  %v5994_v12 = vld [vmem:[#allocation5 + $0x70c] ss:$16 sps:$4 sm:$0xff]  }
 0x3fe   : > { %4000 = vmatprep.subr.bf16.mxu1 %v5916_v13  ;;  %v5989_v13 = vld [vmem:[#allocation5 + $0x700] ss:$16 sps:$4 sm:$0xff]  }
 0x400   : > { %3837 = vmatpush1.bf16.msra.mxu0 %v5911_v14  ;;  %v5992_v14 = vld [vmem:[#allocation5 + $0x708] ss:$16 sps:$4 sm:$0xff]  }
 0x401   : > { %4001 = vmatpush1.bf16.msra.mxu1 %v5914_v15  ;;  %3838 = vmatprep.subr.bf16.mxu0 %v5919_v16  ;;  %v5997_v15 = vld [vmem:[#allocation5 + $0x724] ss:$16 sps:$4 sm:$0xff]   ;;  %v6000_v16 = vld [vmem:[#allocation5 + $0x72c] ss:$16 sps:$4 sm:$0xff]  }
 0x402   : > { %4002 = vmatprep.subr.bf16.mxu1 %v5922_v17  ;;  %v5995_v17 = vld [vmem:[#allocation5 + $0x720] ss:$16 sps:$4 sm:$0xff]  }
 0x404   : > { %3839 = vmatpush1.bf16.msra.mxu0 %v5917_v18  ;;  %v5998_v18 = vld [vmem:[#allocation5 + $0x728] ss:$16 sps:$4 sm:$0xff]  }
 0x405   : > { %4003 = vmatpush1.bf16.msra.mxu1 %v5920_v19  ;;  %3840 = vmatprep.subr.bf16.mxu0 %v5925_v20  ;;  %v6003_v19 = vld [vmem:[#allocation5 + $0x744] ss:$16 sps:$4 sm:$0xff]   ;;  %v6006_v20 = vld [vmem:[#allocation5 + $0x74c] ss:$16 sps:$4 sm:$0xff]  }
 0x406   : > { %4004 = vmatprep.subr.bf16.mxu1 %v5928_v21  ;;  %v6001_v21 = vld [vmem:[#allocation5 + $0x740] ss:$16 sps:$4 sm:$0xff]  }
 0x408   : > { %3841 = vmatpush1.bf16.msra.mxu0 %v5923_v23  ;;  %v6004_v23 = vld [vmem:[#allocation5 + $0x748] ss:$16 sps:$4 sm:$0xff]  }
 0x409   : > { %4005 = vmatpush1.bf16.msra.mxu1 %v5926_v24  ;;  %3842 = vmatprep.subr.bf16.mxu0 %v5931_v25  ;;  %v6009_v24 = vld [vmem:[#allocation5 + $0x764] ss:$16 sps:$4 sm:$0xff]   ;;  %v6012_v25 = vld [vmem:[#allocation5 + $0x76c] ss:$16 sps:$4 sm:$0xff]  }
 0x40a   : > { %4006 = vmatprep.subr.bf16.mxu1 %v5934_v26  ;;  %v6007_v26 = vld [vmem:[#allocation5 + $0x760] ss:$16 sps:$4 sm:$0xff]  }
 0x40c   : > { %3843 = vmatpush1.bf16.msra.mxu0 %v5929_v27  ;;  %v6010_v27 = vld [vmem:[#allocation5 + $0x768] ss:$16 sps:$4 sm:$0xff]  }
 0x40d   : > { %4007 = vmatpush1.bf16.msra.mxu1 %v5932_v28  ;;  %3844 = vmatprep.subr.bf16.mxu0 %v5937_v35  ;;  %v6015_v28 = vld [vmem:[#allocation5 + $0x784] ss:$16 sps:$4 sm:$0xff]   ;;  %v6018_v35 = vld [vmem:[#allocation5 + $0x78c] ss:$16 sps:$4 sm:$0xff]  }
 0x40e   : > { %4008 = vmatprep.subr.bf16.mxu1 %v5940_v36  ;;  %v6013_v36 = vld [vmem:[#allocation5 + $0x780] ss:$16 sps:$4 sm:$0xff]  }
 0x410   : > { %3845 = vmatpush1.bf16.msra.mxu0 %v5935_v37  ;;  %v6016_v37 = vld [vmem:[#allocation5 + $0x788] ss:$16 sps:$4 sm:$0xff]  }
 0x411   : > { %4009 = vmatpush1.bf16.msra.mxu1 %v5938_v38  ;;  %3855 = vmatprep.subr.bf16.mxu0 %v5943_v51  ;;  %v6021_v38 = vld [vmem:[#allocation5 + $0x7a4] ss:$16 sps:$4 sm:$0xff]   ;;  %v6019_v51 = vld [vmem:[#allocation5 + $0x7a0] ss:$16 sps:$4 sm:$0xff]  }
 0x412   : > { %4019 = vmatprep.subr.bf16.mxu1 %v5946_v39  ;;  %v6022_v39 = vld [vmem:[#allocation5 + $0x7a8] ss:$16 sps:$4 sm:$0xff]  }
 0x413   : > { %3847 = vmatmul.mubr.bf16.vlgmr.msra.gmra.mrb[8].mxu0 %v2170_v49 }
 0x414   : > { %4011 = vmatmul.mubr.bf16.vlgmr.msra.gmra.mrb[72].mxu1 %v2170_v49  ;;  %3856 = vmatpush1.bf16.msra.mxu0 %v5941_v45  ;;  %v6030_v45 = vld [vmem:[#allocation5 + $0x7cc] ss:$16 sps:$4 sm:$0xff]   ;;  %v6025_v49 = vld [vmem:[#allocation5 + $0x7c0] ss:$16 sps:$4 sm:$0xff]  }
 0x415   : > { %3887 = vmatprep.mubr.bf16.mxu0 %v2173_v43  ;;  %4020 = vmatpush1.bf16.msra.mxu1 %v5944_v50  ;;  %v6028_v50 = vld [vmem:[#allocation5 + $0x7c8] ss:$16 sps:$4 sm:$0xff]  }
 0x416   : > { %4051 = vmatprep.mubr.bf16.mxu1 %v2173_v43  ;;  %3857 = vmatprep.subr.bf16.mxu0 %v5949_v52  ;;  %v6033_v52 = vld [vmem:[#allocation5 + $0x7e4] ss:$16 sps:$4 sm:$0xff]   ;;  %v6036_v43 = vld [vmem:[#allocation5 + $0x7ec] ss:$16 sps:$4 sm:$0xff]  }
 0x417   : > { %4021 = vmatprep.subr.bf16.mxu1 %v5952_v44  ;;  %v6031_v44 = vld [vmem:[#allocation5 + $0x7e0] ss:$16 sps:$4 sm:$0xff]  }
 0x418   : > { %3858 = vmatpush1.bf16.msra.mxu0 %v5947_v53  ;;  %v6034_v53 = vld [vmem:[#allocation5 + $0x7e8] ss:$16 sps:$4 sm:$0xff]  }
 0x419   : > { %4022 = vmatpush1.bf16.msra.mxu1 %v5950_v46  ;;  %3859 = vmatprep.subr.bf16.mxu0 %v5955_v47  ;;  %v2153_v46 = vrot.slane %v6823_v9, %v1399_v54  ;;  %v6039_v47 = vld [vmem:[#allocation7 + $0x4] ss:$8 sps:$4 sm:$0xff]   ;;  %v6046_v54 = vld [vmem:[#allocation7 + $0x30] ss:$8 sps:$4 sm:$0xff]  }
 0x41a   : > { %4023 = vmatprep.subr.bf16.mxu1 %v5958_v41  ;;  %v6037_v41 = vld [vmem:[#allocation7] ss:$8 sps:$4 sm:$0xff]   ;;  %v6051_v9 = vld [vmem:[#allocation7 + $0x44] ss:$8 sps:$4 sm:$0xff]  }
 0x41c   : > { %3860 = vmatpush1.bf16.msra.mxu0 %v5953_v58  ;;  %v2172_v58 = vpack.c.bf16 %v2153_v46, %v2153_v46 }
 0x41d   : > { %4024 = vmatpush1.bf16.msra.mxu1 %v5956_v59  ;;  %3861 = vmatprep.subr.bf16.mxu0 %v5961_v60  ;;  %v6042_v59 = vld [vmem:[#allocation7 + $0x14] ss:$8 sps:$4 sm:$0xff]   ;;  %v6040_v60 = vld [vmem:[#allocation7 + $0x10] ss:$8 sps:$4 sm:$0xff]  }
 0x41e   : > { %4025 = vmatprep.subr.bf16.mxu1 %v5964_v61  ;;  %v6045_v61 = vld [vmem:[#allocation7 + $0x24] ss:$8 sps:$4 sm:$0xff]  }
 0x420   : > { %3862 = vmatpush1.bf16.msra.mxu0 %v5959_v62  ;;  %v6043_v62 = vld [vmem:[#allocation7 + $0x20] ss:$8 sps:$4 sm:$0xff]  }
 0x421   : > { %4026 = vmatpush1.bf16.msra.mxu1 %v5962_v22  ;;  %3863 = vmatprep.subr.bf16.mxu0 %v5967_v63  ;;  %v6049_v22 = vld [vmem:[#allocation7 + $0x40] ss:$8 sps:$4 sm:$0xff]   ;;  %v6054_v63 = vld [vmem:[#allocation7 + $0x54] ss:$8 sps:$4 sm:$0xff]  }
 0x422   : > { %4027 = vmatprep.subr.bf16.mxu1 %v5970_v0  ;;  %v6052_v0 = vld [vmem:[#allocation7 + $0x50] ss:$8 sps:$4 sm:$0xff]  }
 0x424   : > { %3864 = vmatpush1.bf16.msra.mxu0 %v5965_v1  ;;  %v6057_v1 = vld [vmem:[#allocation7 + $0x64] ss:$8 sps:$4 sm:$0xff]  }
 0x425   : > { %4028 = vmatpush1.bf16.msra.mxu1 %v5968_v2  ;;  %3865 = vmatprep.subr.bf16.mxu0 %v5973_v3  ;;  %v6055_v2 = vld [vmem:[#allocation7 + $0x60] ss:$8 sps:$4 sm:$0xff]   ;;  %v6060_v3 = vld [vmem:[#allocation7 + $0x74] ss:$8 sps:$4 sm:$0xff]  }
 0x426   : > { %4029 = vmatprep.subr.bf16.mxu1 %v5976_v4  ;;  %v6058_v4 = vld [vmem:[#allocation7 + $0x70] ss:$8 sps:$4 sm:$0xff]  }
 0x428   : > { %3866 = vmatpush1.bf16.msra.mxu0 %v5971_v5  ;;  %v6063_v5 = vld [vmem:[#allocation7 + $0x84] ss:$8 sps:$4 sm:$0xff]  }
 0x429   : > { %4030 = vmatpush1.bf16.msra.mxu1 %v5974_v6  ;;  %3867 = vmatprep.subr.bf16.mxu0 %v5979_v7  ;;  %v6061_v6 = vld [vmem:[#allocation7 + $0x80] ss:$8 sps:$4 sm:$0xff]   ;;  %v6066_v7 = vld [vmem:[#allocation7 + $0x94] ss:$8 sps:$4 sm:$0xff]  }
 0x42a   : > { %4031 = vmatprep.subr.bf16.mxu1 %v5982_v8  ;;  %v6064_v8 = vld [vmem:[#allocation7 + $0x90] ss:$8 sps:$4 sm:$0xff]  }
 0x42c   : > { %3868 = vmatpush1.bf16.msra.mxu0 %v5977_v10  ;;  %v6069_v10 = vld [vmem:[#allocation7 + $0xa4] ss:$8 sps:$4 sm:$0xff]  }
 0x42d   : > { %4032 = vmatpush1.bf16.msra.mxu1 %v5980_v11  ;;  %3869 = vmatprep.subr.bf16.mxu0 %v5985_v32  ;;  %v6067_v11 = vld [vmem:[#allocation7 + $0xa0] ss:$8 sps:$4 sm:$0xff]   ;;  %v6072_v32 = vld [vmem:[#allocation7 + $0xb4] ss:$8 sps:$4 sm:$0xff]  }
 0x42e   : > { %4033 = vmatprep.subr.bf16.mxu1 %v5988_v55  ;;  %v6070_v55 = vld [vmem:[#allocation7 + $0xb0] ss:$8 sps:$4 sm:$0xff]  }
 0x430   : > { %3870 = vmatpush1.bf16.msra.mxu0 %v5983_v56  ;;  %v6075_v56 = vld [vmem:[#allocation7 + $0xc4] ss:$8 sps:$4 sm:$0xff]  }
 0x431   : > { %4034 = vmatpush1.bf16.msra.mxu1 %v5986_v42  ;;  %3871 = vmatprep.subr.bf16.mxu0 %v5991_v48  ;;  %v6073_v42 = vld [vmem:[#allocation7 + $0xc0] ss:$8 sps:$4 sm:$0xff]   ;;  %v6078_v48 = vld [vmem:[#allocation7 + $0xd4] ss:$8 sps:$4 sm:$0xff]  }
 0x432   : > { %4035 = vmatprep.subr.bf16.mxu1 %v5994_v12  ;;  %v6076_v12 = vld [vmem:[#allocation7 + $0xd0] ss:$8 sps:$4 sm:$0xff]  }
 0x434   : > { %3872 = vmatpush1.bf16.msra.mxu0 %v5989_v13  ;;  %v6081_v13 = vld [vmem:[#allocation7 + $0xe4] ss:$8 sps:$4 sm:$0xff]  }
 0x435   : > { %4036 = vmatpush1.bf16.msra.mxu1 %v5992_v14  ;;  %3873 = vmatprep.subr.bf16.mxu0 %v5997_v15  ;;  %v6079_v14 = vld [vmem:[#allocation7 + $0xe0] ss:$8 sps:$4 sm:$0xff]   ;;  %v6084_v15 = vld [vmem:[#allocation7 + $0xf4] ss:$8 sps:$4 sm:$0xff]  }
 0x436   : > { %4037 = vmatprep.subr.bf16.mxu1 %v6000_v16  ;;  %v6082_v16 = vld [vmem:[#allocation7 + $0xf0] ss:$8 sps:$4 sm:$0xff]  }
 0x438   : > { %3874 = vmatpush1.bf16.msra.mxu0 %v5995_v17  ;;  %v6087_v17 = vld [vmem:[#allocation7 + $0x104] ss:$8 sps:$4 sm:$0xff]  }
 0x439   : > { %4038 = vmatpush1.bf16.msra.mxu1 %v5998_v18  ;;  %3875 = vmatprep.subr.bf16.mxu0 %v6003_v19  ;;  %v6133_v18 = vld [vmem:[%s7010_s11 + $0x40] sm:$0xff]  }
 0x43a   : > { %4039 = vmatprep.subr.bf16.mxu1 %v6006_v20  ;;  %v6134_v19 = vld [vmem:[%s7010_s11] sm:$0xff]   ;;  %v6135_v20 = vld [vmem:[%s7010_s11 + $0x48] sm:$0xff]  }
 0x43c   : > { %3876 = vmatpush1.bf16.msra.mxu0 %v6001_v21  ;;  %v6136_v21 = vld [vmem:[%s7010_s11 + $0x8] sm:$0xff]  }
 0x43d   : > { %4040 = vmatpush1.bf16.msra.mxu1 %v6004_v23  ;;  %3877 = vmatprep.subr.bf16.mxu0 %v6009_v24  ;;  %v6137_v23 = vld [vmem:[%s7010_s11 + $0x50] sm:$0xff]  }
 0x43e   : > { %4041 = vmatprep.subr.bf16.mxu1 %v6012_v25  ;;  %v6138_v24 = vld [vmem:[%s7010_s11 + $0x10] sm:$0xff]   ;;  %v6139_v25 = vld [vmem:[%s7010_s11 + $0x58] sm:$0xff]  }
 0x440   : > { %3878 = vmatpush1.bf16.msra.mxu0 %v6007_v26  ;;  %v6140_v26 = vld [vmem:[%s7010_s11 + $0x18] sm:$0xff]  }
 0x441   : > { %4042 = vmatpush1.bf16.msra.mxu1 %v6010_v27  ;;  %3879 = vmatprep.subr.bf16.mxu0 %v6015_v28  ;;  %v6141_v27 = vld [vmem:[%s7010_s11 + $0x60] sm:$0xff]  }
 0x442   : > { %4043 = vmatprep.subr.bf16.mxu1 %v6018_v35  ;;  %v6142_v28 = vld [vmem:[%s7010_s11 + $0x20] sm:$0xff]   ;;  %v6143_v35 = vld [vmem:[%s7010_s11 + $0x68] sm:$0xff]  }
 0x444   : > { %3880 = vmatpush1.bf16.msra.mxu0 %v6013_v36  ;;  %v6885_v36 = vld [vmem:[%s7007_s8] sm:$0xf] }
 0x445   : > { %4044 = vmatpush1.bf16.msra.mxu1 %v6016_v37  ;;  %3881 = vmatprep.subr.bf16.mxu0 %v6021_v38  ;;  %v3715_v37 = vrot.slane %v6885_v36, %v6761_v30  ;;  %v3719_v38 = vrot.slane %v6885_v36, %v6772_v33 }
 0x446   : > { %4045 = vmatprep.subr.bf16.mxu1 %v6024_v57  ;;  %v3727_v57 = vrot.slane %v6885_v36, %v6775_v34  ;;  %v6085_v34 = vld [vmem:[#allocation7 + $0x100] ss:$8 sps:$4 sm:$0xff]  }
 0x448   : > { %3882 = vmatpush1.bf16.msra.mxu0 %v6019_v51 }
 0x449   : > { %4046 = vmatpush1.bf16.msra.mxu1 %v6022_v39  ;;  %3883 = vmatprep.subr.bf16.mxu0 %v6027_v40 }
 0x44a   : > { %4047 = vmatprep.subr.bf16.mxu1 %v6030_v45 }
 0x44c   : > { %3884 = vmatpush1.bf16.msra.mxu0 %v6025_v49 }
 0x44d   : > { %4048 = vmatpush1.bf16.msra.mxu1 %v6028_v50  ;;  %3885 = vmatprep.subr.bf16.mxu0 %v6033_v52 }
 0x44e   : > { %4049 = vmatprep.subr.bf16.mxu1 %v6036_v43 }
 0x450   : > { %3886 = vmatpush1.bf16.msra.mxu0 %v6031_v44 }
 0x451   : > { %4050 = vmatpush1.bf16.msra.mxu1 %v6034_v53  ;;  %4468 = vmatprep.subr.bf16.mxu0 %v6039_v47 }
 0x452   : > { %5403 = vmatprep.subr.bf16.mxu1 %v6133_v18  ;;  %v6126_v18 = vld [vmem:[#allocation7 + $0x1d4] ss:$8 sps:$4 sm:$0xff]  }
 0x453   : > { %3888 = vmatmul.mubr.bf16.vlgmr.msra.gmra.mrb[8].mxu0 %v2172_v58 }
 0x454   : > { %4052 = vmatmul.mubr.bf16.vlgmr.msra.gmra.mrb[72].mxu1 %v2172_v58  ;;  %4469 = vmatpush1.bf16.msra.mxu0 %v6037_v41 }
 0x455   : > { %4470 = vmatprep.subr.bf16.mxu0 %v6042_v59  ;;  %5404 = vmatpush3.bf16.msra.mxu1 %v6134_v19  ;;  %v6124_v19 = vld [vmem:[#allocation7 + $0x1d0] ss:$8 sps:$4 sm:$0xff]  }
 0x456   : > { %5405 = vmatprep.subr.bf16.mxu1 %v6135_v20 }
 0x458   : > { %4471 = vmatpush1.bf16.msra.mxu0 %v6040_v60 }
 0x459   : > { %4472 = vmatprep.subr.bf16.mxu0 %v6045_v61  ;;  %5406 = vmatpush3.bf16.msra.mxu1 %v6136_v21  ;;  %v6129_v21 = vld [vmem:[#allocation7 + $0x1e4] ss:$8 sps:$4 sm:$0xff]  }
 0x45a   : > { %5407 = vmatprep.subr.bf16.mxu1 %v6137_v23  ;;  %v6127_v23 = vld [vmem:[#allocation7 + $0x1e0] ss:$8 sps:$4 sm:$0xff]  }
 0x45c   : > { %4473 = vmatpush1.bf16.msra.mxu0 %v6043_v62 }
 0x45d   : > { %4474 = vmatprep.subr.bf16.mxu0 %v6048_v29  ;;  %5408 = vmatpush3.bf16.msra.mxu1 %v6138_v24 }
 0x45e   : > { %5409 = vmatprep.subr.bf16.mxu1 %v6139_v25  ;;  %v6132_v25 = vld [vmem:[#allocation7 + $0x1f4] ss:$8 sps:$4 sm:$0xff]  }
 0x460   : > { %4475 = vmatpush1.bf16.msra.mxu0 %v6046_v54  ;;  %v6090_v54 = vld [vmem:[#allocation7 + $0x114] ss:$8 sps:$4 sm:$0xff]  }
 0x461   : > { %4476 = vmatprep.subr.bf16.mxu0 %v6051_v9  ;;  %5410 = vmatpush3.bf16.msra.mxu1 %v6140_v26  ;;  %v6130_v26 = vld [vmem:[#allocation7 + $0x1f0] ss:$8 sps:$4 sm:$0xff]  }
 0x462   : > { %5411 = vmatprep.subr.bf16.mxu1 %v6141_v27 }
 0x464   : > { %4477 = vmatpush1.bf16.msra.mxu0 %v6049_v22  ;;  %v6088_v22 = vld [vmem:[#allocation7 + $0x110] ss:$8 sps:$4 sm:$0xff]  }
 0x465   : > { %4478 = vmatprep.subr.bf16.mxu0 %v6054_v63  ;;  %5412 = vmatpush3.bf16.msra.mxu1 %v6142_v28  ;;  %v6093_v63 = vld [vmem:[#allocation7 + $0x124] ss:$8 sps:$4 sm:$0xff]  }
 0x466   : > { %5413 = vmatprep.subr.bf16.mxu1 %v6143_v35  ;;  %v6145_v35 = vld [vmem:[%s7010_s11 + $0x70] sm:$0xff]  }
 0x468   : > { %4479 = vmatpush1.bf16.msra.mxu0 %v6052_v0  ;;  %v6091_v0 = vld [vmem:[#allocation7 + $0x120] ss:$8 sps:$4 sm:$0xff]  }
 0x469   : > { %4480 = vmatprep.subr.bf16.mxu0 %v6057_v1  ;;  %v6096_v1 = vld [vmem:[#allocation7 + $0x134] ss:$8 sps:$4 sm:$0xff]  }
 0x46c   : > { %4481 = vmatpush1.bf16.msra.mxu0 %v6055_v2  ;;  %v6094_v2 = vld [vmem:[#allocation7 + $0x130] ss:$8 sps:$4 sm:$0xff]  }
 0x46d   : > { %4482 = vmatprep.subr.bf16.mxu0 %v6060_v3  ;;  %v6099_v3 = vld [vmem:[#allocation7 + $0x144] ss:$8 sps:$4 sm:$0xff]  }
 0x470   : > { %4483 = vmatpush1.bf16.msra.mxu0 %v6058_v4  ;;  %v6097_v4 = vld [vmem:[#allocation7 + $0x140] ss:$8 sps:$4 sm:$0xff]  }
 0x471   : > { %4484 = vmatprep.subr.bf16.mxu0 %v6063_v5  ;;  %v6102_v5 = vld [vmem:[#allocation7 + $0x154] ss:$8 sps:$4 sm:$0xff]  }
 0x474   : > { %4485 = vmatpush1.bf16.msra.mxu0 %v6061_v6  ;;  %v6100_v6 = vld [vmem:[#allocation7 + $0x150] ss:$8 sps:$4 sm:$0xff]  }
 0x475   : > { %4486 = vmatprep.subr.bf16.mxu0 %v6066_v7  ;;  %v6105_v7 = vld [vmem:[#allocation7 + $0x164] ss:$8 sps:$4 sm:$0xff]  }
 0x478   : > { %4487 = vmatpush1.bf16.msra.mxu0 %v6064_v8  ;;  %v6103_v8 = vld [vmem:[#allocation7 + $0x160] ss:$8 sps:$4 sm:$0xff]  }
 0x479   : > { %4488 = vmatprep.subr.bf16.mxu0 %v6069_v10  ;;  %v6108_v10 = vld [vmem:[#allocation7 + $0x174] ss:$8 sps:$4 sm:$0xff]  }
 0x47c   : > { %4489 = vmatpush1.bf16.msra.mxu0 %v6067_v11  ;;  %v6106_v11 = vld [vmem:[#allocation7 + $0x170] ss:$8 sps:$4 sm:$0xff]  }
 0x47d   : > { %4490 = vmatprep.subr.bf16.mxu0 %v6072_v32  ;;  %v6111_v32 = vld [vmem:[#allocation7 + $0x184] ss:$8 sps:$4 sm:$0xff]  }
 0x480   : > { %4491 = vmatpush1.bf16.msra.mxu0 %v6070_v55  ;;  %v6109_v55 = vld [vmem:[#allocation7 + $0x180] ss:$8 sps:$4 sm:$0xff]  }
 0x481   : > { %4492 = vmatprep.subr.bf16.mxu0 %v6075_v56  ;;  %v6114_v56 = vld [vmem:[#allocation7 + $0x194] ss:$8 sps:$4 sm:$0xff]  }
 0x484   : > { %4493 = vmatpush1.bf16.msra.mxu0 %v6073_v42  ;;  %v6112_v42 = vld [vmem:[#allocation7 + $0x190] ss:$8 sps:$4 sm:$0xff]  }
 0x485   : > { %4494 = vmatprep.subr.bf16.mxu0 %v6078_v48  ;;  %v6117_v48 = vld [vmem:[#allocation7 + $0x1a4] ss:$8 sps:$4 sm:$0xff]  }
 0x488   : > { %4495 = vmatpush1.bf16.msra.mxu0 %v6076_v12  ;;  %v6115_v12 = vld [vmem:[#allocation7 + $0x1a0] ss:$8 sps:$4 sm:$0xff]  }
 0x489   : > { %4496 = vmatprep.subr.bf16.mxu0 %v6081_v13  ;;  %v6120_v13 = vld [vmem:[#allocation7 + $0x1b4] ss:$8 sps:$4 sm:$0xff]  }
 0x48c   : > { %4497 = vmatpush1.bf16.msra.mxu0 %v6079_v14  ;;  %v6118_v14 = vld [vmem:[#allocation7 + $0x1b0] ss:$8 sps:$4 sm:$0xff]  }
 0x48d   : > { %4498 = vmatprep.subr.bf16.mxu0 %v6084_v15  ;;  %v6123_v15 = vld [vmem:[#allocation7 + $0x1c4] ss:$8 sps:$4 sm:$0xff]  }
 0x490   : > { %4499 = vmatpush1.bf16.msra.mxu0 %v6082_v16  ;;  %v6121_v16 = vld [vmem:[#allocation7 + $0x1c0] ss:$8 sps:$4 sm:$0xff]  }
 0x491   : > { %4509 = vmatprep.subr.bf16.mxu0 %v6087_v17  ;;  %v3723_v17 = vrot.slane %v6885_v36, %v6764_v31  ;;  %v6144_v31 = vld [vmem:[%s7010_s11 + $0x28] sm:$0xff]   ;;  %v6146_v36 = vld [vmem:[%s7010_s11 + $0x30] sm:$0xff]  }
 0x492   : > { %5414 = vmatpush3.bf16.msra.mxu1 %v6144_v31 }
 0x493   : > { %5415 = vmatprep.subr.bf16.mxu1 %v6145_v35 }
 0x496   : > { %5416 = vmatpush3.bf16.msra.mxu1 %v6146_v36 }
 0x526   : > { %v3889_v51 = vpop.f32.mrb[8].mxu0 }
 0x527   : > { %v5499_v39 = vadd.f32 %v3889_v51, %v3715_v37  ;;  %v6893_v40 = vpop.f32.mrb[72].mxu1  ;;  %v3891_v45 = vpop.f32.mrb[9].mxu0  ;;  %v6147_v37 = vld [vmem:[%s7010_s11 + $0x78] sm:$0xff]  }
 0x528   : > { %v5500_v49 = vadd.f32 %v3891_v45, %v3719_v38  ;;  %v4055_v50 = vpop.f32.mrb[73].mxu1  ;;  %v3893_v52 = vpop.f32.mrb[10].mxu0  ;;  %v5501_v20 = vadd.f32 %v6893_v40, %v3723_v17  ;;  %v6148_v38 = vld [vmem:[%s7010_s11 + $0x38] sm:$0xff]   ;;  %5417 = vmatprep.subr.bf16.mxu1 %v6147_v37 }
 0x529   : > { %v4060_v43 = vmul.f32 0.2, %v5499_v39  ;;  %v5502_v44 = vadd.f32 %v4055_v50, %v3727_v57  ;;  %v4057_v53 = vpop.f32.mrb[74].mxu1  ;;  %v3894_v46 = vpop.f32.mrb[11].mxu0  ;;  %5418 = vmatpush3.bf16.msra.mxu1 %v6148_v38  ;;  %v4136_v57 = vld [vmem:[%s7009_s10] sm:$0x3] }
 0x52a   : > { %v4061_v47 = vmul.f32 0.2, %v5500_v49  ;;  %v4058_v41 = vpop.f32.mrb[75].mxu1  ;;  %v4062_v24 = vmul.f32 0.2, %v5501_v20  ;;  %v4461_v51 = vrot.slane %v4136_v57, %v6761_v30 }
 0x52b   : > { %v4064_v58 = vmax.f32 %v5499_v39, %v4060_v43  ;;  %v4063_v59 = vmul.f32 0.2, %v5502_v44  ;;  %v4465_v39 = vrot.slane %v4136_v57, %v6772_v33 }
 0x52c   : > { %v4065_v60 = vmax.f32 %v5500_v49, %v4061_v47  ;;  %v4066_v27 = vmax.f32 %v5501_v20, %v4062_v24 }
 0x52d   : > { %v4067_v61 = vmax.f32 %v5502_v44, %v4063_v59  ;;  %v4068_v29 = vpack.c.bf16 %v4064_v58, %v4064_v58 }
 0x52e   : > { %v4069_v62 = vpack.c.bf16 %v4065_v60, %v4065_v60  ;;  %v4070_v28 = vpack.c.bf16 %v4066_v27, %v4066_v27 }
 0x52f   : > { %v4071_v9 = vpack.c.bf16 %v4067_v61, %v4067_v61 }
 0x530   : > { %4500 = vmatprep.mubr.bf16.mxu0 %v4069_v62 }
 0x531   : > { %4501 = vmatmul.mubr.bf16.vlgmr.msra.gmra.mrb[12].mxu0 %v4068_v29 }
 0x532   : > { %4510 = vmatpush1.bf16.msra.mxu0 %v6085_v34  ;;  %4541 = vmatprep.mubr.bf16.mxu0 %v4071_v9 }
 0x533   : > { %4511 = vmatprep.subr.bf16.mxu0 %v6090_v54 }
 0x536   : > { %4512 = vmatpush1.bf16.msra.mxu0 %v6088_v22 }
 0x537   : > { %4513 = vmatprep.subr.bf16.mxu0 %v6093_v63 }
 0x53a   : > { %4514 = vmatpush1.bf16.msra.mxu0 %v6091_v0 }
 0x53b   : > { %4515 = vmatprep.subr.bf16.mxu0 %v6096_v1 }
 0x53e   : > { %4516 = vmatpush1.bf16.msra.mxu0 %v6094_v2 }
 0x53f   : > { %4517 = vmatprep.subr.bf16.mxu0 %v6099_v3 }
 0x542   : > { %4518 = vmatpush1.bf16.msra.mxu0 %v6097_v4 }
 0x543   : > { %4519 = vmatprep.subr.bf16.mxu0 %v6102_v5 }
 0x546   : > { %4520 = vmatpush1.bf16.msra.mxu0 %v6100_v6 }
 0x547   : > { %4521 = vmatprep.subr.bf16.mxu0 %v6105_v7 }
 0x54a   : > { %4522 = vmatpush1.bf16.msra.mxu0 %v6103_v8 }
 0x54b   : > { %4523 = vmatprep.subr.bf16.mxu0 %v6108_v10 }
 0x54e   : > { %4524 = vmatpush1.bf16.msra.mxu0 %v6106_v11 }
 0x54f   : > { %4525 = vmatprep.subr.bf16.mxu0 %v6111_v32 }
 0x552   : > { %4526 = vmatpush1.bf16.msra.mxu0 %v6109_v55 }
 0x553   : > { %4527 = vmatprep.subr.bf16.mxu0 %v6114_v56 }
 0x556   : > { %4528 = vmatpush1.bf16.msra.mxu0 %v6112_v42 }
 0x557   : > { %4529 = vmatprep.subr.bf16.mxu0 %v6117_v48 }
 0x55a   : > { %4530 = vmatpush1.bf16.msra.mxu0 %v6115_v12 }
 0x55b   : > { %4531 = vmatprep.subr.bf16.mxu0 %v6120_v13 }
 0x55e   : > { %4532 = vmatpush1.bf16.msra.mxu0 %v6118_v14 }
 0x55f   : > { %4533 = vmatprep.subr.bf16.mxu0 %v6123_v15 }
 0x562   : > { %4534 = vmatpush1.bf16.msra.mxu0 %v6121_v16 }
 0x563   : > { %4535 = vmatprep.subr.bf16.mxu0 %v6126_v18 }
 0x566   : > { %4536 = vmatpush1.bf16.msra.mxu0 %v6124_v19 }
 0x567   : > { %4537 = vmatprep.subr.bf16.mxu0 %v6129_v21 }
 0x56a   : > { %4538 = vmatpush1.bf16.msra.mxu0 %v6127_v23 }
 0x56b   : > { %4539 = vmatprep.subr.bf16.mxu0 %v6132_v25 }
 0x56e   : > { %4540 = vmatpush1.bf16.msra.mxu0 %v6130_v26 }
 0x571   : > { %4542 = vmatmul.mubr.bf16.vlgmr.msra.gmra.mrb[12].mxu0 %v4070_v28 }
 0x644   : > { %v4543_v40 = vpop.f32.mrb[12].mxu0 }
 0x645   : > { %v5503_v45 = vadd.f32 %v4543_v40, %v4461_v51  ;;  %v4545_v49 = vpop.f32.mrb[13].mxu0 }
 0x646   : > { %v5504_v50 = vadd.f32 %v4545_v49, %v4465_v39  ;;  %v4547_v52 = vpop.f32.mrb[14].mxu0 }
 0x647   : > { %v4550_v43 = vmul.f32 0.2, %v5503_v45  ;;  %v4548_v44 = vpop.f32.mrb[15].mxu0 }
 0x648   : > { %v4551_v53 = vmul.f32 0.2, %v5504_v50 }
 0x649   : > { %v4552_v46 = vmax.f32 %v5503_v45, %v4550_v43 }
 0x64a   : > { %v4553_v47 = vmax.f32 %v5504_v50, %v4551_v53 }
 0x64b   : > { %v4554_v58 = vpack.c.bf16 %v4552_v46, %v4552_v46 }
 0x64c   : > { %v4555_v41 = vpack.c.bf16 %v4553_v47, %v4553_v47 }
 0x64e   : > { %4717 = vmatprep.mubr.bf16.mxu1 %v4555_v41 }
 0x64f   : > { %4718 = vmatmul.mubr.bf16.vlgmr.msra.gmra.mrb[76].mxu1 %v4554_v58 }
 0x650   : > { %6246 = shalt.err (!%p6243_p6)
}
 0x651   : > { %s6247_s28 = scalar_lea.hbm %s6923_s23, 128  ;;  %s6251_s26 = scalar_lea.hbm %s7051_s14, 256 }
 0x652   : > { %p6248_p7 = scmp.ne.s32.totalorder %s6923_s23, %s6247_s28  ;;  %p6252_p4 = scmp.lt.u32.totalorder %s6923_s23, %s7051_s14 }
 0x653   : > { %p6253_p8 = scmp.lt.u32.totalorder %s6251_s26, %s6247_s28  ;;  %p6255_p13 = scmp.lt.u32.totalorder %s6247_s28, %s6923_s23 }
 0x654   : > { %p6249_p9 = pnand %p6248_p7, %p7052_p10 }
 0x655   : > { %p6254_p1 = por %p6253_p8, %p6252_p4 }
 0x656   : > { %p6250_p12 = pneg %p6249_p9 }
 0x657   : > { %p6256_p11 = por %p6255_p13, %p6254_p1 }
 0x659   : > { %p6257_p0 = pnand %p6256_p11, %p6250_p12 }
 0x65b   : > { %6260 = shalt.err (!%p6257_p0)
}
 0x65c   : > { %5547 = dma.vmem_to_hbm [thread:$0]  (%p7052_p10), %s4759_s13, 128, %s6923_s23, %s4731_s7  }
 0x65d   : > { %s7053_s21 = sld [smem:[#allocation24_spill]]  ;;  %s5359_s20 = sshll.u32 %s6343_s16, 4 }
 0x65e   : > { %s530_s27 = scalar_lea.vmem [#allocation8], %s6813_s24  ;;  %s7054_s18 = sld [smem:[#allocation25_spill]] }
 0x65f   : > { %s4744_s29 = sshll.u32 %s530_s27, 4  ;;  %s4727_s13 = scalar_lea.sflag [#allocation4], %s6813_s24  ;;  %s6953_s29 = int_to_ptr.vmem [resolvable:$true] %s4744_s29 }
 0x660   : > { %s6261_s23 = scalar_lea.vmem %s6953_s29, 16  ;;  %s6365_s16 = smov [#allocation8]  }
 0x661   : > { %p6262_p2 = scmp.ne.s32.totalorder %s6953_s29, %s6261_s23  ;;  %s6265_s7 = sshll.u32 %s6365_s16, 4  ;;  %s6266_s7 = int_to_ptr.vmem [resolvable:$false] %s6265_s7 }
 0x662   : > { %s6267_s15 = scalar_lea.vmem %s6266_s7, 32  ;;  %p6268_p6 = scmp.lt.s32.totalorder %s6953_s29, %s6266_s7 }
 0x663   : > { %v4588_v33 = vld [vmem:[%s7053_s21] sm:$0x1]  ;;  %p6263_p3 = pnand %p6262_p2, %p7052_p10  ;;  %p6269_p7 = scmp.lt.s32.totalorder %s6267_s15, %s6261_s23 }
 0x664   : > { %s7055_s26 = smov %s7054_s18  ;;  %s6951_s22 = scalar_lea.hbm %s7054_s18, %s5359_s20 }
 0x665   : > { %p6264_p5 = pneg %p6263_p3  ;;  %p6270_p9 = por %p6269_p7, %p6268_p6 }
 0x667   : > { %p6271_p12 = pnand %p6270_p9, %p6264_p5 }
 0x722   : > { %v5419_v30 = vpop.f32.mrb[76].mxu1 }
 0x723   : > { %v5420_v59 = vpop.f32.mrb[77].mxu1 }
 0x724   : > { %v5421_v60 = vadd.f32 %v5420_v59, %v5419_v30  ;;  %v5422_v61 = vpop.f32.mrb[78].mxu1 }
 0x725   : > { %v5423_v62 = vpop.f32.mrb[79].mxu1 }
 0x726   : > { %v4720_v34 = vadd.f32 %v5421_v60, %v4588_v33 }
 0x728   : > { %4725 = vst [vmem:[%s530_s27] sm:$0x1] %v4720_v34 }
 0x729   : > { %6274 = shalt.err (!%p6271_p12)
}
 0x72a   : > { %s6275_s24 = scalar_lea.hbm %s6951_s22, 16  ;;  %s6279_s21 = scalar_lea.hbm %s7055_s26, 32 }
 0x72b   : > { %p6276_p4 = scmp.ne.s32.totalorder %s6951_s22, %s6275_s24  ;;  %p6280_p13 = scmp.lt.u32.totalorder %s6951_s22, %s7055_s26 }
 0x72c   : > { %p6281_p11 = scmp.lt.u32.totalorder %s6279_s21, %s6275_s24  ;;  %p6283_p2 = scmp.lt.u32.totalorder %s6275_s24, %s6951_s22 }
 0x72d   : > { %p6277_p8 = pnand %p6276_p4, %p7052_p10 }
 0x72e   : > { %p6282_p0 = por %p6281_p11, %p6280_p13 }
 0x72f   : > { %p6278_p1 = pneg %p6277_p8 }
 0x730   : > { %p6284_p3 = por %p6283_p2, %p6282_p0 }
 0x732   : > { %p6285_p5 = pnand %p6284_p3, %p6278_p1 }
 0x734   : > { %6288 = shalt.err (!%p6285_p5)
}
 0x735   : > { %5546 = dma.vmem_to_hbm [thread:$0]  (%p7052_p10), %s6953_s29, 16, %s6951_s22, %s4727_s13  }
 0x736 PF: > { %s7056_s28 = sld [smem:[#allocation18_spill]]  ;;  %s7057_s25 = sld [smem:[#allocation15_spill]] }
 0x737   : > { %s7058_s18 = sld [smem:[#allocation21_spill]] }
 0x73c   : > { %p5573_p6 = scmp.ge.s32.totalorder %s7056_s28, 2  ;;  %s4770_s23 = sand.u32 1, %s7057_s25  }
 0x73d   : > { %p7059_p7 = scmp.ne.s32.totalorder %s7058_s18, 0  ;;  %s4771_s16 = scalar_lea.sflag [#allocation4], %s4770_s23 }
 0x73f   : > { %p5561_p9 = pnand %p5573_p6, %p7059_p7 }
 0x741   : > { %6322 = dma.done.wait (!%p5561_p9), %s4771_s16, 16  }
 0x742   : > { %6324 = vsyncadd (!%p5561_p9), %s4771_s16, 4294967280  ;;  %s4779_s7 = scalar_lea.sflag [#allocation10], %s4770_s23 }
 0x743   : > { %6326 = dma.done.wait (!%p5561_p9), %s4779_s7, 128  }
 0x744   : > { %6328 = vsyncadd (!%p5561_p9), %s4779_s7, 4294967168  ;;  %s33_s18 = sadd.s32 1, %s7056_s28   ;;  %s7060_s19 = sld [smem:[#allocation16_spill]] }
 0x745   : > { %p30_p12 = scmp.ge.s32.totalorder %s33_s18, 4   ;;  %s7061_s15 = sld [smem:[#allocation22_spill]] }
 0x746   : > { %s7062_s16 = sld [smem:[#allocation17_spill]]  ;;  %s7063_s17 = sld [smem:[#allocation19_spill]] }
 0x747   : > { %s7064_s29 = smov %s6335_s30  ;;  %32 = sbr.rel (!%p30_p12) target bundleno = 13 (0xd), region = 149 }
 0x74a   : > { %s7065_s30 = smov %s7060_s19 }
 0x74e   :  { %4784 = vsyncpa [#allocation3], 1 }
 0x74f   :  { %4786 = vsyncpa [#allocation3 + $0x1], 1 }
 0x750   :  { %4787 = vsyncpa [#allocation6], 1 }
 0x751   :  { %4788 = vsyncpa [#allocation4], 1 }
 0x752   :  { %4790 = vsyncpa [#allocation4 + $0x1], 1 }
 0x753   :  { %4791 = vsyncpa [#allocation10], 1 }
 0x754   :  { %4793 = vsyncpa [#allocation10 + $0x1], 1 }

</bundles_post_ra>
